<compile_context>
chip_gen: v6e
topology: v6e:2x2x1
jax: 0.10.0
libtpu: 0.0.40
codegen_flags: <defaults>
</compile_context>

<pallas_src>
import math

import jax
import jax.numpy as jnp
from jax import lax
from jax.experimental import pallas as pl
from jax.experimental.pallas import tpu as pltpu

D = 512            # embed dim of the combination function
NUM_HEADS = 8      # nn.MultiheadAttention(512, 8)
HEAD_DIM = D // NUM_HEADS
SCALE = 1.0 / math.sqrt(HEAD_DIM)
LQ_PAD = 8         # preseqlen (5) padded to a full sublane tile


def _combine_attn_kernel(q_ref, kv_ref, wq_ref, wkv_ref, wo_ref, bq_ref, bout_ref, out_ref):
    """One grid step == one (layer, prompt-slot) combination attention.

    q_ref   : (LQ_PAD, D)        bf16  padded query embedding rows for this query_id
    kv_ref  : (1, B*Lkv, D)      bf16  concatenated / transposed prompts, all batches
    wq_ref  : (D, D)             bf16  fused query proj (external @ in_proj), SCALE folded
    wkv_ref : (D, 2D)            bf16  fused key|value proj, packed side by side
    wo_ref  : (D, D)             bf16  out_proj weight
    bq_ref  : (1, D)             f32   fused query bias (SCALE folded)
    bout_ref: (1, D)             f32   b_v_eff @ W_o + b_o  (k bias cancels in softmax)
    out_ref : (1, B, LQ_PAD, D)  f32
    """
    B = out_ref.shape[1]
    Lq = q_ref.shape[0]
    Lkv = kv_ref.shape[1] // B

    # Full-width projections: K=512 / N>=512 matmuls. Weights stay VMEM-resident across
    # the whole layer grid (constant index_maps), so these only cost MXU time.
    q_proj = jnp.dot(q_ref[...], wq_ref[...], preferred_element_type=jnp.float32)
    q_proj = (q_proj + bq_ref[...]).astype(jnp.bfloat16)                      # (Lq, D)

    kvp = jnp.dot(kv_ref[0], wkv_ref[...],
                  preferred_element_type=jnp.float32).astype(jnp.bfloat16)    # (B*Lkv, 2D)
    k_all = kvp[:, :D]                       # 128-aligned lane slices
    v_all = kvp[:, D:]

    packed = []                              # per-batch (Lq, D) bf16 head-concat
    for b in range(B):                       # B is tiny & static -> unrolled
        kb = k_all[b * Lkv:(b + 1) * Lkv, :]                                  # (Lkv, D)
        vb = v_all[b * Lkv:(b + 1) * Lkv, :]
        oh_parts = []
        for h in range(NUM_HEADS):           # tiny per-head score / PV matmuls
            qh = q_proj[:, h * HEAD_DIM:(h + 1) * HEAD_DIM]                   # (Lq, Dh)
            kh = kb[:, h * HEAD_DIM:(h + 1) * HEAD_DIM]                       # (Lkv, Dh)
            vh = vb[:, h * HEAD_DIM:(h + 1) * HEAD_DIM]
            s = lax.dot_general(qh, kh, (((1,), (1,)), ((), ())),
                                preferred_element_type=jnp.float32)           # (Lq, Lkv)
            s = s - jnp.max(s, axis=-1, keepdims=True)
            p = jnp.exp(s)
            p = p * pl.reciprocal(jnp.sum(p, axis=-1, keepdims=True), approx=True)
            oh = jnp.dot(p.astype(jnp.bfloat16), vh,
                         preferred_element_type=jnp.float32)                  # (Lq, Dh)
            oh_parts.append(oh.astype(jnp.bfloat16))
        packed.append(jnp.concatenate(oh_parts, axis=-1))                     # (Lq, D)

    # Single K=512 out_proj matmul over all batches, folded output bias, lane-dense write.
    o_packed = jnp.concatenate(packed, axis=0)                                # (B*Lq, D)
    out = jnp.dot(o_packed, wo_ref[...], preferred_element_type=jnp.float32)
    out = out + bout_ref[...]
    out_ref[0] = out.reshape(B, Lq, out_ref.shape[-1])


def prepare_fused_params(params):
    """Host-side algebraic fusion: external Linear q/k/v folded into the MHA in_proj,
    SCALE folded into the query path, k/v biases cancelled / folded into b_out."""
    wq_eff = (params['wq_t'] @ params['wqi_t']) * SCALE                       # (D, D)
    wk_eff = params['wk_t'] @ params['wki_t']
    wv_eff = params['wv_t'] @ params['wvi_t']
    bq_eff = (params['bq'] @ params['wqi_t'] + params['bqi']) * SCALE         # (1, D)
    # b_k_eff cancels exactly inside softmax (per-query-row constant) -> dropped.
    bv_eff = params['bv'] @ params['wvi_t'] + params['bvi']                   # (1, D)
    b_out = bv_eff @ params['wo_t'] + params['bo']                            # (1, D)
    return {
        'wq': wq_eff.astype(jnp.bfloat16),                                    # (D, D)
        'wkv': jnp.concatenate([wk_eff, wv_eff], axis=-1).astype(jnp.bfloat16),  # (D, 2D)
        'wo': params['wo_t'].astype(jnp.bfloat16),                            # (D, D)
        'bq': bq_eff.astype(jnp.float32),                                     # (1, D)
        'b_out': b_out.astype(jnp.float32),                                   # (1, D)
    }


@jax.jit
def combine_attention_pallas(q_all, kv_all, fused):
    """q_all: (NQ, LQ_PAD, D) f32; kv_all: (NQ, B, Lkv, D) f32 -> (NQ, B, LQ_PAD, D) f32."""
    NQ, LQP, _ = q_all.shape
    _, B, Lkv, _ = kv_all.shape
    q_flat = q_all.reshape(NQ * LQP, D).astype(jnp.bfloat16)
    kv_flat = kv_all.reshape(NQ, B * Lkv, D).astype(jnp.bfloat16)

    flops = NQ * (2 * LQP * D * D                      # q projection
                  + 2 * (B * Lkv) * D * (2 * D)        # fused k|v projection
                  + B * NUM_HEADS * 4 * LQP * HEAD_DIM * Lkv   # scores + PV
                  + 2 * (B * LQP) * D * D)             # out_proj
    bytes_accessed = ((D * D + D * 2 * D + D * D) * 2 + 2 * D * 4 * 2
                      + NQ * (LQP * D * 2 + B * Lkv * D * 2 + B * LQP * D * 4))
    transcendentals = NQ * B * NUM_HEADS * LQP * Lkv

    return pl.pallas_call(
        _combine_attn_kernel,
        out_shape=jax.ShapeDtypeStruct((NQ, B, LQP, D), jnp.float32),
        grid=(NQ,),
        in_specs=[
            pl.BlockSpec((LQP, D), lambda l: (l, 0)),            # per-step query rows (8 KiB)
            pl.BlockSpec((1, B * Lkv, D), lambda l: (l, 0, 0)),  # per-step kv (~20 KiB)
            pl.BlockSpec((D, D), lambda l: (0, 0)),              # weights: constant index_map
            pl.BlockSpec((D, 2 * D), lambda l: (0, 0)),          #   -> DMA'd exactly once,
            pl.BlockSpec((D, D), lambda l: (0, 0)),              #   resident for all steps
            pl.BlockSpec((1, D), lambda l: (0, 0)),
            pl.BlockSpec((1, D), lambda l: (0, 0)),
        ],
        out_specs=pl.BlockSpec((1, B, LQP, D), lambda l: (l, 0, 0, 0)),
        compiler_params=pltpu.CompilerParams(dimension_semantics=("arbitrary",)),
        cost_estimate=pl.CostEstimate(flops=int(flops),
                                      transcendentals=int(transcendentals),
                                      bytes_accessed=int(bytes_accessed)),
    )(q_flat, kv_flat, fused['wq'], fused['wkv'], fused['wo'], fused['bq'], fused['b_out'])


def combine_attention_fused_ref(q_all, kv_all, fused):
    """Pure-JAX model of the exact fused bf16 computation the kernel performs."""
    NQ, LQP, _ = q_all.shape
    _, B, Lkv, _ = kv_all.shape
    qb = q_all.astype(jnp.bfloat16)
    kvb = kv_all.astype(jnp.bfloat16)
    qp = jnp.einsum('nqd,de->nqe', qb, fused['wq'], preferred_element_type=jnp.float32)
    qp = (qp + fused['bq']).astype(jnp.bfloat16)
    kvp = jnp.einsum('nbkd,de->nbke', kvb, fused['wkv'],
                     preferred_element_type=jnp.float32).astype(jnp.bfloat16)
    k, v = kvp[..., :D], kvp[..., D:]
    qh = qp.reshape(NQ, LQP, NUM_HEADS, HEAD_DIM)
    kh = k.reshape(NQ, B, Lkv, NUM_HEADS, HEAD_DIM)
    vh = v.reshape(NQ, B, Lkv, NUM_HEADS, HEAD_DIM)
    s = jnp.einsum('nqhe,nbkhe->nbhqk', qh, kh, preferred_element_type=jnp.float32)
    p = jax.nn.softmax(s, axis=-1)
    oh = jnp.einsum('nbhqk,nbkhe->nbqhe', p.astype(jnp.bfloat16), vh,
                    preferred_element_type=jnp.float32)
    oh = oh.reshape(NQ, B, LQP, D).astype(jnp.bfloat16)
    out = jnp.einsum('nbqd,de->nbqe', oh, fused['wo'], preferred_element_type=jnp.float32)
    return out + fused['b_out']


def combine_attention_ref(q_all5, kv_all, params):
    """Faithful unfused f32 reference (Linear q/k/v + nn.MultiheadAttention semantics)."""
    NQ, Lq, _ = q_all5.shape
    _, B, Lkv, _ = kv_all.shape
    q = jnp.einsum('nqd,de->nqe', q_all5, params['wq_t']) + params['bq']
    k = jnp.einsum('nbkd,de->nbke', kv_all, params['wk_t']) + params['bk']
    v = jnp.einsum('nbkd,de->nbke', kv_all, params['wv_t']) + params['bv']
    qp = jnp.einsum('nqd,de->nqe', q, params['wqi_t']) + params['bqi']
    kp = jnp.einsum('nbkd,de->nbke', k, params['wki_t']) + params['bki']
    vp = jnp.einsum('nbkd,de->nbke', v, params['wvi_t']) + params['bvi']
    qh = qp.reshape(NQ, Lq, NUM_HEADS, HEAD_DIM)
    kh = kp.reshape(NQ, B, Lkv, NUM_HEADS, HEAD_DIM)
    vh = vp.reshape(NQ, B, Lkv, NUM_HEADS, HEAD_DIM)
    s = jnp.einsum('nqhe,nbkhe->nbhqk', qh, kh) * SCALE
    p = jax.nn.softmax(s, axis=-1)
    oh = jnp.einsum('nbhqk,nbkhe->nbqhe', p, vh).reshape(NQ, B, Lq, D)
    return jnp.einsum('nbqd,de->nbqe', oh, params['wo_t']) + params['bo']


def make_params(key):
    """Deterministic parameter init mirroring CFunctionPrompt.__init__ shapes."""
    ks = jax.random.split(key, 14)
    xav = math.sqrt(2.0 / (D + D))

    def lin_w(k):   # xavier-normal-ish (out, in) weight, stored pre-transposed (x @ W)
        return (jax.random.normal(k, (D, D), jnp.float32) * xav).T

    def bias(k):
        return (jax.random.normal(k, (1, D)) * 0.02).astype(jnp.float32)

    return {
        # external Linear(512, 512) q / k / v
        'wq_t': lin_w(ks[0]), 'bq': bias(ks[1]),
        'wk_t': lin_w(ks[2]), 'bk': bias(ks[3]),
        'wv_t': lin_w(ks[4]), 'bv': bias(ks[5]),
        # MultiheadAttention in_proj (3*512, 512) split into q/k/v, pre-transposed
        'wqi_t': lin_w(ks[6]), 'bqi': bias(ks[7]),
        'wki_t': lin_w(ks[8]), 'bki': bias(ks[9]),
        'wvi_t': lin_w(ks[10]), 'bvi': bias(ks[11]),
        # MultiheadAttention out_proj
        'wo_t': lin_w(ks[12]), 'bo': bias(ks[13]),
    }


if __name__ == "__main__":
    root = jax.random.PRNGKey(0)
    pkey, dkey = jax.random.split(root)
    params = make_params(pkey)
    fused = prepare_fused_params(params)

    preseqlen = 5          # module default
    bsz = 2
    n_models = 2           # two prefix prompt models selected (sum(model_indices) == 2)
    model_heads = NUM_HEADS
    model_head_dim = HEAD_DIM            # model_heads * model_head_dim == 512
    num_layers = 3
    tensors_per_layer = 2                # key-prompt and value-prompt per layer
    NQ = num_layers * tensors_per_layer  # one attention (one query_id) per 4-D prompt
    Lkv = preseqlen * n_models

    dkeys = jax.random.split(dkey, NQ * n_models + 1)
    emb_key, pkeys = dkeys[0], dkeys[1:]

    # query_embedding table: (preseqlen * 9 * 4, 512); query_id q -> rows [5q, 5(q+1))
    emb_table = jax.random.normal(emb_key, (preseqlen * 9 * 4, D), jnp.float32) * 0.02

    kv_list, q_list, q5_list = [], [], []
    for qid in range(NQ):
        # per-model layer prompts: (bsz, num_heads, preseqlen, head_dim)
        prompts = [jax.random.normal(pkeys[qid * n_models + m],
                                     (bsz, model_heads, preseqlen, model_head_dim),
                                     jnp.float32)
                   for m in range(n_models)]
        # glue matching combine_promts: cat(dim=-2) -> transpose(2,1) -> reshape
        concat = jnp.concatenate(prompts, axis=-2)                       # (B, H, Lkv, Dh)
        kv = jnp.transpose(concat, (0, 2, 1, 3)).reshape(bsz, Lkv, D)    # (B, Lkv, 512)
        kv_list.append(kv)
        q5 = emb_table[qid * preseqlen:(qid + 1) * preseqlen]            # (5, 512)
        q5_list.append(q5)
        q_list.append(jnp.pad(q5, ((0, LQ_PAD - preseqlen), (0, 0))))    # pad 5 -> 8 rows

    kv_all = jnp.stack(kv_list, axis=0)        # (NQ, B, Lkv, D)
    q_all = jnp.stack(q_list, axis=0)          # (NQ, LQ_PAD, D)
    q_all5 = jnp.stack(q5_list, axis=0)        # (NQ, 5, D)

    # ONE layer-batched kernel call: weights DMA'd once, kv streamed per grid step.
    out_pad = combine_attention_pallas(q_all, kv_all, fused)             # (NQ, B, 8, 512)
    out_pad = jax.block_until_ready(out_pad)

    # tight check vs a pure-JAX model of the exact fused bf16 computation
    ref_fused = combine_attention_fused_ref(q_all, kv_all, fused)
    err_fused = float(jnp.max(jnp.abs(out_pad - ref_fused)))
    assert jnp.allclose(out_pad, ref_fused, atol=2e-2, rtol=2e-2), \
        f"mismatch vs fused-bf16 reference (max abs err {err_fused})"

    # drop the padded query rows, then relaxed check vs the faithful unfused f32 reference
    combined = out_pad[:, :, :preseqlen, :]                              # (NQ, B, 5, 512)
    ref_f32 = combine_attention_ref(q_all5, kv_all, params)
    err_f32 = float(jnp.max(jnp.abs(combined - ref_f32)))
    assert jnp.allclose(combined, ref_f32, atol=8e-2, rtol=8e-2), \
        f"mismatch vs f32 reference (max abs err {err_f32})"

    # final reshape back to the original prompt layout per query_id, as in the PyTorch code:
    # combined_prompt.reshape(one_dim, two_dim, three_dim, four_dim)
    combined_prompts = [combined[qid].reshape(bsz, model_heads, preseqlen, model_head_dim)
                        for qid in range(NQ)]
    jax.block_until_ready(combined_prompts[-1])

    print("KERNEL_OK")
</pallas_src>

<mosaic_0001>
module attributes {stable_mosaic.version = 11 : i64} {
  func.func @_combine_attn_kernel(%arg0: i32, %arg1: memref<8x512xbf16, #tpu.memory_space<vmem>>, %arg2: memref<1x20x512xbf16, #tpu.memory_space<vmem>>, %arg3: memref<512x512xbf16, #tpu.memory_space<vmem>>, %arg4: memref<512x1024xbf16, #tpu.memory_space<vmem>>, %arg5: memref<512x512xbf16, #tpu.memory_space<vmem>>, %arg6: memref<1x512xf32, #tpu.memory_space<vmem>>, %arg7: memref<1x512xf32, #tpu.memory_space<vmem>>, %arg8: memref<1x2x8x512xf32, #tpu.memory_space<vmem>>) attributes {dimension_semantics = [#tpu.dimension_semantics<arbitrary>], iteration_bounds = array<i64: 6>, scalar_prefetch = 0 : i64, scratch_operands = 0 : i64, tpu.core_type = #tpu.core_type<tc>, window_params = [{transform_indices = @transform_0, window_bounds = array<i64: 8, 512>}, {transform_indices = @transform_1, window_bounds = array<i64: 1, 20, 512>}, {pipeline_mode = #tpu.pipeline_mode<synchronous>, transform_indices = @transform_2, window_bounds = array<i64: 512, 512>}, {pipeline_mode = #tpu.pipeline_mode<synchronous>, transform_indices = @transform_3, window_bounds = array<i64: 512, 1024>}, {pipeline_mode = #tpu.pipeline_mode<synchronous>, transform_indices = @transform_4, window_bounds = array<i64: 512, 512>}, {pipeline_mode = #tpu.pipeline_mode<synchronous>, transform_indices = @transform_5, window_bounds = array<i64: 1, 512>}, {pipeline_mode = #tpu.pipeline_mode<synchronous>, transform_indices = @transform_6, window_bounds = array<i64: 1, 512>}, {transform_indices = @transform_7, window_bounds = array<i64: 1, 2, 8, 512>}]} {
    %c0 = arith.constant 0 : index
    %c0_0 = arith.constant 0 : index
    %0 = vector.load %arg1[%c0, %c0_0] : memref<8x512xbf16, #tpu.memory_space<vmem>>, vector<8x512xbf16>
    %c0_1 = arith.constant 0 : index
    %c0_2 = arith.constant 0 : index
    %1 = vector.load %arg3[%c0_1, %c0_2] : memref<512x512xbf16, #tpu.memory_space<vmem>>, vector<512x512xbf16>
    %cst = arith.constant dense<0.000000e+00> : vector<8x512xf32>
    %2 = tpu.matmul %0, %1, %cst {dimension_numbers = #tpu.dot_dimension_numbers<[1], [0], [0], [1], [0, 0, 1, 1], [], []>} : vector<8x512xbf16>, vector<512x512xbf16>, vector<8x512xf32> -> vector<8x512xf32>
    %c0_3 = arith.constant 0 : index
    %c0_4 = arith.constant 0 : index
    %3 = vector.load %arg6[%c0_3, %c0_4] : memref<1x512xf32, #tpu.memory_space<vmem>>, vector<1x512xf32>
    %4 = vector.broadcast %3 : vector<1x512xf32> to vector<8x512xf32>
    %5 = arith.addf %2, %4 : vector<8x512xf32>
    %6 = arith.truncf %5 : vector<8x512xf32> to vector<8x512xbf16>
    %c0_5 = arith.constant 0 : index
    %c0_6 = arith.constant 0 : index
    %c0_7 = arith.constant 0 : index
    %7 = vector.load %arg2[%c0_5, %c0_6, %c0_7] : memref<1x20x512xbf16, #tpu.memory_space<vmem>>, vector<1x20x512xbf16>
    %8 = vector.shape_cast %7 : vector<1x20x512xbf16> to vector<20x512xbf16>
    %c0_8 = arith.constant 0 : index
    %c0_9 = arith.constant 0 : index
    %9 = vector.load %arg4[%c0_8, %c0_9] : memref<512x1024xbf16, #tpu.memory_space<vmem>>, vector<512x1024xbf16>
    %cst_10 = arith.constant dense<0.000000e+00> : vector<20x1024xf32>
    %10 = tpu.matmul %8, %9, %cst_10 {dimension_numbers = #tpu.dot_dimension_numbers<[1], [0], [0], [1], [0, 0, 1, 1], [], []>} : vector<20x512xbf16>, vector<512x1024xbf16>, vector<20x1024xf32> -> vector<20x1024xf32>
    %11 = arith.truncf %10 : vector<20x1024xf32> to vector<20x1024xbf16>
    %12 = vector.extract_strided_slice %11 {offsets = [0, 0], sizes = [20, 512], strides = [1, 1]} : vector<20x1024xbf16> to vector<20x512xbf16>
    %13 = vector.extract_strided_slice %11 {offsets = [0, 512], sizes = [20, 512], strides = [1, 1]} : vector<20x1024xbf16> to vector<20x512xbf16>
    %14 = vector.extract_strided_slice %12 {offsets = [0, 0], sizes = [10, 512], strides = [1, 1]} : vector<20x512xbf16> to vector<10x512xbf16>
    %15 = vector.extract_strided_slice %13 {offsets = [0, 0], sizes = [10, 512], strides = [1, 1]} : vector<20x512xbf16> to vector<10x512xbf16>
    %16 = vector.extract_strided_slice %6 {offsets = [0, 0], sizes = [8, 64], strides = [1, 1]} : vector<8x512xbf16> to vector<8x64xbf16>
    %17 = vector.extract_strided_slice %14 {offsets = [0, 0], sizes = [10, 64], strides = [1, 1]} : vector<10x512xbf16> to vector<10x64xbf16>
    %18 = vector.extract_strided_slice %15 {offsets = [0, 0], sizes = [10, 64], strides = [1, 1]} : vector<10x512xbf16> to vector<10x64xbf16>
    %cst_11 = arith.constant dense<0.000000e+00> : vector<8x10xf32>
    %19 = tpu.matmul %16, %17, %cst_11 {dimension_numbers = #tpu.dot_dimension_numbers<[1], [1], [0], [0], [0, 0, 1, 0], [], []>} : vector<8x64xbf16>, vector<10x64xbf16>, vector<8x10xf32> -> vector<8x10xf32>
    %cst_12 = arith.constant dense<0xFF800000> : vector<8xf32>
    %20 = vector.multi_reduction <maximumf>, %19, %cst_12 [1] : vector<8x10xf32> to vector<8xf32>
    %21 = vector.shape_cast %20 : vector<8xf32> to vector<8x1xf32>
    %22 = vector.broadcast %21 : vector<8x1xf32> to vector<8x10xf32>
    %23 = arith.subf %19, %22 : vector<8x10xf32>
    %24 = math.exp %23 : vector<8x10xf32>
    %cst_13 = arith.constant dense<0.000000e+00> : vector<8xf32>
    %25 = vector.multi_reduction <add>, %24, %cst_13 [1] : vector<8x10xf32> to vector<8xf32>
    %26 = vector.shape_cast %25 : vector<8xf32> to vector<8x1xf32>
    %27 = tpu.reciprocal %26 {approx = true} : vector<8x1xf32> -> vector<8x1xf32>
    %28 = vector.broadcast %27 : vector<8x1xf32> to vector<8x10xf32>
    %29 = arith.mulf %24, %28 : vector<8x10xf32>
    %30 = arith.truncf %29 : vector<8x10xf32> to vector<8x10xbf16>
    %cst_14 = arith.constant dense<0.000000e+00> : vector<8x64xf32>
    %31 = tpu.matmul %30, %18, %cst_14 {dimension_numbers = #tpu.dot_dimension_numbers<[1], [0], [0], [1], [0, 0, 1, 1], [], []>} : vector<8x10xbf16>, vector<10x64xbf16>, vector<8x64xf32> -> vector<8x64xf32>
    %32 = arith.truncf %31 : vector<8x64xf32> to vector<8x64xbf16>
    %33 = vector.extract_strided_slice %6 {offsets = [0, 64], sizes = [8, 64], strides = [1, 1]} : vector<8x512xbf16> to vector<8x64xbf16>
    %34 = vector.extract_strided_slice %14 {offsets = [0, 64], sizes = [10, 64], strides = [1, 1]} : vector<10x512xbf16> to vector<10x64xbf16>
    %35 = vector.extract_strided_slice %15 {offsets = [0, 64], sizes = [10, 64], strides = [1, 1]} : vector<10x512xbf16> to vector<10x64xbf16>
    %cst_15 = arith.constant dense<0.000000e+00> : vector<8x10xf32>
    %36 = tpu.matmul %33, %34, %cst_15 {dimension_numbers = #tpu.dot_dimension_numbers<[1], [1], [0], [0], [0, 0, 1, 0], [], []>} : vector<8x64xbf16>, vector<10x64xbf16>, vector<8x10xf32> -> vector<8x10xf32>
    %cst_16 = arith.constant dense<0xFF800000> : vector<8xf32>
    %37 = vector.multi_reduction <maximumf>, %36, %cst_16 [1] : vector<8x10xf32> to vector<8xf32>
    %38 = vector.shape_cast %37 : vector<8xf32> to vector<8x1xf32>
    %39 = vector.broadcast %38 : vector<8x1xf32> to vector<8x10xf32>
    %40 = arith.subf %36, %39 : vector<8x10xf32>
    %41 = math.exp %40 : vector<8x10xf32>
    %cst_17 = arith.constant dense<0.000000e+00> : vector<8xf32>
    %42 = vector.multi_reduction <add>, %41, %cst_17 [1] : vector<8x10xf32> to vector<8xf32>
    %43 = vector.shape_cast %42 : vector<8xf32> to vector<8x1xf32>
    %44 = tpu.reciprocal %43 {approx = true} : vector<8x1xf32> -> vector<8x1xf32>
    %45 = vector.broadcast %44 : vector<8x1xf32> to vector<8x10xf32>
    %46 = arith.mulf %41, %45 : vector<8x10xf32>
    %47 = arith.truncf %46 : vector<8x10xf32> to vector<8x10xbf16>
    %cst_18 = arith.constant dense<0.000000e+00> : vector<8x64xf32>
    %48 = tpu.matmul %47, %35, %cst_18 {dimension_numbers = #tpu.dot_dimension_numbers<[1], [0], [0], [1], [0, 0, 1, 1], [], []>} : vector<8x10xbf16>, vector<10x64xbf16>, vector<8x64xf32> -> vector<8x64xf32>
    %49 = arith.truncf %48 : vector<8x64xf32> to vector<8x64xbf16>
    %50 = vector.extract_strided_slice %6 {offsets = [0, 128], sizes = [8, 64], strides = [1, 1]} : vector<8x512xbf16> to vector<8x64xbf16>
    %51 = vector.extract_strided_slice %14 {offsets = [0, 128], sizes = [10, 64], strides = [1, 1]} : vector<10x512xbf16> to vector<10x64xbf16>
    %52 = vector.extract_strided_slice %15 {offsets = [0, 128], sizes = [10, 64], strides = [1, 1]} : vector<10x512xbf16> to vector<10x64xbf16>
    %cst_19 = arith.constant dense<0.000000e+00> : vector<8x10xf32>
    %53 = tpu.matmul %50, %51, %cst_19 {dimension_numbers = #tpu.dot_dimension_numbers<[1], [1], [0], [0], [0, 0, 1, 0], [], []>} : vector<8x64xbf16>, vector<10x64xbf16>, vector<8x10xf32> -> vector<8x10xf32>
    %cst_20 = arith.constant dense<0xFF800000> : vector<8xf32>
    %54 = vector.multi_reduction <maximumf>, %53, %cst_20 [1] : vector<8x10xf32> to vector<8xf32>
    %55 = vector.shape_cast %54 : vector<8xf32> to vector<8x1xf32>
    %56 = vector.broadcast %55 : vector<8x1xf32> to vector<8x10xf32>
    %57 = arith.subf %53, %56 : vector<8x10xf32>
    %58 = math.exp %57 : vector<8x10xf32>
    %cst_21 = arith.constant dense<0.000000e+00> : vector<8xf32>
    %59 = vector.multi_reduction <add>, %58, %cst_21 [1] : vector<8x10xf32> to vector<8xf32>
    %60 = vector.shape_cast %59 : vector<8xf32> to vector<8x1xf32>
    %61 = tpu.reciprocal %60 {approx = true} : vector<8x1xf32> -> vector<8x1xf32>
    %62 = vector.broadcast %61 : vector<8x1xf32> to vector<8x10xf32>
    %63 = arith.mulf %58, %62 : vector<8x10xf32>
    %64 = arith.truncf %63 : vector<8x10xf32> to vector<8x10xbf16>
    %cst_22 = arith.constant dense<0.000000e+00> : vector<8x64xf32>
    %65 = tpu.matmul %64, %52, %cst_22 {dimension_numbers = #tpu.dot_dimension_numbers<[1], [0], [0], [1], [0, 0, 1, 1], [], []>} : vector<8x10xbf16>, vector<10x64xbf16>, vector<8x64xf32> -> vector<8x64xf32>
    %66 = arith.truncf %65 : vector<8x64xf32> to vector<8x64xbf16>
    %67 = vector.extract_strided_slice %6 {offsets = [0, 192], sizes = [8, 64], strides = [1, 1]} : vector<8x512xbf16> to vector<8x64xbf16>
    %68 = vector.extract_strided_slice %14 {offsets = [0, 192], sizes = [10, 64], strides = [1, 1]} : vector<10x512xbf16> to vector<10x64xbf16>
    %69 = vector.extract_strided_slice %15 {offsets = [0, 192], sizes = [10, 64], strides = [1, 1]} : vector<10x512xbf16> to vector<10x64xbf16>
    %cst_23 = arith.constant dense<0.000000e+00> : vector<8x10xf32>
    %70 = tpu.matmul %67, %68, %cst_23 {dimension_numbers = #tpu.dot_dimension_numbers<[1], [1], [0], [0], [0, 0, 1, 0], [], []>} : vector<8x64xbf16>, vector<10x64xbf16>, vector<8x10xf32> -> vector<8x10xf32>
    %cst_24 = arith.constant dense<0xFF800000> : vector<8xf32>
    %71 = vector.multi_reduction <maximumf>, %70, %cst_24 [1] : vector<8x10xf32> to vector<8xf32>
    %72 = vector.shape_cast %71 : vector<8xf32> to vector<8x1xf32>
    %73 = vector.broadcast %72 : vector<8x1xf32> to vector<8x10xf32>
    %74 = arith.subf %70, %73 : vector<8x10xf32>
    %75 = math.exp %74 : vector<8x10xf32>
    %cst_25 = arith.constant dense<0.000000e+00> : vector<8xf32>
    %76 = vector.multi_reduction <add>, %75, %cst_25 [1] : vector<8x10xf32> to vector<8xf32>
    %77 = vector.shape_cast %76 : vector<8xf32> to vector<8x1xf32>
    %78 = tpu.reciprocal %77 {approx = true} : vector<8x1xf32> -> vector<8x1xf32>
    %79 = vector.broadcast %78 : vector<8x1xf32> to vector<8x10xf32>
    %80 = arith.mulf %75, %79 : vector<8x10xf32>
    %81 = arith.truncf %80 : vector<8x10xf32> to vector<8x10xbf16>
    %cst_26 = arith.constant dense<0.000000e+00> : vector<8x64xf32>
    %82 = tpu.matmul %81, %69, %cst_26 {dimension_numbers = #tpu.dot_dimension_numbers<[1], [0], [0], [1], [0, 0, 1, 1], [], []>} : vector<8x10xbf16>, vector<10x64xbf16>, vector<8x64xf32> -> vector<8x64xf32>
    %83 = arith.truncf %82 : vector<8x64xf32> to vector<8x64xbf16>
    %84 = vector.extract_strided_slice %6 {offsets = [0, 256], sizes = [8, 64], strides = [1, 1]} : vector<8x512xbf16> to vector<8x64xbf16>
    %85 = vector.extract_strided_slice %14 {offsets = [0, 256], sizes = [10, 64], strides = [1, 1]} : vector<10x512xbf16> to vector<10x64xbf16>
    %86 = vector.extract_strided_slice %15 {offsets = [0, 256], sizes = [10, 64], strides = [1, 1]} : vector<10x512xbf16> to vector<10x64xbf16>
    %cst_27 = arith.constant dense<0.000000e+00> : vector<8x10xf32>
    %87 = tpu.matmul %84, %85, %cst_27 {dimension_numbers = #tpu.dot_dimension_numbers<[1], [1], [0], [0], [0, 0, 1, 0], [], []>} : vector<8x64xbf16>, vector<10x64xbf16>, vector<8x10xf32> -> vector<8x10xf32>
    %cst_28 = arith.constant dense<0xFF800000> : vector<8xf32>
    %88 = vector.multi_reduction <maximumf>, %87, %cst_28 [1] : vector<8x10xf32> to vector<8xf32>
    %89 = vector.shape_cast %88 : vector<8xf32> to vector<8x1xf32>
    %90 = vector.broadcast %89 : vector<8x1xf32> to vector<8x10xf32>
    %91 = arith.subf %87, %90 : vector<8x10xf32>
    %92 = math.exp %91 : vector<8x10xf32>
    %cst_29 = arith.constant dense<0.000000e+00> : vector<8xf32>
    %93 = vector.multi_reduction <add>, %92, %cst_29 [1] : vector<8x10xf32> to vector<8xf32>
    %94 = vector.shape_cast %93 : vector<8xf32> to vector<8x1xf32>
    %95 = tpu.reciprocal %94 {approx = true} : vector<8x1xf32> -> vector<8x1xf32>
    %96 = vector.broadcast %95 : vector<8x1xf32> to vector<8x10xf32>
    %97 = arith.mulf %92, %96 : vector<8x10xf32>
    %98 = arith.truncf %97 : vector<8x10xf32> to vector<8x10xbf16>
    %cst_30 = arith.constant dense<0.000000e+00> : vector<8x64xf32>
    %99 = tpu.matmul %98, %86, %cst_30 {dimension_numbers = #tpu.dot_dimension_numbers<[1], [0], [0], [1], [0, 0, 1, 1], [], []>} : vector<8x10xbf16>, vector<10x64xbf16>, vector<8x64xf32> -> vector<8x64xf32>
    %100 = arith.truncf %99 : vector<8x64xf32> to vector<8x64xbf16>
    %101 = vector.extract_strided_slice %6 {offsets = [0, 320], sizes = [8, 64], strides = [1, 1]} : vector<8x512xbf16> to vector<8x64xbf16>
    %102 = vector.extract_strided_slice %14 {offsets = [0, 320], sizes = [10, 64], strides = [1, 1]} : vector<10x512xbf16> to vector<10x64xbf16>
    %103 = vector.extract_strided_slice %15 {offsets = [0, 320], sizes = [10, 64], strides = [1, 1]} : vector<10x512xbf16> to vector<10x64xbf16>
    %cst_31 = arith.constant dense<0.000000e+00> : vector<8x10xf32>
    %104 = tpu.matmul %101, %102, %cst_31 {dimension_numbers = #tpu.dot_dimension_numbers<[1], [1], [0], [0], [0, 0, 1, 0], [], []>} : vector<8x64xbf16>, vector<10x64xbf16>, vector<8x10xf32> -> vector<8x10xf32>
    %cst_32 = arith.constant dense<0xFF800000> : vector<8xf32>
    %105 = vector.multi_reduction <maximumf>, %104, %cst_32 [1] : vector<8x10xf32> to vector<8xf32>
    %106 = vector.shape_cast %105 : vector<8xf32> to vector<8x1xf32>
    %107 = vector.broadcast %106 : vector<8x1xf32> to vector<8x10xf32>
    %108 = arith.subf %104, %107 : vector<8x10xf32>
    %109 = math.exp %108 : vector<8x10xf32>
    %cst_33 = arith.constant dense<0.000000e+00> : vector<8xf32>
    %110 = vector.multi_reduction <add>, %109, %cst_33 [1] : vector<8x10xf32> to vector<8xf32>
    %111 = vector.shape_cast %110 : vector<8xf32> to vector<8x1xf32>
    %112 = tpu.reciprocal %111 {approx = true} : vector<8x1xf32> -> vector<8x1xf32>
    %113 = vector.broadcast %112 : vector<8x1xf32> to vector<8x10xf32>
    %114 = arith.mulf %109, %113 : vector<8x10xf32>
    %115 = arith.truncf %114 : vector<8x10xf32> to vector<8x10xbf16>
    %cst_34 = arith.constant dense<0.000000e+00> : vector<8x64xf32>
    %116 = tpu.matmul %115, %103, %cst_34 {dimension_numbers = #tpu.dot_dimension_numbers<[1], [0], [0], [1], [0, 0, 1, 1], [], []>} : vector<8x10xbf16>, vector<10x64xbf16>, vector<8x64xf32> -> vector<8x64xf32>
    %117 = arith.truncf %116 : vector<8x64xf32> to vector<8x64xbf16>
    %118 = vector.extract_strided_slice %6 {offsets = [0, 384], sizes = [8, 64], strides = [1, 1]} : vector<8x512xbf16> to vector<8x64xbf16>
    %119 = vector.extract_strided_slice %14 {offsets = [0, 384], sizes = [10, 64], strides = [1, 1]} : vector<10x512xbf16> to vector<10x64xbf16>
    %120 = vector.extract_strided_slice %15 {offsets = [0, 384], sizes = [10, 64], strides = [1, 1]} : vector<10x512xbf16> to vector<10x64xbf16>
    %cst_35 = arith.constant dense<0.000000e+00> : vector<8x10xf32>
    %121 = tpu.matmul %118, %119, %cst_35 {dimension_numbers = #tpu.dot_dimension_numbers<[1], [1], [0], [0], [0, 0, 1, 0], [], []>} : vector<8x64xbf16>, vector<10x64xbf16>, vector<8x10xf32> -> vector<8x10xf32>
    %cst_36 = arith.constant dense<0xFF800000> : vector<8xf32>
    %122 = vector.multi_reduction <maximumf>, %121, %cst_36 [1] : vector<8x10xf32> to vector<8xf32>
    %123 = vector.shape_cast %122 : vector<8xf32> to vector<8x1xf32>
    %124 = vector.broadcast %123 : vector<8x1xf32> to vector<8x10xf32>
    %125 = arith.subf %121, %124 : vector<8x10xf32>
    %126 = math.exp %125 : vector<8x10xf32>
    %cst_37 = arith.constant dense<0.000000e+00> : vector<8xf32>
    %127 = vector.multi_reduction <add>, %126, %cst_37 [1] : vector<8x10xf32> to vector<8xf32>
    %128 = vector.shape_cast %127 : vector<8xf32> to vector<8x1xf32>
    %129 = tpu.reciprocal %128 {approx = true} : vector<8x1xf32> -> vector<8x1xf32>
    %130 = vector.broadcast %129 : vector<8x1xf32> to vector<8x10xf32>
    %131 = arith.mulf %126, %130 : vector<8x10xf32>
    %132 = arith.truncf %131 : vector<8x10xf32> to vector<8x10xbf16>
    %cst_38 = arith.constant dense<0.000000e+00> : vector<8x64xf32>
    %133 = tpu.matmul %132, %120, %cst_38 {dimension_numbers = #tpu.dot_dimension_numbers<[1], [0], [0], [1], [0, 0, 1, 1], [], []>} : vector<8x10xbf16>, vector<10x64xbf16>, vector<8x64xf32> -> vector<8x64xf32>
    %134 = arith.truncf %133 : vector<8x64xf32> to vector<8x64xbf16>
    %135 = vector.extract_strided_slice %6 {offsets = [0, 448], sizes = [8, 64], strides = [1, 1]} : vector<8x512xbf16> to vector<8x64xbf16>
    %136 = vector.extract_strided_slice %14 {offsets = [0, 448], sizes = [10, 64], strides = [1, 1]} : vector<10x512xbf16> to vector<10x64xbf16>
    %137 = vector.extract_strided_slice %15 {offsets = [0, 448], sizes = [10, 64], strides = [1, 1]} : vector<10x512xbf16> to vector<10x64xbf16>
    %cst_39 = arith.constant dense<0.000000e+00> : vector<8x10xf32>
    %138 = tpu.matmul %135, %136, %cst_39 {dimension_numbers = #tpu.dot_dimension_numbers<[1], [1], [0], [0], [0, 0, 1, 0], [], []>} : vector<8x64xbf16>, vector<10x64xbf16>, vector<8x10xf32> -> vector<8x10xf32>
    %cst_40 = arith.constant dense<0xFF800000> : vector<8xf32>
    %139 = vector.multi_reduction <maximumf>, %138, %cst_40 [1] : vector<8x10xf32> to vector<8xf32>
    %140 = vector.shape_cast %139 : vector<8xf32> to vector<8x1xf32>
    %141 = vector.broadcast %140 : vector<8x1xf32> to vector<8x10xf32>
    %142 = arith.subf %138, %141 : vector<8x10xf32>
    %143 = math.exp %142 : vector<8x10xf32>
    %cst_41 = arith.constant dense<0.000000e+00> : vector<8xf32>
    %144 = vector.multi_reduction <add>, %143, %cst_41 [1] : vector<8x10xf32> to vector<8xf32>
    %145 = vector.shape_cast %144 : vector<8xf32> to vector<8x1xf32>
    %146 = tpu.reciprocal %145 {approx = true} : vector<8x1xf32> -> vector<8x1xf32>
    %147 = vector.broadcast %146 : vector<8x1xf32> to vector<8x10xf32>
    %148 = arith.mulf %143, %147 : vector<8x10xf32>
    %149 = arith.truncf %148 : vector<8x10xf32> to vector<8x10xbf16>
    %cst_42 = arith.constant dense<0.000000e+00> : vector<8x64xf32>
    %150 = tpu.matmul %149, %137, %cst_42 {dimension_numbers = #tpu.dot_dimension_numbers<[1], [0], [0], [1], [0, 0, 1, 1], [], []>} : vector<8x10xbf16>, vector<10x64xbf16>, vector<8x64xf32> -> vector<8x64xf32>
    %151 = arith.truncf %150 : vector<8x64xf32> to vector<8x64xbf16>
    %152 = tpu.concatenate %32, %49, %66, %83, %100, %117, %134, %151 in 1 : vector<8x64xbf16>, vector<8x64xbf16>, vector<8x64xbf16>, vector<8x64xbf16>, vector<8x64xbf16>, vector<8x64xbf16>, vector<8x64xbf16>, vector<8x64xbf16> -> vector<8x512xbf16>
    %153 = vector.extract_strided_slice %12 {offsets = [10, 0], sizes = [10, 512], strides = [1, 1]} : vector<20x512xbf16> to vector<10x512xbf16>
    %154 = vector.extract_strided_slice %13 {offsets = [10, 0], sizes = [10, 512], strides = [1, 1]} : vector<20x512xbf16> to vector<10x512xbf16>
    %155 = vector.extract_strided_slice %6 {offsets = [0, 0], sizes = [8, 64], strides = [1, 1]} : vector<8x512xbf16> to vector<8x64xbf16>
    %156 = vector.extract_strided_slice %153 {offsets = [0, 0], sizes = [10, 64], strides = [1, 1]} : vector<10x512xbf16> to vector<10x64xbf16>
    %157 = vector.extract_strided_slice %154 {offsets = [0, 0], sizes = [10, 64], strides = [1, 1]} : vector<10x512xbf16> to vector<10x64xbf16>
    %cst_43 = arith.constant dense<0.000000e+00> : vector<8x10xf32>
    %158 = tpu.matmul %155, %156, %cst_43 {dimension_numbers = #tpu.dot_dimension_numbers<[1], [1], [0], [0], [0, 0, 1, 0], [], []>} : vector<8x64xbf16>, vector<10x64xbf16>, vector<8x10xf32> -> vector<8x10xf32>
    %cst_44 = arith.constant dense<0xFF800000> : vector<8xf32>
    %159 = vector.multi_reduction <maximumf>, %158, %cst_44 [1] : vector<8x10xf32> to vector<8xf32>
    %160 = vector.shape_cast %159 : vector<8xf32> to vector<8x1xf32>
    %161 = vector.broadcast %160 : vector<8x1xf32> to vector<8x10xf32>
    %162 = arith.subf %158, %161 : vector<8x10xf32>
    %163 = math.exp %162 : vector<8x10xf32>
    %cst_45 = arith.constant dense<0.000000e+00> : vector<8xf32>
    %164 = vector.multi_reduction <add>, %163, %cst_45 [1] : vector<8x10xf32> to vector<8xf32>
    %165 = vector.shape_cast %164 : vector<8xf32> to vector<8x1xf32>
    %166 = tpu.reciprocal %165 {approx = true} : vector<8x1xf32> -> vector<8x1xf32>
    %167 = vector.broadcast %166 : vector<8x1xf32> to vector<8x10xf32>
    %168 = arith.mulf %163, %167 : vector<8x10xf32>
    %169 = arith.truncf %168 : vector<8x10xf32> to vector<8x10xbf16>
    %cst_46 = arith.constant dense<0.000000e+00> : vector<8x64xf32>
    %170 = tpu.matmul %169, %157, %cst_46 {dimension_numbers = #tpu.dot_dimension_numbers<[1], [0], [0], [1], [0, 0, 1, 1], [], []>} : vector<8x10xbf16>, vector<10x64xbf16>, vector<8x64xf32> -> vector<8x64xf32>
    %171 = arith.truncf %170 : vector<8x64xf32> to vector<8x64xbf16>
    %172 = vector.extract_strided_slice %6 {offsets = [0, 64], sizes = [8, 64], strides = [1, 1]} : vector<8x512xbf16> to vector<8x64xbf16>
    %173 = vector.extract_strided_slice %153 {offsets = [0, 64], sizes = [10, 64], strides = [1, 1]} : vector<10x512xbf16> to vector<10x64xbf16>
    %174 = vector.extract_strided_slice %154 {offsets = [0, 64], sizes = [10, 64], strides = [1, 1]} : vector<10x512xbf16> to vector<10x64xbf16>
    %cst_47 = arith.constant dense<0.000000e+00> : vector<8x10xf32>
    %175 = tpu.matmul %172, %173, %cst_47 {dimension_numbers = #tpu.dot_dimension_numbers<[1], [1], [0], [0], [0, 0, 1, 0], [], []>} : vector<8x64xbf16>, vector<10x64xbf16>, vector<8x10xf32> -> vector<8x10xf32>
    %cst_48 = arith.constant dense<0xFF800000> : vector<8xf32>
    %176 = vector.multi_reduction <maximumf>, %175, %cst_48 [1] : vector<8x10xf32> to vector<8xf32>
    %177 = vector.shape_cast %176 : vector<8xf32> to vector<8x1xf32>
    %178 = vector.broadcast %177 : vector<8x1xf32> to vector<8x10xf32>
    %179 = arith.subf %175, %178 : vector<8x10xf32>
    %180 = math.exp %179 : vector<8x10xf32>
    %cst_49 = arith.constant dense<0.000000e+00> : vector<8xf32>
    %181 = vector.multi_reduction <add>, %180, %cst_49 [1] : vector<8x10xf32> to vector<8xf32>
    %182 = vector.shape_cast %181 : vector<8xf32> to vector<8x1xf32>
    %183 = tpu.reciprocal %182 {approx = true} : vector<8x1xf32> -> vector<8x1xf32>
    %184 = vector.broadcast %183 : vector<8x1xf32> to vector<8x10xf32>
    %185 = arith.mulf %180, %184 : vector<8x10xf32>
    %186 = arith.truncf %185 : vector<8x10xf32> to vector<8x10xbf16>
    %cst_50 = arith.constant dense<0.000000e+00> : vector<8x64xf32>
    %187 = tpu.matmul %186, %174, %cst_50 {dimension_numbers = #tpu.dot_dimension_numbers<[1], [0], [0], [1], [0, 0, 1, 1], [], []>} : vector<8x10xbf16>, vector<10x64xbf16>, vector<8x64xf32> -> vector<8x64xf32>
    %188 = arith.truncf %187 : vector<8x64xf32> to vector<8x64xbf16>
    %189 = vector.extract_strided_slice %6 {offsets = [0, 128], sizes = [8, 64], strides = [1, 1]} : vector<8x512xbf16> to vector<8x64xbf16>
    %190 = vector.extract_strided_slice %153 {offsets = [0, 128], sizes = [10, 64], strides = [1, 1]} : vector<10x512xbf16> to vector<10x64xbf16>
    %191 = vector.extract_strided_slice %154 {offsets = [0, 128], sizes = [10, 64], strides = [1, 1]} : vector<10x512xbf16> to vector<10x64xbf16>
    %cst_51 = arith.constant dense<0.000000e+00> : vector<8x10xf32>
    %192 = tpu.matmul %189, %190, %cst_51 {dimension_numbers = #tpu.dot_dimension_numbers<[1], [1], [0], [0], [0, 0, 1, 0], [], []>} : vector<8x64xbf16>, vector<10x64xbf16>, vector<8x10xf32> -> vector<8x10xf32>
    %cst_52 = arith.constant dense<0xFF800000> : vector<8xf32>
    %193 = vector.multi_reduction <maximumf>, %192, %cst_52 [1] : vector<8x10xf32> to vector<8xf32>
    %194 = vector.shape_cast %193 : vector<8xf32> to vector<8x1xf32>
    %195 = vector.broadcast %194 : vector<8x1xf32> to vector<8x10xf32>
    %196 = arith.subf %192, %195 : vector<8x10xf32>
    %197 = math.exp %196 : vector<8x10xf32>
    %cst_53 = arith.constant dense<0.000000e+00> : vector<8xf32>
    %198 = vector.multi_reduction <add>, %197, %cst_53 [1] : vector<8x10xf32> to vector<8xf32>
    %199 = vector.shape_cast %198 : vector<8xf32> to vector<8x1xf32>
    %200 = tpu.reciprocal %199 {approx = true} : vector<8x1xf32> -> vector<8x1xf32>
    %201 = vector.broadcast %200 : vector<8x1xf32> to vector<8x10xf32>
    %202 = arith.mulf %197, %201 : vector<8x10xf32>
    %203 = arith.truncf %202 : vector<8x10xf32> to vector<8x10xbf16>
    %cst_54 = arith.constant dense<0.000000e+00> : vector<8x64xf32>
    %204 = tpu.matmul %203, %191, %cst_54 {dimension_numbers = #tpu.dot_dimension_numbers<[1], [0], [0], [1], [0, 0, 1, 1], [], []>} : vector<8x10xbf16>, vector<10x64xbf16>, vector<8x64xf32> -> vector<8x64xf32>
    %205 = arith.truncf %204 : vector<8x64xf32> to vector<8x64xbf16>
    %206 = vector.extract_strided_slice %6 {offsets = [0, 192], sizes = [8, 64], strides = [1, 1]} : vector<8x512xbf16> to vector<8x64xbf16>
    %207 = vector.extract_strided_slice %153 {offsets = [0, 192], sizes = [10, 64], strides = [1, 1]} : vector<10x512xbf16> to vector<10x64xbf16>
    %208 = vector.extract_strided_slice %154 {offsets = [0, 192], sizes = [10, 64], strides = [1, 1]} : vector<10x512xbf16> to vector<10x64xbf16>
    %cst_55 = arith.constant dense<0.000000e+00> : vector<8x10xf32>
    %209 = tpu.matmul %206, %207, %cst_55 {dimension_numbers = #tpu.dot_dimension_numbers<[1], [1], [0], [0], [0, 0, 1, 0], [], []>} : vector<8x64xbf16>, vector<10x64xbf16>, vector<8x10xf32> -> vector<8x10xf32>
    %cst_56 = arith.constant dense<0xFF800000> : vector<8xf32>
    %210 = vector.multi_reduction <maximumf>, %209, %cst_56 [1] : vector<8x10xf32> to vector<8xf32>
    %211 = vector.shape_cast %210 : vector<8xf32> to vector<8x1xf32>
    %212 = vector.broadcast %211 : vector<8x1xf32> to vector<8x10xf32>
    %213 = arith.subf %209, %212 : vector<8x10xf32>
    %214 = math.exp %213 : vector<8x10xf32>
    %cst_57 = arith.constant dense<0.000000e+00> : vector<8xf32>
    %215 = vector.multi_reduction <add>, %214, %cst_57 [1] : vector<8x10xf32> to vector<8xf32>
    %216 = vector.shape_cast %215 : vector<8xf32> to vector<8x1xf32>
    %217 = tpu.reciprocal %216 {approx = true} : vector<8x1xf32> -> vector<8x1xf32>
    %218 = vector.broadcast %217 : vector<8x1xf32> to vector<8x10xf32>
    %219 = arith.mulf %214, %218 : vector<8x10xf32>
    %220 = arith.truncf %219 : vector<8x10xf32> to vector<8x10xbf16>
    %cst_58 = arith.constant dense<0.000000e+00> : vector<8x64xf32>
    %221 = tpu.matmul %220, %208, %cst_58 {dimension_numbers = #tpu.dot_dimension_numbers<[1], [0], [0], [1], [0, 0, 1, 1], [], []>} : vector<8x10xbf16>, vector<10x64xbf16>, vector<8x64xf32> -> vector<8x64xf32>
    %222 = arith.truncf %221 : vector<8x64xf32> to vector<8x64xbf16>
    %223 = vector.extract_strided_slice %6 {offsets = [0, 256], sizes = [8, 64], strides = [1, 1]} : vector<8x512xbf16> to vector<8x64xbf16>
    %224 = vector.extract_strided_slice %153 {offsets = [0, 256], sizes = [10, 64], strides = [1, 1]} : vector<10x512xbf16> to vector<10x64xbf16>
    %225 = vector.extract_strided_slice %154 {offsets = [0, 256], sizes = [10, 64], strides = [1, 1]} : vector<10x512xbf16> to vector<10x64xbf16>
    %cst_59 = arith.constant dense<0.000000e+00> : vector<8x10xf32>
    %226 = tpu.matmul %223, %224, %cst_59 {dimension_numbers = #tpu.dot_dimension_numbers<[1], [1], [0], [0], [0, 0, 1, 0], [], []>} : vector<8x64xbf16>, vector<10x64xbf16>, vector<8x10xf32> -> vector<8x10xf32>
    %cst_60 = arith.constant dense<0xFF800000> : vector<8xf32>
    %227 = vector.multi_reduction <maximumf>, %226, %cst_60 [1] : vector<8x10xf32> to vector<8xf32>
    %228 = vector.shape_cast %227 : vector<8xf32> to vector<8x1xf32>
    %229 = vector.broadcast %228 : vector<8x1xf32> to vector<8x10xf32>
    %230 = arith.subf %226, %229 : vector<8x10xf32>
    %231 = math.exp %230 : vector<8x10xf32>
    %cst_61 = arith.constant dense<0.000000e+00> : vector<8xf32>
    %232 = vector.multi_reduction <add>, %231, %cst_61 [1] : vector<8x10xf32> to vector<8xf32>
    %233 = vector.shape_cast %232 : vector<8xf32> to vector<8x1xf32>
    %234 = tpu.reciprocal %233 {approx = true} : vector<8x1xf32> -> vector<8x1xf32>
    %235 = vector.broadcast %234 : vector<8x1xf32> to vector<8x10xf32>
    %236 = arith.mulf %231, %235 : vector<8x10xf32>
    %237 = arith.truncf %236 : vector<8x10xf32> to vector<8x10xbf16>
    %cst_62 = arith.constant dense<0.000000e+00> : vector<8x64xf32>
    %238 = tpu.matmul %237, %225, %cst_62 {dimension_numbers = #tpu.dot_dimension_numbers<[1], [0], [0], [1], [0, 0, 1, 1], [], []>} : vector<8x10xbf16>, vector<10x64xbf16>, vector<8x64xf32> -> vector<8x64xf32>
    %239 = arith.truncf %238 : vector<8x64xf32> to vector<8x64xbf16>
    %240 = vector.extract_strided_slice %6 {offsets = [0, 320], sizes = [8, 64], strides = [1, 1]} : vector<8x512xbf16> to vector<8x64xbf16>
    %241 = vector.extract_strided_slice %153 {offsets = [0, 320], sizes = [10, 64], strides = [1, 1]} : vector<10x512xbf16> to vector<10x64xbf16>
    %242 = vector.extract_strided_slice %154 {offsets = [0, 320], sizes = [10, 64], strides = [1, 1]} : vector<10x512xbf16> to vector<10x64xbf16>
    %cst_63 = arith.constant dense<0.000000e+00> : vector<8x10xf32>
    %243 = tpu.matmul %240, %241, %cst_63 {dimension_numbers = #tpu.dot_dimension_numbers<[1], [1], [0], [0], [0, 0, 1, 0], [], []>} : vector<8x64xbf16>, vector<10x64xbf16>, vector<8x10xf32> -> vector<8x10xf32>
    %cst_64 = arith.constant dense<0xFF800000> : vector<8xf32>
    %244 = vector.multi_reduction <maximumf>, %243, %cst_64 [1] : vector<8x10xf32> to vector<8xf32>
    %245 = vector.shape_cast %244 : vector<8xf32> to vector<8x1xf32>
    %246 = vector.broadcast %245 : vector<8x1xf32> to vector<8x10xf32>
    %247 = arith.subf %243, %246 : vector<8x10xf32>
    %248 = math.exp %247 : vector<8x10xf32>
    %cst_65 = arith.constant dense<0.000000e+00> : vector<8xf32>
    %249 = vector.multi_reduction <add>, %248, %cst_65 [1] : vector<8x10xf32> to vector<8xf32>
    %250 = vector.shape_cast %249 : vector<8xf32> to vector<8x1xf32>
    %251 = tpu.reciprocal %250 {approx = true} : vector<8x1xf32> -> vector<8x1xf32>
    %252 = vector.broadcast %251 : vector<8x1xf32> to vector<8x10xf32>
    %253 = arith.mulf %248, %252 : vector<8x10xf32>
    %254 = arith.truncf %253 : vector<8x10xf32> to vector<8x10xbf16>
    %cst_66 = arith.constant dense<0.000000e+00> : vector<8x64xf32>
    %255 = tpu.matmul %254, %242, %cst_66 {dimension_numbers = #tpu.dot_dimension_numbers<[1], [0], [0], [1], [0, 0, 1, 1], [], []>} : vector<8x10xbf16>, vector<10x64xbf16>, vector<8x64xf32> -> vector<8x64xf32>
    %256 = arith.truncf %255 : vector<8x64xf32> to vector<8x64xbf16>
    %257 = vector.extract_strided_slice %6 {offsets = [0, 384], sizes = [8, 64], strides = [1, 1]} : vector<8x512xbf16> to vector<8x64xbf16>
    %258 = vector.extract_strided_slice %153 {offsets = [0, 384], sizes = [10, 64], strides = [1, 1]} : vector<10x512xbf16> to vector<10x64xbf16>
    %259 = vector.extract_strided_slice %154 {offsets = [0, 384], sizes = [10, 64], strides = [1, 1]} : vector<10x512xbf16> to vector<10x64xbf16>
    %cst_67 = arith.constant dense<0.000000e+00> : vector<8x10xf32>
    %260 = tpu.matmul %257, %258, %cst_67 {dimension_numbers = #tpu.dot_dimension_numbers<[1], [1], [0], [0], [0, 0, 1, 0], [], []>} : vector<8x64xbf16>, vector<10x64xbf16>, vector<8x10xf32> -> vector<8x10xf32>
    %cst_68 = arith.constant dense<0xFF800000> : vector<8xf32>
    %261 = vector.multi_reduction <maximumf>, %260, %cst_68 [1] : vector<8x10xf32> to vector<8xf32>
    %262 = vector.shape_cast %261 : vector<8xf32> to vector<8x1xf32>
    %263 = vector.broadcast %262 : vector<8x1xf32> to vector<8x10xf32>
    %264 = arith.subf %260, %263 : vector<8x10xf32>
    %265 = math.exp %264 : vector<8x10xf32>
    %cst_69 = arith.constant dense<0.000000e+00> : vector<8xf32>
    %266 = vector.multi_reduction <add>, %265, %cst_69 [1] : vector<8x10xf32> to vector<8xf32>
    %267 = vector.shape_cast %266 : vector<8xf32> to vector<8x1xf32>
    %268 = tpu.reciprocal %267 {approx = true} : vector<8x1xf32> -> vector<8x1xf32>
    %269 = vector.broadcast %268 : vector<8x1xf32> to vector<8x10xf32>
    %270 = arith.mulf %265, %269 : vector<8x10xf32>
    %271 = arith.truncf %270 : vector<8x10xf32> to vector<8x10xbf16>
    %cst_70 = arith.constant dense<0.000000e+00> : vector<8x64xf32>
    %272 = tpu.matmul %271, %259, %cst_70 {dimension_numbers = #tpu.dot_dimension_numbers<[1], [0], [0], [1], [0, 0, 1, 1], [], []>} : vector<8x10xbf16>, vector<10x64xbf16>, vector<8x64xf32> -> vector<8x64xf32>
    %273 = arith.truncf %272 : vector<8x64xf32> to vector<8x64xbf16>
    %274 = vector.extract_strided_slice %6 {offsets = [0, 448], sizes = [8, 64], strides = [1, 1]} : vector<8x512xbf16> to vector<8x64xbf16>
    %275 = vector.extract_strided_slice %153 {offsets = [0, 448], sizes = [10, 64], strides = [1, 1]} : vector<10x512xbf16> to vector<10x64xbf16>
    %276 = vector.extract_strided_slice %154 {offsets = [0, 448], sizes = [10, 64], strides = [1, 1]} : vector<10x512xbf16> to vector<10x64xbf16>
    %cst_71 = arith.constant dense<0.000000e+00> : vector<8x10xf32>
    %277 = tpu.matmul %274, %275, %cst_71 {dimension_numbers = #tpu.dot_dimension_numbers<[1], [1], [0], [0], [0, 0, 1, 0], [], []>} : vector<8x64xbf16>, vector<10x64xbf16>, vector<8x10xf32> -> vector<8x10xf32>
    %cst_72 = arith.constant dense<0xFF800000> : vector<8xf32>
    %278 = vector.multi_reduction <maximumf>, %277, %cst_72 [1] : vector<8x10xf32> to vector<8xf32>
    %279 = vector.shape_cast %278 : vector<8xf32> to vector<8x1xf32>
    %280 = vector.broadcast %279 : vector<8x1xf32> to vector<8x10xf32>
    %281 = arith.subf %277, %280 : vector<8x10xf32>
    %282 = math.exp %281 : vector<8x10xf32>
    %cst_73 = arith.constant dense<0.000000e+00> : vector<8xf32>
    %283 = vector.multi_reduction <add>, %282, %cst_73 [1] : vector<8x10xf32> to vector<8xf32>
    %284 = vector.shape_cast %283 : vector<8xf32> to vector<8x1xf32>
    %285 = tpu.reciprocal %284 {approx = true} : vector<8x1xf32> -> vector<8x1xf32>
    %286 = vector.broadcast %285 : vector<8x1xf32> to vector<8x10xf32>
    %287 = arith.mulf %282, %286 : vector<8x10xf32>
    %288 = arith.truncf %287 : vector<8x10xf32> to vector<8x10xbf16>
    %cst_74 = arith.constant dense<0.000000e+00> : vector<8x64xf32>
    %289 = tpu.matmul %288, %276, %cst_74 {dimension_numbers = #tpu.dot_dimension_numbers<[1], [0], [0], [1], [0, 0, 1, 1], [], []>} : vector<8x10xbf16>, vector<10x64xbf16>, vector<8x64xf32> -> vector<8x64xf32>
    %290 = arith.truncf %289 : vector<8x64xf32> to vector<8x64xbf16>
    %291 = tpu.concatenate %171, %188, %205, %222, %239, %256, %273, %290 in 1 : vector<8x64xbf16>, vector<8x64xbf16>, vector<8x64xbf16>, vector<8x64xbf16>, vector<8x64xbf16>, vector<8x64xbf16>, vector<8x64xbf16>, vector<8x64xbf16> -> vector<8x512xbf16>
    %292 = tpu.concatenate %152, %291 in 0 : vector<8x512xbf16>, vector<8x512xbf16> -> vector<16x512xbf16>
    %c0_75 = arith.constant 0 : index
    %c0_76 = arith.constant 0 : index
    %293 = vector.load %arg5[%c0_75, %c0_76] : memref<512x512xbf16, #tpu.memory_space<vmem>>, vector<512x512xbf16>
    %cst_77 = arith.constant dense<0.000000e+00> : vector<16x512xf32>
    %294 = tpu.matmul %292, %293, %cst_77 {dimension_numbers = #tpu.dot_dimension_numbers<[1], [0], [0], [1], [0, 0, 1, 1], [], []>} : vector<16x512xbf16>, vector<512x512xbf16>, vector<16x512xf32> -> vector<16x512xf32>
    %c0_78 = arith.constant 0 : index
    %c0_79 = arith.constant 0 : index
    %295 = vector.load %arg7[%c0_78, %c0_79] : memref<1x512xf32, #tpu.memory_space<vmem>>, vector<1x512xf32>
    %296 = vector.broadcast %295 : vector<1x512xf32> to vector<16x512xf32>
    %297 = arith.addf %294, %296 : vector<16x512xf32>
    %298 = vector.shape_cast %297 : vector<16x512xf32> to vector<2x8x512xf32>
    %c0_80 = arith.constant 0 : index
    %c0_81 = arith.constant 0 : index
    %c0_82 = arith.constant 0 : index
    %c0_83 = arith.constant 0 : index
    %299 = vector.load %arg8[%c0_80, %c0_81, %c0_82, %c0_83] : memref<1x2x8x512xf32, #tpu.memory_space<vmem>>, vector<1x2x8x512xf32>
    %300 = vector.shape_cast %299 : vector<1x2x8x512xf32> to vector<2x8x512xf32>
    %301 = vector.shape_cast %298 : vector<2x8x512xf32> to vector<1x2x8x512xf32>
    tpu.vector_store %arg8[%c0_80, %c0_81, %c0_82, %c0_83], %301 {strides = array<i32>} : memref<1x2x8x512xf32, #tpu.memory_space<vmem>>, vector<1x2x8x512xf32>,
    return
  }
  func.func @transform_0(%arg0: i32) -> (i32, i32) {
    %c0_i32 = arith.constant 0 : i32
    %c0_i32_0 = arith.constant 0 : i32
    return %arg0, %c0_i32 : i32, i32
  }
  func.func @transform_1(%arg0: i32) -> (i32, i32, i32) {
    %c0_i32 = arith.constant 0 : i32
    %c0_i32_0 = arith.constant 0 : i32
    %c0_i32_1 = arith.constant 0 : i32
    return %arg0, %c0_i32, %c0_i32_0 : i32, i32, i32
  }
  func.func @transform_2(%arg0: i32) -> (i32, i32) {
    %c0_i32 = arith.constant 0 : i32
    %c0_i32_0 = arith.constant 0 : i32
    %c0_i32_1 = arith.constant 0 : i32
    return %c0_i32, %c0_i32_0 : i32, i32
  }
  func.func @transform_3(%arg0: i32) -> (i32, i32) {
    %c0_i32 = arith.constant 0 : i32
    %c0_i32_0 = arith.constant 0 : i32
    %c0_i32_1 = arith.constant 0 : i32
    return %c0_i32, %c0_i32_0 : i32, i32
  }
  func.func @transform_4(%arg0: i32) -> (i32, i32) {
    %c0_i32 = arith.constant 0 : i32
    %c0_i32_0 = arith.constant 0 : i32
    %c0_i32_1 = arith.constant 0 : i32
    return %c0_i32, %c0_i32_0 : i32, i32
  }
  func.func @transform_5(%arg0: i32) -> (i32, i32) {
    %c0_i32 = arith.constant 0 : i32
    %c0_i32_0 = arith.constant 0 : i32
    %c0_i32_1 = arith.constant 0 : i32
    return %c0_i32, %c0_i32_0 : i32, i32
  }
  func.func @transform_6(%arg0: i32) -> (i32, i32) {
    %c0_i32 = arith.constant 0 : i32
    %c0_i32_0 = arith.constant 0 : i32
    %c0_i32_1 = arith.constant 0 : i32
    return %c0_i32, %c0_i32_0 : i32, i32
  }
  func.func @transform_7(%arg0: i32) -> (i32, i32, i32, i32) {
    %c0_i32 = arith.constant 0 : i32
    %c0_i32_0 = arith.constant 0 : i32
    %c0_i32_1 = arith.constant 0 : i32
    %c0_i32_2 = arith.constant 0 : i32
    return %arg0, %c0_i32, %c0_i32_0, %c0_i32_1 : i32, i32, i32, i32
  }
}

</mosaic_0001>

<bundles_post_ra>
// kernel: combine_attention_pallas.1
= control target key start
LH: loop header
LB: loop body
LE: loop exit
PB: predicated region body
PF: predicated region fallthrough
CT: control target
= control target key end

     0   :  { %12 = vsyncpa [#allocation3], 0  ;;  %s9320_s0 = inlined_call_operand.vmem [shape: bf16[48,512], index: 0, kind: input, shape index: {}]   ;;  %s9321_s1 = inlined_call_operand.vmem [shape: bf16[6,20,512], index: 1, kind: input, shape index: {}]   ;;  %s9322_s2 = inlined_call_operand.hbm [shape: bf16[512,512], index: 2, kind: input, shape index: {}]   ;;  %s9323_s3 = inlined_call_operand.vmem [shape: bf16[512,1024], index: 3, kind: input, shape index: {}]   ;;  %s9324_s4 = inlined_call_operand.hbm [shape: bf16[512,512], index: 4, kind: input, shape index: {}]   ;;  %s9325_s5 = inlined_call_operand.vmem [shape: f32[1,512], index: 5, kind: input, shape index: {}]   ;;  %s9326_s6 = inlined_call_operand.vmem [shape: f32[1,512], index: 6, kind: input, shape index: {}]   ;;  %s9327_s7 = inlined_call_operand.hbm [shape: f32[6,2,8,512], index: 7, kind: output, shape index: {}]  }
   0x1   :  { %13 = vsyncpa [#allocation6], 0 }
   0x2   :  { %14 = vsyncpa [#allocation4], 0 }
   0x3   :  { %16 = vsyncpa [#allocation4 + $0x1], 0  ;;  %s7732_s24 = smov 0   ;;  %s7734_s25 = smov 0  }
   0x4   :  { %s7736_s26 = smov 0   ;;  %s7738_s27 = smov 0  }
   0x5 LB: > { %s7753_s28 = sadd.s32 4294967295, %s7680_s27   ;;  %s6195_s29 = sadd.s32 4294967294, %s7680_s27   ;;  %s7680_s27 = sphi %s7738_s27, %s9341_s27   ;;  %s7676_s26 = sphi %s7736_s26, %s9340_s26   ;;  %s7672_s25 = sphi %s7734_s25, %s9339_s25   ;;  %s7668_s24 = sphi %s7732_s24, %s9338_s24  }
   0x6   : > { %s7757_s30 = sadd.s32 1, %s7680_s27   ;;  %s186_s8 = sadd.s32 1, %s7676_s26 }
   0x7   : > { %s183_s9 = ssub.s32 %s7680_s27, %s7757_s30  ;;  %p196_p0 = scmp.ne.s32.totalorder %s7676_s26, %s7672_s25 }
   0x8   : > { %p184_p1 = scmp.eq.s32.totalorder %s183_s9, 0  ;;  %p197_p2 = scmp.eq.s32.totalorder %s7753_s28, 5 }
   0x9   : > { %p202_p3 = scmp.ne.s32.totalorder %s7672_s25, %s7668_s24  ;;  %p203_p4 = scmp.eq.s32.totalorder %s6195_s29, 5 }
   0xa   : > { %s7768_s10 = scalar_select %p184_p1, %s7676_s26, %s186_s8  }
   0xb   : > { %p7770_p5 = por %p197_p2, %p196_p0  ;;  %p7774_p6 = por %p203_p4, %p202_p3 }
   0xc   : > { %p6196_p7 = scmp.ge.s32.totalorder %s7680_s27, 1  ;;  %p210_p8 = scmp.lt.s32.totalorder %s7680_s27, 7 }
   0xd   : > { %s9330_s12 = scalar_select %p7774_p6, 1, 0 }
   0xe   : > { %p9328_p9 = scmp.eq.s32.totalorder %s7753_s28, 0  ;;  %p7781_p10 = pnand %p6196_p7, %p210_p8 }
   0xf   : > { %s7682_s14 = smov [#allocation2]   ;;  %s7683_s17 = smov [#allocation5]  }
  0x10   : > { %s222_s15 = sshll.u32 %s7682_s14, 4  ;;  %p7037_p11 = pneg %p7781_p10  ;;  %s223_s15 = int_to_ptr.vmem [resolvable:$true] %s222_s15 }
  0x11   : > { %s238_s18 = sshll.u32 %s7683_s17, 4  ;;  %s7571_s19 = scalar_lea.vmem %s223_s15, 16384  ;;  %s239_s18 = int_to_ptr.vmem [resolvable:$true] %s238_s18 }
  0x12   : > { %p7789_p12 = pnand %p9328_p9, %p7037_p11  ;;  %p7572_p0 = scmp.ne.s32.totalorder %s223_s15, %s7571_s19 }
  0x13   : > { %p7579_p3 = scmp.lt.s32.totalorder %s223_s15, %s223_s15  ;;  %p7580_p4 = scmp.lt.s32.totalorder %s7571_s19, %s7571_s19 }
  0x14   : > { %p7562_p13 = pneg %p7789_p12 }
  0x15   : > { %p7581_p7 = por %p7580_p4, %p7579_p3 }
  0x16   : > { %p7574_p1 = pnand %p7572_p0, %p7562_p13 }
  0x18   : > { %p7575_p2 = pneg %p7574_p1 }
  0x1a   : > { %p7582_p8 = pnand %p7581_p7, %p7575_p2 }
  0x1c   : > { %7585 = shalt.err (!%p7582_p8)
}
  0x1d   : > { %s7684_s20 = smov 256   ;;  %s7685_s21 = smov 16  }
  0x1e   : > { %7040 = dma.hbm_to_vmem [thread:$0]  (!%p7789_p12), %s9322_s2, 16384, %s223_s15, [#allocation3], %s7684_s20, %s7684_s20, %s7685_s21  }
  0x1f   : > { %s7597_s29 = scalar_lea.vmem %s239_s18, 16384  ;;  %p7605_p9 = scmp.lt.s32.totalorder %s239_s18, %s239_s18 }
  0x20   : > { %p7598_p11 = scmp.ne.s32.totalorder %s239_s18, %s7597_s29  ;;  %p7606_p6 = scmp.lt.s32.totalorder %s7597_s29, %s7597_s29 }
  0x22   : > { %p7600_p0 = pnand %p7598_p11, %p7562_p13  ;;  %p7607_p3 = por %p7606_p6, %p7605_p9 }
  0x24   : > { %p7601_p1 = pneg %p7600_p0 }
  0x26   : > { %p7608_p2 = pnand %p7607_p3, %p7601_p1 }
  0x28   : > { %7611 = shalt.err (!%p7608_p2)
}
  0x29   : > { %7043 = dma.hbm_to_vmem [thread:$0]  (!%p7789_p12), %s9324_s4, 16384, %s239_s18, [#allocation6], %s7684_s20, %s7684_s20, %s7685_s21  }
  0x2a   : > { %276 = sbr.rel (%p7781_p10) target bundleno = 1859 (0x743), region = 48  ;;  %p9333_p4 = scmp.eq.s32.totalorder (!%p7781_p10), %s7753_s28, 0 }
  0x2f   : > { %7655 = dma.done.wait (%p9333_p4), [#allocation3], 16384   ;;  %p9334_p13 = pmov %p9333_p4 }
  0x30   : > { %p9335_p7 = pmov %p9333_p4 }
  0x31   : > { %7657 = vsyncadd (%p9334_p13), [#allocation3], 4294950912 }
  0x32   : > { %7659 = dma.done.wait (%p9335_p7), [#allocation6], 16384   ;;  %p9336_p6 = pmov %p9333_p4 }
  0x33   : > { %v7094_v0 = vld [vmem:[#allocation2 + $0xe4] ss:$16 sps:$4 sm:$0xff]   ;;  %v7098_v2 = vld [vmem:[#allocation2 + $0xe0] ss:$16 sps:$4 sm:$0xff]   ;;  %p317_p9 = scmp.lt.s32.totalorder %s7753_s28, 5  ;;  %vm3302_vm0 = vcmask 523264  }
  0x34   : > { %7661 = vsyncadd (%p9336_p6), [#allocation6], 4294950912  ;;  %v7096_v1 = vld [vmem:[#allocation2 + $0x2e4] ss:$16 sps:$4 sm:$0xff]   ;;  %1134 = vmatprep.subr.bf16.mxu0 %v7094_v0  ;;  %v7099_v3 = vld [vmem:[#allocation2 + $0x2e0] ss:$16 sps:$4 sm:$0xff]  }
  0x35   : > { %1175 = vmatprep.subr.bf16.mxu1 %v7096_v1  ;;  %v7100_v4 = vld [vmem:[#allocation2 + $0xc4] ss:$16 sps:$4 sm:$0xff]   ;;  %1135 = vmatpush1.bf16.msra.mxu0 %v7098_v2  ;;  %v7104_v6 = vld [vmem:[#allocation2 + $0xc0] ss:$16 sps:$4 sm:$0xff]   ;;  %s7823_s13 = scalar_select %p317_p9, %s7753_s28, 5  ;;  %vm7688_vm1 = vmmov 0  }
  0x36   : > { %1176 = vmatpush1.bf16.msra.mxu1 %v7099_v3  ;;  %v7102_v5 = vld [vmem:[#allocation2 + $0x2c4] ss:$16 sps:$4 sm:$0xff]   ;;  %1136 = vmatprep.subr.bf16.mxu0 %v7100_v4  ;;  %v7105_v7 = vld [vmem:[#allocation2 + $0x2c0] ss:$16 sps:$4 sm:$0xff]   ;;  %v7196_v4 = vld [vmem:[#allocation2 + $0xec] ss:$16 sps:$4 sm:$0xff]  }
  0x37   : > { %1177 = vmatprep.subr.bf16.mxu1 %v7102_v5  ;;  %v7106_v8 = vld [vmem:[#allocation2 + $0xa4] ss:$16 sps:$4 sm:$0xff]   ;;  %v7110_v10 = vld [vmem:[#allocation2 + $0xa0] ss:$16 sps:$4 sm:$0xff]   ;;  %s6768_s14 = sshll.u32 %s7823_s13, 4  ;;  %s7026_s18 = smul.u32 48, %s7823_s13 }
  0x38   : > { %v7108_v9 = vld [vmem:[#allocation2 + $0x2a4] ss:$16 sps:$4 sm:$0xff]   ;;  %v7111_v11 = vld [vmem:[#allocation2 + $0x2a0] ss:$16 sps:$4 sm:$0xff]   ;;  %s321_s17 = scalar_lea.vmem %s9320_s0, %s6768_s14  ;;  %v7199_v5 = vld [vmem:[#allocation2 + $0x2ec] ss:$16 sps:$4 sm:$0xff]  }
  0x39   : > { %1137 = vmatpush1.bf16.msra.mxu0 %v7104_v6  ;;  %v7112_v12 = vld [vmem:[#allocation2 + $0x84] ss:$16 sps:$4 sm:$0xff]   ;;  %v7116_v14 = vld [vmem:[#allocation2 + $0x80] ss:$16 sps:$4 sm:$0xff]   ;;  %v329_v48 = vld [vmem:[%s321_s17 + $0x8] sm:$0xff]  ;;  %s7843_s21 = scalar_lea.vmem %s9321_s1, %s7026_s18  ;;  %vm4206_vm2 = vcmask 1042432  }
  0x3a   : > { %1178 = vmatpush1.bf16.msra.mxu1 %v7105_v7  ;;  %1138 = vmatprep.subr.bf16.mxu0 %v7106_v8  ;;  %v7114_v13 = vld [vmem:[#allocation2 + $0x284] ss:$16 sps:$4 sm:$0xff]   ;;  %v7117_v15 = vld [vmem:[#allocation2 + $0x280] ss:$16 sps:$4 sm:$0xff]   ;;  %v6210_v51 = vcombine.high %v329_v48, %v329_v48  ;;  %v7834_v7 = vcombine.low %v329_v48, %v329_v48  ;;  %v7194_v8 = vld [vmem:[#allocation2 + $0xe8] ss:$16 sps:$4 sm:$0xff]  }
  0x3b   : > { %1179 = vmatprep.subr.bf16.mxu1 %v7108_v9  ;;  %v7118_v16 = vld [vmem:[#allocation2 + $0x64] ss:$16 sps:$4 sm:$0xff]   ;;  %v7122_v18 = vld [vmem:[#allocation2 + $0x60] ss:$16 sps:$4 sm:$0xff]   ;;  %v7197_v9 = vld [vmem:[#allocation2 + $0x2e8] ss:$16 sps:$4 sm:$0xff]  }
  0x3c   : > { %v7120_v17 = vld [vmem:[#allocation2 + $0x264] ss:$16 sps:$4 sm:$0xff]   ;;  %v7123_v19 = vld [vmem:[#allocation2 + $0x260] ss:$16 sps:$4 sm:$0xff]   ;;  %1207 = vmatprep.mubr.bf16.mxu1 %v6210_v51  ;;  %v7254_v48 = vld [vmem:[#allocation2 + $0x1a8] ss:$16 sps:$4 sm:$0xff]  }
  0x3d   : > { %1139 = vmatpush1.bf16.msra.mxu0 %v7110_v10  ;;  %v7124_v20 = vld [vmem:[#allocation2 + $0x44] ss:$16 sps:$4 sm:$0xff]   ;;  %v7128_v22 = vld [vmem:[#allocation2 + $0x40] ss:$16 sps:$4 sm:$0xff]   ;;  %v7202_v10 = vld [vmem:[#allocation2 + $0xcc] ss:$16 sps:$4 sm:$0xff]  }
  0x3e   : > { %1180 = vmatpush1.bf16.msra.mxu1 %v7111_v11  ;;  %1140 = vmatprep.subr.bf16.mxu0 %v7112_v12  ;;  %v7126_v21 = vld [vmem:[#allocation2 + $0x244] ss:$16 sps:$4 sm:$0xff]   ;;  %v7129_v23 = vld [vmem:[#allocation2 + $0x240] ss:$16 sps:$4 sm:$0xff]   ;;  %v7205_v11 = vld [vmem:[#allocation2 + $0x2cc] ss:$16 sps:$4 sm:$0xff]  }
  0x3f   : > { %1181 = vmatprep.subr.bf16.mxu1 %v7114_v13  ;;  %v7130_v24 = vld [vmem:[#allocation2 + $0x24] ss:$16 sps:$4 sm:$0xff]   ;;  %v7134_v26 = vld [vmem:[#allocation2 + $0x20] ss:$16 sps:$4 sm:$0xff]   ;;  %v7200_v12 = vld [vmem:[#allocation2 + $0xc8] ss:$16 sps:$4 sm:$0xff]  }
  0x40   : > { %v7132_v25 = vld [vmem:[#allocation2 + $0x224] ss:$16 sps:$4 sm:$0xff]   ;;  %v7135_v27 = vld [vmem:[#allocation2 + $0x220] ss:$16 sps:$4 sm:$0xff]   ;;  %v7203_v13 = vld [vmem:[#allocation2 + $0x2c8] ss:$16 sps:$4 sm:$0xff]  }
  0x41   : > { %1141 = vmatpush1.bf16.msra.mxu0 %v7116_v14  ;;  %v7136_v28 = vld [vmem:[#allocation2 + $0x4] ss:$16 sps:$4 sm:$0xff]   ;;  %v7140_v30 = vld [vmem:[#allocation2] ss:$16 sps:$4 sm:$0xff]   ;;  %v7208_v14 = vld [vmem:[#allocation2 + $0xac] ss:$16 sps:$4 sm:$0xff]  }
  0x42   : > { %1182 = vmatpush1.bf16.msra.mxu1 %v7117_v15  ;;  %1142 = vmatprep.subr.bf16.mxu0 %v7118_v16  ;;  %v7138_v29 = vld [vmem:[#allocation2 + $0x204] ss:$16 sps:$4 sm:$0xff]   ;;  %v7141_v31 = vld [vmem:[#allocation2 + $0x200] ss:$16 sps:$4 sm:$0xff]   ;;  %v7211_v15 = vld [vmem:[#allocation2 + $0x2ac] ss:$16 sps:$4 sm:$0xff]  }
  0x43   : > { %1183 = vmatprep.subr.bf16.mxu1 %v7120_v17  ;;  %v7142_v32 = vld [vmem:[#allocation2 + $0x1e4] ss:$16 sps:$4 sm:$0xff]   ;;  %v7146_v34 = vld [vmem:[#allocation2 + $0x1e0] ss:$16 sps:$4 sm:$0xff]   ;;  %v7206_v16 = vld [vmem:[#allocation2 + $0xa8] ss:$16 sps:$4 sm:$0xff]  }
  0x44   : > { %v7144_v33 = vld [vmem:[#allocation2 + $0x3e4] ss:$16 sps:$4 sm:$0xff]   ;;  %v7147_v35 = vld [vmem:[#allocation2 + $0x3e0] ss:$16 sps:$4 sm:$0xff]   ;;  %v7209_v17 = vld [vmem:[#allocation2 + $0x2a8] ss:$16 sps:$4 sm:$0xff]  }
  0x45   : > { %1143 = vmatpush1.bf16.msra.mxu0 %v7122_v18  ;;  %v7148_v36 = vld [vmem:[#allocation2 + $0x1c4] ss:$16 sps:$4 sm:$0xff]   ;;  %v7152_v38 = vld [vmem:[#allocation2 + $0x1c0] ss:$16 sps:$4 sm:$0xff]   ;;  %v7214_v18 = vld [vmem:[#allocation2 + $0x8c] ss:$16 sps:$4 sm:$0xff]  }
  0x46   : > { %1184 = vmatpush1.bf16.msra.mxu1 %v7123_v19  ;;  %1144 = vmatprep.subr.bf16.mxu0 %v7124_v20  ;;  %v7150_v37 = vld [vmem:[#allocation2 + $0x3c4] ss:$16 sps:$4 sm:$0xff]   ;;  %v7153_v39 = vld [vmem:[#allocation2 + $0x3c0] ss:$16 sps:$4 sm:$0xff]   ;;  %v7217_v19 = vld [vmem:[#allocation2 + $0x28c] ss:$16 sps:$4 sm:$0xff]  }
  0x47   : > { %1185 = vmatprep.subr.bf16.mxu1 %v7126_v21  ;;  %v7154_v40 = vld [vmem:[#allocation2 + $0x1a4] ss:$16 sps:$4 sm:$0xff]   ;;  %v7158_v42 = vld [vmem:[#allocation2 + $0x1a0] ss:$16 sps:$4 sm:$0xff]   ;;  %v7212_v20 = vld [vmem:[#allocation2 + $0x88] ss:$16 sps:$4 sm:$0xff]  }
  0x48   : > { %v7156_v41 = vld [vmem:[#allocation2 + $0x3a4] ss:$16 sps:$4 sm:$0xff]   ;;  %v7159_v43 = vld [vmem:[#allocation2 + $0x3a0] ss:$16 sps:$4 sm:$0xff]   ;;  %v7215_v21 = vld [vmem:[#allocation2 + $0x288] ss:$16 sps:$4 sm:$0xff]  }
  0x49   : > { %1145 = vmatpush1.bf16.msra.mxu0 %v7128_v22  ;;  %v7160_v44 = vld [vmem:[#allocation2 + $0x184] ss:$16 sps:$4 sm:$0xff]   ;;  %v7164_v49 = vld [vmem:[#allocation2 + $0x180] ss:$16 sps:$4 sm:$0xff]   ;;  %v7220_v22 = vld [vmem:[#allocation2 + $0x6c] ss:$16 sps:$4 sm:$0xff]  }
  0x4a   : > { %1186 = vmatpush1.bf16.msra.mxu1 %v7129_v23  ;;  %1146 = vmatprep.subr.bf16.mxu0 %v7130_v24  ;;  %v7162_v45 = vld [vmem:[#allocation2 + $0x384] ss:$16 sps:$4 sm:$0xff]   ;;  %v7165_v50 = vld [vmem:[#allocation2 + $0x380] ss:$16 sps:$4 sm:$0xff]   ;;  %v7223_v23 = vld [vmem:[#allocation2 + $0x26c] ss:$16 sps:$4 sm:$0xff]  }
  0x4b   : > { %1187 = vmatprep.subr.bf16.mxu1 %v7132_v25  ;;  %v328_v46 = vld [vmem:[%s321_s17] sm:$0xff]  ;;  %v7218_v24 = vld [vmem:[#allocation2 + $0x68] ss:$16 sps:$4 sm:$0xff]   ;;  %vm3365_vm3 = vcmask 1044480   ;;  %vm3349_vm4 = vcmask 80896   ;;  %vm5102_vm5 = vcmask 1043456  }
  0x4c   : > { %v7829_v47 = vcombine.high %v328_v46, %v328_v46  ;;  %v7166_v52 = vld [vmem:[#allocation2 + $0x164] ss:$16 sps:$4 sm:$0xff]   ;;  %v7170_v54 = vld [vmem:[#allocation2 + $0x160] ss:$16 sps:$4 sm:$0xff]   ;;  %v7832_v6 = vcombine.low %v328_v46, %v328_v46  ;;  %v7221_v25 = vld [vmem:[#allocation2 + $0x268] ss:$16 sps:$4 sm:$0xff]  }
  0x4d   : > { %1147 = vmatpush1.bf16.msra.mxu0 %v7134_v26  ;;  %v7168_v53 = vld [vmem:[#allocation2 + $0x364] ss:$16 sps:$4 sm:$0xff]   ;;  %v7171_v55 = vld [vmem:[#allocation2 + $0x360] ss:$16 sps:$4 sm:$0xff]   ;;  %v7226_v26 = vld [vmem:[#allocation2 + $0x4c] ss:$16 sps:$4 sm:$0xff]  }
  0x4e   : > { %1188 = vmatpush1.bf16.msra.mxu1 %v7135_v27  ;;  %1148 = vmatprep.subr.bf16.mxu0 %v7136_v28  ;;  %v7172_v56 = vld [vmem:[#allocation2 + $0x144] ss:$16 sps:$4 sm:$0xff]   ;;  %v7176_v58 = vld [vmem:[#allocation2 + $0x140] ss:$16 sps:$4 sm:$0xff]   ;;  %v7229_v27 = vld [vmem:[#allocation2 + $0x24c] ss:$16 sps:$4 sm:$0xff]  }
  0x4f   : > { %1189 = vmatprep.subr.bf16.mxu1 %v7138_v29  ;;  %1166 = vmatprep.mubr.bf16.mxu0 %v7829_v47  ;;  %v7174_v57 = vld [vmem:[#allocation2 + $0x344] ss:$16 sps:$4 sm:$0xff]   ;;  %v7177_v59 = vld [vmem:[#allocation2 + $0x340] ss:$16 sps:$4 sm:$0xff]   ;;  %v7224_v28 = vld [vmem:[#allocation2 + $0x48] ss:$16 sps:$4 sm:$0xff]  }
  0x50   : > { %v7178_v60 = vld [vmem:[#allocation2 + $0x124] ss:$16 sps:$4 sm:$0xff]   ;;  %v7182_v62 = vld [vmem:[#allocation2 + $0x120] ss:$16 sps:$4 sm:$0xff]   ;;  %v7227_v29 = vld [vmem:[#allocation2 + $0x248] ss:$16 sps:$4 sm:$0xff]  }
  0x51   : > { %1149 = vmatpush1.bf16.msra.mxu0 %v7140_v30  ;;  %v7180_v61 = vld [vmem:[#allocation2 + $0x324] ss:$16 sps:$4 sm:$0xff]   ;;  %v7183_v63 = vld [vmem:[#allocation2 + $0x320] ss:$16 sps:$4 sm:$0xff]   ;;  %v7232_v30 = vld [vmem:[#allocation2 + $0x2c] ss:$16 sps:$4 sm:$0xff]  }
  0x52   : > { %1190 = vmatpush1.bf16.msra.mxu1 %v7141_v31  ;;  %1150 = vmatprep.subr.bf16.mxu0 %v7142_v32  ;;  %v7184_v0 = vld [vmem:[#allocation2 + $0x104] ss:$16 sps:$4 sm:$0xff]   ;;  %v7188_v2 = vld [vmem:[#allocation2 + $0x100] ss:$16 sps:$4 sm:$0xff]   ;;  %v7235_v31 = vld [vmem:[#allocation2 + $0x22c] ss:$16 sps:$4 sm:$0xff]  }
  0x53   : > { %1191 = vmatprep.subr.bf16.mxu1 %v7144_v33  ;;  %v7186_v1 = vld [vmem:[#allocation2 + $0x304] ss:$16 sps:$4 sm:$0xff]   ;;  %v7189_v3 = vld [vmem:[#allocation2 + $0x300] ss:$16 sps:$4 sm:$0xff]   ;;  %v7230_v32 = vld [vmem:[#allocation2 + $0x28] ss:$16 sps:$4 sm:$0xff]  }
  0x54   : > { %v7233_v33 = vld [vmem:[#allocation2 + $0x228] ss:$16 sps:$4 sm:$0xff]   ;;  %v7256_v46 = vld [vmem:[#allocation2 + $0x1ac] ss:$16 sps:$4 sm:$0xff]   ;;  %s314_s17 = sand.u32 1, %s7672_s25   ;;  %s6769_s22 = sshll.u32 %s7753_s28, 10 }
  0x55   : > { %1151 = vmatpush2.bf16.msra.mxu0 %v7146_v34  ;;  %v7238_v34 = vld [vmem:[#allocation2 + $0xc] ss:$16 sps:$4 sm:$0xff]   ;;  %s6203_s18 = sshll.u32 %s314_s17, 6  ;;  %s9275_s8 = scalar_lea.hbm %s9327_s7, %s6769_s22 }
  0x56   : > { %1192 = vmatpush2.bf16.msra.mxu1 %v7147_v35  ;;  %1152 = vmatprep.subr.bf16.mxu0 %v7148_v36  ;;  %v7241_v35 = vld [vmem:[#allocation2 + $0x20c] ss:$16 sps:$4 sm:$0xff]   ;;  %v7236_v36 = vld [vmem:[#allocation2 + $0x8] ss:$16 sps:$4 sm:$0xff]   ;;  %s9255_s19 = scalar_lea.vmem [#allocation7], %s6203_s18  ;;  %s9280_s9 = scalar_lea.sflag [#allocation4], %s314_s17 }
  0x57   : > { %1193 = vmatprep.subr.bf16.mxu1 %v7150_v37  ;;  %v7239_v37 = vld [vmem:[#allocation2 + $0x208] ss:$16 sps:$4 sm:$0xff]   ;;  %s6099_s20 = sshll.u32 %s9255_s19, 4  ;;  %s7689_s13 = smov [#allocation7]   ;;  %s9269_s20 = int_to_ptr.vmem [resolvable:$true] %s6099_s20 }
  0x58   : > { %s7612_s28 = scalar_lea.vmem %s9269_s20, 1024  ;;  %s7616_s14 = sshll.u32 %s7689_s13, 4  ;;  %s7617_s14 = int_to_ptr.vmem [resolvable:$false] %s7616_s14 }
  0x59   : > { %1153 = vmatpush2.bf16.msra.mxu0 %v7152_v38  ;;  %v7244_v38 = vld [vmem:[#allocation2 + $0x1ec] ss:$16 sps:$4 sm:$0xff]   ;;  %p7613_p10 = scmp.ne.s32.totalorder %s9269_s20, %s7612_s28  ;;  %p7619_p11 = scmp.lt.s32.totalorder %s9269_s20, %s7617_s14 }
  0x5a   : > { %1194 = vmatpush2.bf16.msra.mxu1 %v7153_v39  ;;  %1154 = vmatprep.subr.bf16.mxu0 %v7154_v40  ;;  %v7247_v39 = vld [vmem:[#allocation2 + $0x3ec] ss:$16 sps:$4 sm:$0xff]   ;;  %v7242_v40 = vld [vmem:[#allocation2 + $0x1e8] ss:$16 sps:$4 sm:$0xff]  }
  0x5b   : > { %1195 = vmatprep.subr.bf16.mxu1 %v7156_v41  ;;  %v7245_v41 = vld [vmem:[#allocation2 + $0x3e8] ss:$16 sps:$4 sm:$0xff]   ;;  %p7614_p12 = pnand %p7613_p10, %p7770_p5 }
  0x5d   : > { %1155 = vmatpush2.bf16.msra.mxu0 %v7158_v42  ;;  %v7250_v42 = vld [vmem:[#allocation2 + $0x1cc] ss:$16 sps:$4 sm:$0xff]   ;;  %p7615_p8 = pneg %p7614_p12 }
  0x5e   : > { %1196 = vmatpush2.bf16.msra.mxu1 %v7159_v43  ;;  %1156 = vmatprep.subr.bf16.mxu0 %v7160_v44  ;;  %v7253_v43 = vld [vmem:[#allocation2 + $0x3cc] ss:$16 sps:$4 sm:$0xff]   ;;  %v7248_v44 = vld [vmem:[#allocation2 + $0x1c8] ss:$16 sps:$4 sm:$0xff]  }
  0x5f   : > { %1197 = vmatprep.subr.bf16.mxu1 %v7162_v45  ;;  %v7251_v45 = vld [vmem:[#allocation2 + $0x3c8] ss:$16 sps:$4 sm:$0xff]  }
  0x61   : > { %1157 = vmatpush2.bf16.msra.mxu0 %v7164_v49  ;;  %v7257_v49 = vld [vmem:[#allocation2 + $0x3a8] ss:$16 sps:$4 sm:$0xff]  }
  0x62   : > { %1198 = vmatpush2.bf16.msra.mxu1 %v7165_v50  ;;  %1158 = vmatprep.subr.bf16.mxu0 %v7166_v52  ;;  %v7262_v50 = vld [vmem:[#allocation2 + $0x18c] ss:$16 sps:$4 sm:$0xff]   ;;  %v7260_v52 = vld [vmem:[#allocation2 + $0x188] ss:$16 sps:$4 sm:$0xff]  }
  0x63   : > { %1199 = vmatprep.subr.bf16.mxu1 %v7168_v53  ;;  %v7263_v53 = vld [vmem:[#allocation2 + $0x388] ss:$16 sps:$4 sm:$0xff]  }
  0x65   : > { %1159 = vmatpush2.bf16.msra.mxu0 %v7170_v54  ;;  %v7268_v54 = vld [vmem:[#allocation2 + $0x16c] ss:$16 sps:$4 sm:$0xff]  }
  0x66   : > { %1200 = vmatpush2.bf16.msra.mxu1 %v7171_v55  ;;  %1160 = vmatprep.subr.bf16.mxu0 %v7172_v56  ;;  %v7271_v55 = vld [vmem:[#allocation2 + $0x36c] ss:$16 sps:$4 sm:$0xff]   ;;  %v7266_v56 = vld [vmem:[#allocation2 + $0x168] ss:$16 sps:$4 sm:$0xff]  }
  0x67   : > { %1201 = vmatprep.subr.bf16.mxu1 %v7174_v57  ;;  %v7269_v57 = vld [vmem:[#allocation2 + $0x368] ss:$16 sps:$4 sm:$0xff]  }
  0x69   : > { %1161 = vmatpush2.bf16.msra.mxu0 %v7176_v58  ;;  %v7274_v58 = vld [vmem:[#allocation2 + $0x14c] ss:$16 sps:$4 sm:$0xff]  }
  0x6a   : > { %1202 = vmatpush2.bf16.msra.mxu1 %v7177_v59  ;;  %1162 = vmatprep.subr.bf16.mxu0 %v7178_v60  ;;  %v7277_v59 = vld [vmem:[#allocation2 + $0x34c] ss:$16 sps:$4 sm:$0xff]   ;;  %v7272_v60 = vld [vmem:[#allocation2 + $0x148] ss:$16 sps:$4 sm:$0xff]  }
  0x6b   : > { %1203 = vmatprep.subr.bf16.mxu1 %v7180_v61  ;;  %v7275_v61 = vld [vmem:[#allocation2 + $0x348] ss:$16 sps:$4 sm:$0xff]  }
  0x6d   : > { %1163 = vmatpush2.bf16.msra.mxu0 %v7182_v62  ;;  %v7280_v62 = vld [vmem:[#allocation2 + $0x12c] ss:$16 sps:$4 sm:$0xff]  }
  0x6e   : > { %1204 = vmatpush2.bf16.msra.mxu1 %v7183_v63  ;;  %1164 = vmatprep.subr.bf16.mxu0 %v7184_v0  ;;  %v7283_v63 = vld [vmem:[#allocation2 + $0x32c] ss:$16 sps:$4 sm:$0xff]   ;;  %v7278_v0 = vld [vmem:[#allocation2 + $0x128] ss:$16 sps:$4 sm:$0xff]  }
  0x6f   : > { %1205 = vmatprep.subr.bf16.mxu1 %v7186_v1  ;;  %v7281_v1 = vld [vmem:[#allocation2 + $0x328] ss:$16 sps:$4 sm:$0xff]  }
  0x71   : > { %1165 = vmatpush2.bf16.msra.mxu0 %v7188_v2  ;;  %v7286_v2 = vld [vmem:[#allocation2 + $0x10c] ss:$16 sps:$4 sm:$0xff]  }
  0x72   : > { %1206 = vmatpush2.bf16.msra.mxu1 %v7189_v3  ;;  %1216 = vmatprep.subr.bf16.mxu0 %v7196_v4  ;;  %v7289_v3 = vld [vmem:[#allocation2 + $0x30c] ss:$16 sps:$4 sm:$0xff]   ;;  %v1364_v4 = vld [vmem:[%s9323_s3 + $0x1c0] sm:$0xff] }
  0x73   : > { %1257 = vmatprep.subr.bf16.mxu1 %v7199_v5  ;;  %v1368_v5 = vld [vmem:[%s9323_s3 + $0x1e0] sm:$0xff] }
  0x74   : > { %1167 = vmatmul.mubr.bf16.vlgmr.msra.gmra.mxu0 %v7832_v6 }
  0x75   : > { %1208 = vmatmul.mubr.bf16.vlgmr.msra.gmra.mxu1 %v7834_v7  ;;  %1217 = vmatpush1.bf16.msra.mxu0 %v7194_v8  ;;  %v1492_v8 = vld [vmem:[%s9323_s3 + $0x5c0] sm:$0xff] }
  0x76   : > { %1258 = vmatpush1.bf16.msra.mxu1 %v7197_v9  ;;  %1218 = vmatprep.subr.bf16.mxu0 %v7202_v10  ;;  %v1496_v9 = vld [vmem:[%s9323_s3 + $0x5e0] sm:$0xff]  ;;  %v7284_v10 = vld [vmem:[#allocation2 + $0x108] ss:$16 sps:$4 sm:$0xff]  }
  0x77   : > { %1259 = vmatprep.subr.bf16.mxu1 %v7205_v11  ;;  %1248 = vmatprep.mubr.bf16.mxu0 %v7829_v47  ;;  %v7259_v47 = vld [vmem:[#allocation2 + $0x3ac] ss:$16 sps:$4 sm:$0xff]   ;;  %v7287_v11 = vld [vmem:[#allocation2 + $0x308] ss:$16 sps:$4 sm:$0xff]  }
  0x78   : > { %1289 = vmatprep.mubr.bf16.mxu1 %v6210_v51  ;;  %v7265_v51 = vld [vmem:[#allocation2 + $0x38c] ss:$16 sps:$4 sm:$0xff]  }
  0x79   : > { %1219 = vmatpush1.bf16.msra.mxu0 %v7200_v12  ;;  %v6404_v12 = vcombine.high %v1364_v4, %v1368_v5 }
  0x7a   : > { %1260 = vmatpush1.bf16.msra.mxu1 %v7203_v13  ;;  %1220 = vmatprep.subr.bf16.mxu0 %v7208_v14  ;;  %v6532_v13 = vcombine.high %v1492_v8, %v1496_v9  ;;  %v1356_v14 = vld [vmem:[%s9323_s3 + $0x180] sm:$0xff] }
  0x7b   : > { %1261 = vmatprep.subr.bf16.mxu1 %v7211_v15  ;;  %v1360_v15 = vld [vmem:[%s9323_s3 + $0x1a0] sm:$0xff] }
  0x7d   : > { %1221 = vmatpush1.bf16.msra.mxu0 %v7206_v16  ;;  %v1484_v16 = vld [vmem:[%s9323_s3 + $0x580] sm:$0xff] }
  0x7e   : > { %1262 = vmatpush1.bf16.msra.mxu1 %v7209_v17  ;;  %1222 = vmatprep.subr.bf16.mxu0 %v7214_v18  ;;  %v1488_v17 = vld [vmem:[%s9323_s3 + $0x5a0] sm:$0xff]  ;;  %v6403_v18 = vcombine.low %v1364_v4, %v1368_v5 }
  0x7f   : > { %1263 = vmatprep.subr.bf16.mxu1 %v7217_v19  ;;  %v6531_v19 = vcombine.low %v1492_v8, %v1496_v9  ;;  %v1428_v4 = vld [vmem:[%s9323_s3 + $0x3c0] sm:$0xff] }
  0x80   : > { %v1432_v5 = vld [vmem:[%s9323_s3 + $0x3e0] sm:$0xff] }
  0x81   : > { %1223 = vmatpush1.bf16.msra.mxu0 %v7212_v20  ;;  %v6396_v20 = vcombine.high %v1356_v14, %v1360_v15  ;;  %v1556_v8 = vld [vmem:[%s9323_s3 + $0x7c0] sm:$0xff] }
  0x82   : > { %1264 = vmatpush1.bf16.msra.mxu1 %v7215_v21  ;;  %1224 = vmatprep.subr.bf16.mxu0 %v7220_v22  ;;  %v6524_v21 = vcombine.high %v1484_v16, %v1488_v17  ;;  %v1348_v22 = vld [vmem:[%s9323_s3 + $0x140] sm:$0xff] }
  0x83   : > { %1265 = vmatprep.subr.bf16.mxu1 %v7223_v23  ;;  %v1352_v23 = vld [vmem:[%s9323_s3 + $0x160] sm:$0xff] }
  0x84   : > { %v1560_v9 = vld [vmem:[%s9323_s3 + $0x7e0] sm:$0xff] }
  0x85   : > { %1225 = vmatpush1.bf16.msra.mxu0 %v7218_v24  ;;  %v1476_v24 = vld [vmem:[%s9323_s3 + $0x540] sm:$0xff] }
  0x86   : > { %1266 = vmatpush1.bf16.msra.mxu1 %v7221_v25  ;;  %1226 = vmatprep.subr.bf16.mxu0 %v7226_v26  ;;  %v1480_v25 = vld [vmem:[%s9323_s3 + $0x560] sm:$0xff] }
  0x87   : > { %1267 = vmatprep.subr.bf16.mxu1 %v7229_v27  ;;  %v7882_v26 = vld [vmem:[%s7843_s21 + $0x4] ss:$16 sps:$4 sm:$0xff]   ;;  %v7885_v27 = vld [vmem:[%s7843_s21 + $0xc] ss:$16 sps:$4 sm:$0xff]  }
  0x89   : > { %1227 = vmatpush1.bf16.msra.mxu0 %v7224_v28  ;;  %v6395_v28 = vcombine.low %v1356_v14, %v1360_v15  ;;  %v1420_v14 = vld [vmem:[%s9323_s3 + $0x380] sm:$0xff] }
  0x8a   : > { %1268 = vmatpush1.bf16.msra.mxu1 %v7227_v29  ;;  %1228 = vmatprep.subr.bf16.mxu0 %v7232_v30  ;;  %v6523_v29 = vcombine.low %v1484_v16, %v1488_v17  ;;  %v1340_v30 = vld [vmem:[%s9323_s3 + $0x100] sm:$0xff] }
  0x8b   : > { %1269 = vmatprep.subr.bf16.mxu1 %v7235_v31  ;;  %v1344_v31 = vld [vmem:[%s9323_s3 + $0x120] sm:$0xff] }
  0x8c   : > { %v1424_v15 = vld [vmem:[%s9323_s3 + $0x3a0] sm:$0xff] }
  0x8d   : > { %1229 = vmatpush1.bf16.msra.mxu0 %v7230_v32  ;;  %v6388_v32 = vcombine.high %v1348_v22, %v1352_v23  ;;  %v1548_v16 = vld [vmem:[%s9323_s3 + $0x780] sm:$0xff] }
  0x8e   : > { %1270 = vmatpush1.bf16.msra.mxu1 %v7233_v33  ;;  %1230 = vmatprep.subr.bf16.mxu0 %v7238_v34  ;;  %v6516_v33 = vcombine.high %v1476_v24, %v1480_v25  ;;  %v6387_v34 = vcombine.low %v1348_v22, %v1352_v23  ;;  %v1552_v17 = vld [vmem:[%s9323_s3 + $0x7a0] sm:$0xff] }
  0x8f   : > { %1271 = vmatprep.subr.bf16.mxu1 %v7241_v35  ;;  %v6515_v35 = vcombine.low %v1476_v24, %v1480_v25  ;;  %v1412_v22 = vld [vmem:[%s9323_s3 + $0x340] sm:$0xff] }
  0x90   : > { %v1416_v23 = vld [vmem:[%s9323_s3 + $0x360] sm:$0xff] }
  0x91   : > { %1231 = vmatpush1.bf16.msra.mxu0 %v7236_v36  ;;  %v1332_v36 = vld [vmem:[%s9323_s3 + $0xc0] sm:$0xff] }
  0x92   : > { %1272 = vmatpush1.bf16.msra.mxu1 %v7239_v37  ;;  %1232 = vmatprep.subr.bf16.mxu0 %v7244_v38  ;;  %v1336_v37 = vld [vmem:[%s9323_s3 + $0xe0] sm:$0xff]  ;;  %v6380_v38 = vcombine.high %v1340_v30, %v1344_v31 }
  0x93   : > { %1273 = vmatprep.subr.bf16.mxu1 %v7247_v39  ;;  %v1540_v24 = vld [vmem:[%s9323_s3 + $0x740] sm:$0xff] }
  0x94   : > { %v1544_v25 = vld [vmem:[%s9323_s3 + $0x760] sm:$0xff] }
  0x95   : > { %1233 = vmatpush2.bf16.msra.mxu0 %v7242_v40  ;;  %v1460_v40 = vld [vmem:[%s9323_s3 + $0x4c0] sm:$0xff] }
  0x96   : > { %1274 = vmatpush2.bf16.msra.mxu1 %v7245_v41  ;;  %1234 = vmatprep.subr.bf16.mxu0 %v7250_v42  ;;  %v1464_v41 = vld [vmem:[%s9323_s3 + $0x4e0] sm:$0xff]  ;;  %v6379_v42 = vcombine.low %v1340_v30, %v1344_v31  ;;  %v6459_v30 = vcombine.low %v1420_v14, %v1424_v15  ;;  %v6587_v31 = vcombine.low %v1548_v16, %v1552_v17 }
  0x97   : > { %1275 = vmatprep.subr.bf16.mxu1 %v7253_v43 }
  0x99   : > { %1235 = vmatpush2.bf16.msra.mxu0 %v7248_v44  ;;  %v1324_v44 = vld [vmem:[%s9323_s3 + $0x80] sm:$0xff] }
  0x9a   : > { %1276 = vmatpush2.bf16.msra.mxu1 %v7251_v45  ;;  %1236 = vmatprep.subr.bf16.mxu0 %v7256_v46  ;;  %v1328_v45 = vld [vmem:[%s9323_s3 + $0xa0] sm:$0xff] }
  0x9b   : > { %1277 = vmatprep.subr.bf16.mxu1 %v7259_v47  ;;  %v1452_v46 = vld [vmem:[%s9323_s3 + $0x480] sm:$0xff] }
  0x9c   : > { %v1456_v47 = vld [vmem:[%s9323_s3 + $0x4a0] sm:$0xff] }
  0x9d   : > { %1237 = vmatpush2.bf16.msra.mxu0 %v7254_v48  ;;  %v6372_v48 = vcombine.high %v1332_v36, %v1336_v37 }
  0x9e   : > { %1278 = vmatpush2.bf16.msra.mxu1 %v7257_v49  ;;  %1238 = vmatprep.subr.bf16.mxu0 %v7262_v50  ;;  %v6500_v49 = vcombine.high %v1460_v40, %v1464_v41  ;;  %v6371_v50 = vcombine.low %v1332_v36, %v1336_v37  ;;  %v6451_v36 = vcombine.low %v1412_v22, %v1416_v23 }
  0x9f   : > { %1279 = vmatprep.subr.bf16.mxu1 %v7265_v51  ;;  %v6499_v51 = vcombine.low %v1460_v40, %v1464_v41  ;;  %v6579_v37 = vcombine.low %v1540_v24, %v1544_v25  ;;  %v1524_v40 = vld [vmem:[%s9323_s3 + $0x6c0] sm:$0xff] }
  0xa0   : > { %v1528_v41 = vld [vmem:[%s9323_s3 + $0x6e0] sm:$0xff] }
  0xa1   : > { %1239 = vmatpush2.bf16.msra.mxu0 %v7260_v52  ;;  %v1316_v52 = vld [vmem:[%s9323_s3 + $0x40] sm:$0xff] }
  0xa2   : > { %1280 = vmatpush2.bf16.msra.mxu1 %v7263_v53  ;;  %1240 = vmatprep.subr.bf16.mxu0 %v7268_v54  ;;  %v1320_v53 = vld [vmem:[%s9323_s3 + $0x60] sm:$0xff] }
  0xa3   : > { %1281 = vmatprep.subr.bf16.mxu1 %v7271_v55  ;;  %v1444_v54 = vld [vmem:[%s9323_s3 + $0x440] sm:$0xff] }
  0xa4   : > { %v1448_v55 = vld [vmem:[%s9323_s3 + $0x460] sm:$0xff] }
  0xa5   : > { %1241 = vmatpush2.bf16.msra.mxu0 %v7266_v56  ;;  %v6364_v56 = vcombine.high %v1324_v44, %v1328_v45 }
  0xa6   : > { %1282 = vmatpush2.bf16.msra.mxu1 %v7269_v57  ;;  %1242 = vmatprep.subr.bf16.mxu0 %v7274_v58  ;;  %v6492_v57 = vcombine.high %v1452_v46, %v1456_v47  ;;  %v6363_v58 = vcombine.low %v1324_v44, %v1328_v45 }
  0xa7   : > { %1283 = vmatprep.subr.bf16.mxu1 %v7277_v59  ;;  %v6491_v59 = vcombine.low %v1452_v46, %v1456_v47  ;;  %v1388_v46 = vld [vmem:[%s9323_s3 + $0x280] sm:$0xff] }
  0xa8   : > { %v1392_v47 = vld [vmem:[%s9323_s3 + $0x2a0] sm:$0xff] }
  0xa9   : > { %1243 = vmatpush2.bf16.msra.mxu0 %v7272_v60  ;;  %v1308_v60 = vld [vmem:[%s9323_s3] sm:$0xff] }
  0xaa   : > { %1284 = vmatpush2.bf16.msra.mxu1 %v7275_v61  ;;  %1244 = vmatprep.subr.bf16.mxu0 %v7280_v62  ;;  %v1312_v61 = vld [vmem:[%s9323_s3 + $0x20] sm:$0xff] }
  0xab   : > { %1285 = vmatprep.subr.bf16.mxu1 %v7283_v63  ;;  %v1436_v62 = vld [vmem:[%s9323_s3 + $0x400] sm:$0xff] }
  0xac   : > { %v1440_v63 = vld [vmem:[%s9323_s3 + $0x420] sm:$0xff] }
  0xad   : > { %1245 = vmatpush2.bf16.msra.mxu0 %v7278_v0  ;;  %v6356_v0 = vcombine.high %v1316_v52, %v1320_v53 }
  0xae   : > { %1286 = vmatpush2.bf16.msra.mxu1 %v7281_v1  ;;  %1246 = vmatprep.subr.bf16.mxu0 %v7286_v2  ;;  %v6484_v1 = vcombine.high %v1444_v54, %v1448_v55  ;;  %v6355_v2 = vcombine.low %v1316_v52, %v1320_v53  ;;  %v6563_v53 = vcombine.low %v1524_v40, %v1528_v41 }
  0xaf   : > { %1287 = vmatprep.subr.bf16.mxu1 %v7289_v3  ;;  %v6483_v3 = vcombine.low %v1444_v54, %v1448_v55  ;;  %v1380_v54 = vld [vmem:[%s9323_s3 + $0x240] sm:$0xff] }
  0xb0   : > { %v1384_v55 = vld [vmem:[%s9323_s3 + $0x260] sm:$0xff] }
  0xb1   : > { %1247 = vmatpush2.bf16.msra.mxu0 %v7284_v10  ;;  %v6348_v10 = vcombine.high %v1308_v60, %v1312_v61 }
  0xb2   : > { %1288 = vmatpush2.bf16.msra.mxu1 %v7287_v11  ;;  %2878 = vmatprep.subr.bf16.mxu0 %v6404_v12  ;;  %v6476_v11 = vcombine.high %v1436_v62, %v1440_v63  ;;  %v6347_v12 = vcombine.low %v1308_v60, %v1312_v61  ;;  %v6427_v60 = vcombine.low %v1388_v46, %v1392_v47 }
  0xb3   : > { %2929 = vmatprep.subr.bf16.mxu1 %v6532_v13  ;;  %v6475_v13 = vcombine.low %v1436_v62, %v1440_v63  ;;  %v1372_v62 = vld [vmem:[%s9323_s3 + $0x200] sm:$0xff] }
  0xb4   : > { %1249 = vmatmul.mubr.bf16.vlgmr.msra.gmra.mxu0 %v7832_v6  ;;  %v1468_v6 = vld [vmem:[%s9323_s3 + $0x500] sm:$0xff] }
  0xb5   : > { %1290 = vmatmul.mubr.bf16.vlgmr.msra.gmra.mxu1 %v7834_v7  ;;  %2879 = vmatpush1.bf16.msra.mxu0 %v6403_v18  ;;  %v1472_v7 = vld [vmem:[%s9323_s3 + $0x520] sm:$0xff]  ;;  %v6468_v18 = vcombine.high %v1428_v4, %v1432_v5 }
  0xb6   : > { %2930 = vmatpush1.bf16.msra.mxu1 %v6531_v19  ;;  %2880 = vmatprep.subr.bf16.mxu0 %v6396_v20  ;;  %v6508_v39 = vcombine.high %v1468_v6, %v1472_v7  ;;  %v6507_v43 = vcombine.low %v1468_v6, %v1472_v7  ;;  %v6596_v19 = vcombine.high %v1556_v8, %v1560_v9  ;;  %v1532_v6 = vld [vmem:[%s9323_s3 + $0x700] sm:$0xff] }
  0xb7   : > { %2931 = vmatprep.subr.bf16.mxu1 %v6524_v21  ;;  %2910 = vmatprep.mubr.bf16.mxu0 %v7882_v26  ;;  %v6467_v20 = vcombine.low %v1428_v4, %v1432_v5  ;;  %v6595_v21 = vcombine.low %v1556_v8, %v1560_v9  ;;  %v1536_v7 = vld [vmem:[%s9323_s3 + $0x720] sm:$0xff]  ;;  %v6419_v4 = vcombine.low %v1380_v54, %v1384_v55  ;;  %v1365_v8 = vld [vmem:[%s9323_s3 + $0x1c8] sm:$0xff] }
  0xb8   : > { %2961 = vmatprep.mubr.bf16.mxu1 %v7885_v27  ;;  %v6571_v45 = vcombine.low %v1532_v6, %v1536_v7  ;;  %v1376_v63 = vld [vmem:[%s9323_s3 + $0x220] sm:$0xff]  ;;  %v1369_v9 = vld [vmem:[%s9323_s3 + $0x1e8] sm:$0xff] }
  0xb9   : > { %2881 = vmatpush1.bf16.msra.mxu0 %v6395_v28  ;;  %v6460_v28 = vcombine.high %v1420_v14, %v1424_v15  ;;  %v6411_v14 = vcombine.low %v1372_v62, %v1376_v63 }
  0xba   : > { %2932 = vmatpush1.bf16.msra.mxu1 %v6523_v29  ;;  %2882 = vmatprep.subr.bf16.mxu0 %v6388_v32  ;;  %v6588_v29 = vcombine.high %v1548_v16, %v1552_v17  ;;  %v1404_v32 = vld [vmem:[%s9323_s3 + $0x300] sm:$0xff]  ;;  %v6406_v17 = vcombine.high %v1365_v8, %v1369_v9 }
  0xbb   : > { %2933 = vmatprep.subr.bf16.mxu1 %v6516_v33  ;;  %v1408_v33 = vld [vmem:[%s9323_s3 + $0x320] sm:$0xff] }
  0xbc   : > { %v6443_v44 = vcombine.low %v1404_v32, %v1408_v33  ;;  %v8060_v16 = vld [vmem:[%s7843_s21] ss:$16 sps:$4 sm:$0xff]  }
  0xbd   : > { %2883 = vmatpush1.bf16.msra.mxu0 %v6387_v34  ;;  %v6452_v34 = vcombine.high %v1412_v22, %v1416_v23  ;;  %v1489_v22 = vld [vmem:[%s9323_s3 + $0x5a8] sm:$0xff] }
  0xbe   : > { %2934 = vmatpush1.bf16.msra.mxu1 %v6515_v35  ;;  %2884 = vmatprep.subr.bf16.mxu0 %v6380_v38  ;;  %v6580_v35 = vcombine.high %v1540_v24, %v1544_v25  ;;  %v1396_v38 = vld [vmem:[%s9323_s3 + $0x2c0] sm:$0xff]  ;;  %v8075_v23 = vld [vmem:[%s7843_s21 + $0x8] ss:$16 sps:$4 sm:$0xff]  }
  0xbf   : > { %2935 = vmatprep.subr.bf16.mxu1 %v6508_v39  ;;  %v1400_v39 = vld [vmem:[%s9323_s3 + $0x2e0] sm:$0xff]  ;;  %v1307_v25 = vld [vmem:[%s7843_s21 + $0x28] sm:$0x33] }
  0xc0   : > { %v6435_v52 = vcombine.low %v1396_v38, %v1400_v39  ;;  %v1306_v24 = vld [vmem:[%s7843_s21 + $0x20] sm:$0x33] }
  0xc1   : > { %2885 = vmatpush1.bf16.msra.mxu0 %v6379_v42  ;;  %v6444_v42 = vcombine.high %v1404_v32, %v1408_v33  ;;  %v1349_v32 = vld [vmem:[%s9323_s3 + $0x148] sm:$0xff]  ;;  %v8082_v33 = vcombine.high %v1306_v24, %v1306_v24 }
  0xc2   : > { %2936 = vmatpush1.bf16.msra.mxu1 %v6507_v43  ;;  %2886 = vmatprep.subr.bf16.mxu0 %v6372_v48  ;;  %v6572_v43 = vcombine.high %v1532_v6, %v1536_v7  ;;  %v1516_v48 = vld [vmem:[%s9323_s3 + $0x680] sm:$0xff]  ;;  %v8084_v6 = vcombine.high %v1307_v25, %v1307_v25  ;;  %v1353_v7 = vld [vmem:[%s9323_s3 + $0x168] sm:$0xff] }
  0xc3   : > { %2937 = vmatprep.subr.bf16.mxu1 %v6500_v49  ;;  %v1520_v49 = vld [vmem:[%s9323_s3 + $0x6a0] sm:$0xff] }
  0xc4   : > { %v6555_v61 = vcombine.low %v1516_v48, %v1520_v49 }
  0xc5   : > { %2887 = vmatpush1.bf16.msra.mxu0 %v6371_v50  ;;  %v6436_v50 = vcombine.high %v1396_v38, %v1400_v39  ;;  %v6390_v38 = vcombine.high %v1349_v32, %v1353_v7 }
  0xc6   : > { %2938 = vmatpush1.bf16.msra.mxu1 %v6499_v51  ;;  %2888 = vmatprep.subr.bf16.mxu0 %v6364_v56  ;;  %v6564_v51 = vcombine.high %v1524_v40, %v1528_v41  ;;  %v1508_v56 = vld [vmem:[%s9323_s3 + $0x640] sm:$0xff]  ;;  %v1341_v40 = vld [vmem:[%s9323_s3 + $0x108] sm:$0xff] }
  0xc7   : > { %2939 = vmatprep.subr.bf16.mxu1 %v6492_v57  ;;  %v1512_v57 = vld [vmem:[%s9323_s3 + $0x660] sm:$0xff]  ;;  %v1345_v41 = vld [vmem:[%s9323_s3 + $0x128] sm:$0xff] }
  0xc8   : > { %v6547_v5 = vcombine.low %v1508_v56, %v1512_v57 }
  0xc9   : > { %2889 = vmatpush1.bf16.msra.mxu0 %v6363_v58  ;;  %v6428_v58 = vcombine.high %v1388_v46, %v1392_v47  ;;  %v6389_v46 = vcombine.low %v1349_v32, %v1353_v7  ;;  %v1549_v32 = vld [vmem:[%s9323_s3 + $0x788] sm:$0xff] }
  0xca   : > { %2940 = vmatpush1.bf16.msra.mxu1 %v6491_v59  ;;  %2890 = vmatprep.subr.bf16.mxu0 %v6356_v0  ;;  %v6556_v59 = vcombine.high %v1516_v48, %v1520_v49  ;;  %v1500_v0 = vld [vmem:[%s9323_s3 + $0x600] sm:$0xff]  ;;  %v6382_v48 = vcombine.high %v1341_v40, %v1345_v41  ;;  %v1553_v7 = vld [vmem:[%s9323_s3 + $0x7a8] sm:$0xff] }
  0xcb   : > { %2941 = vmatprep.subr.bf16.mxu1 %v6484_v1  ;;  %v1504_v1 = vld [vmem:[%s9323_s3 + $0x620] sm:$0xff] }
  0xcc   : > { %v6539_v15 = vcombine.low %v1500_v0, %v1504_v1 }
  0xcd   : > { %2891 = vmatpush1.bf16.msra.mxu0 %v6355_v2  ;;  %v6420_v2 = vcombine.high %v1380_v54, %v1384_v55  ;;  %v6381_v54 = vcombine.low %v1341_v40, %v1345_v41  ;;  %v1541_v40 = vld [vmem:[%s9323_s3 + $0x748] sm:$0xff] }
  0xce   : > { %2942 = vmatpush1.bf16.msra.mxu1 %v6483_v3  ;;  %2892 = vmatprep.subr.bf16.mxu0 %v6348_v10  ;;  %v6548_v3 = vcombine.high %v1508_v56, %v1512_v57  ;;  %v1493_v10 = vld [vmem:[%s9323_s3 + $0x5c8] sm:$0xff] }
  0xcf   : > { %2943 = vmatprep.subr.bf16.mxu1 %v6476_v11  ;;  %v1497_v11 = vld [vmem:[%s9323_s3 + $0x5e8] sm:$0xff] }
  0xd0   : > { %v1545_v41 = vld [vmem:[%s9323_s3 + $0x768] sm:$0xff] }
  0xd1   : > { %2893 = vmatpush1.bf16.msra.mxu0 %v6347_v12  ;;  %v6412_v12 = vcombine.high %v1372_v62, %v1376_v63 }
  0xd2   : > { %2944 = vmatpush1.bf16.msra.mxu1 %v6475_v13  ;;  %2894 = vmatprep.subr.bf16.mxu0 %v6468_v18  ;;  %v6540_v13 = vcombine.high %v1500_v0, %v1504_v1  ;;  %v6534_v18 = vcombine.high %v1493_v10, %v1497_v11 }
  0xd3   : > { %2945 = vmatprep.subr.bf16.mxu1 %v6596_v19  ;;  %v1357_v19 = vld [vmem:[%s9323_s3 + $0x188] sm:$0xff] }
  0xd5   : > { %2895 = vmatpush2.bf16.msra.mxu0 %v6467_v20  ;;  %v1361_v20 = vld [vmem:[%s9323_s3 + $0x1a8] sm:$0xff] }
  0xd6   : > { %2946 = vmatpush2.bf16.msra.mxu1 %v6595_v21  ;;  %2896 = vmatprep.subr.bf16.mxu0 %v6460_v28  ;;  %v1485_v21 = vld [vmem:[%s9323_s3 + $0x588] sm:$0xff]  ;;  %v6405_v28 = vcombine.low %v1365_v8, %v1369_v9 }
  0xd7   : > { %2947 = vmatprep.subr.bf16.mxu1 %v6588_v29  ;;  %v6533_v29 = vcombine.low %v1493_v10, %v1497_v11  ;;  %v1309_v10 = vld [vmem:[%s9323_s3 + $0x8] sm:$0xff] }
  0xd8   : > { %v1313_v11 = vld [vmem:[%s9323_s3 + $0x28] sm:$0xff] }
  0xd9   : > { %2897 = vmatpush2.bf16.msra.mxu0 %v6459_v30  ;;  %v6398_v30 = vcombine.high %v1357_v19, %v1361_v20 }
  0xda   : > { %2948 = vmatpush2.bf16.msra.mxu1 %v6587_v31  ;;  %2898 = vmatprep.subr.bf16.mxu0 %v6452_v34  ;;  %v6526_v31 = vcombine.high %v1485_v21, %v1489_v22  ;;  %v1477_v34 = vld [vmem:[%s9323_s3 + $0x548] sm:$0xff] }
  0xdb   : > { %2949 = vmatprep.subr.bf16.mxu1 %v6580_v35  ;;  %v1481_v35 = vld [vmem:[%s9323_s3 + $0x568] sm:$0xff] }
  0xdc   : > { %v6518_v39 = vcombine.high %v1477_v34, %v1481_v35  ;;  %v6517_v47 = vcombine.low %v1477_v34, %v1481_v35 }
  0xdd   : > { %2899 = vmatpush2.bf16.msra.mxu0 %v6451_v36  ;;  %v6397_v36 = vcombine.low %v1357_v19, %v1361_v20  ;;  %v1429_v19 = vld [vmem:[%s9323_s3 + $0x3c8] sm:$0xff] }
  0xde   : > { %2950 = vmatpush2.bf16.msra.mxu1 %v6579_v37  ;;  %2900 = vmatprep.subr.bf16.mxu0 %v6444_v42  ;;  %v6525_v37 = vcombine.low %v1485_v21, %v1489_v22  ;;  %v1469_v42 = vld [vmem:[%s9323_s3 + $0x508] sm:$0xff] }
  0xdf   : > { %2951 = vmatprep.subr.bf16.mxu1 %v6572_v43  ;;  %v1473_v43 = vld [vmem:[%s9323_s3 + $0x528] sm:$0xff] }
  0xe0   : > { %v6510_v49 = vcombine.high %v1469_v42, %v1473_v43  ;;  %v6509_v55 = vcombine.low %v1469_v42, %v1473_v43  ;;  %v1433_v20 = vld [vmem:[%s9323_s3 + $0x3e8] sm:$0xff]  ;;  %v6589_v43 = vcombine.low %v1549_v32, %v1553_v7 }
  0xe1   : > { %2901 = vmatpush2.bf16.msra.mxu0 %v6443_v44  ;;  %v8111_v44 = vcombine.low %v1306_v24, %v1306_v24  ;;  %v1557_v21 = vld [vmem:[%s9323_s3 + $0x7c8] sm:$0xff]  ;;  %v6349_v24 = vcombine.low %v1309_v10, %v1313_v11  ;;  %v6469_v34 = vcombine.low %v1429_v19, %v1433_v20 }
  0xe2   : > { %2952 = vmatpush2.bf16.msra.mxu1 %v6571_v45  ;;  %2902 = vmatprep.subr.bf16.mxu0 %v6436_v50  ;;  %v8113_v45 = vcombine.low %v1307_v25, %v1307_v25  ;;  %v1333_v50 = vld [vmem:[%s9323_s3 + $0xc8] sm:$0xff] }
  0xe3   : > { %2953 = vmatprep.subr.bf16.mxu1 %v6564_v51  ;;  %v1337_v51 = vld [vmem:[%s9323_s3 + $0xe8] sm:$0xff] }
  0xe4   : > { %v6374_v56 = vcombine.high %v1333_v50, %v1337_v51  ;;  %v6373_v62 = vcombine.low %v1333_v50, %v1337_v51  ;;  %v1561_v22 = vld [vmem:[%s9323_s3 + $0x7e8] sm:$0xff] }
  0xe5   : > { %2903 = vmatpush2.bf16.msra.mxu0 %v6435_v52  ;;  %v1461_v52 = vld [vmem:[%s9323_s3 + $0x4c8] sm:$0xff]  ;;  %v6597_v35 = vcombine.low %v1557_v21, %v1561_v22 }
  0xe6   : > { %2954 = vmatpush2.bf16.msra.mxu1 %v6563_v53  ;;  %2904 = vmatprep.subr.bf16.mxu0 %v6428_v58  ;;  %v1465_v53 = vld [vmem:[%s9323_s3 + $0x4e8] sm:$0xff] }
  0xe7   : > { %2955 = vmatprep.subr.bf16.mxu1 %v6556_v59  ;;  %v6502_v57 = vcombine.high %v1461_v52, %v1465_v53  ;;  %v1325_v58 = vld [vmem:[%s9323_s3 + $0x88] sm:$0xff]  ;;  %v6501_v63 = vcombine.low %v1461_v52, %v1465_v53  ;;  %v6581_v53 = vcombine.low %v1541_v40, %v1545_v41 }
  0xe8   : > { %v1329_v59 = vld [vmem:[%s9323_s3 + $0xa8] sm:$0xff] }
  0xe9   : > { %2905 = vmatpush2.bf16.msra.mxu0 %v6427_v60  ;;  %v1453_v60 = vld [vmem:[%s9323_s3 + $0x488] sm:$0xff]  ;;  %v6366_v0 = vcombine.high %v1325_v58, %v1329_v59 }
  0xea   : > { %2956 = vmatpush2.bf16.msra.mxu1 %v6555_v61  ;;  %2906 = vmatprep.subr.bf16.mxu0 %v6420_v2  ;;  %v1457_v61 = vld [vmem:[%s9323_s3 + $0x4a8] sm:$0xff] }
  0xeb   : > { %2957 = vmatprep.subr.bf16.mxu1 %v6548_v3  ;;  %v6494_v1 = vcombine.high %v1453_v60, %v1457_v61  ;;  %v1317_v2 = vld [vmem:[%s9323_s3 + $0x48] sm:$0xff] }
  0xec   : > { %v1321_v3 = vld [vmem:[%s9323_s3 + $0x68] sm:$0xff] }
  0xed   : > { %2907 = vmatpush2.bf16.msra.mxu0 %v6419_v4  ;;  %v6365_v4 = vcombine.low %v1325_v58, %v1329_v59  ;;  %v6358_v8 = vcombine.high %v1317_v2, %v1321_v3  ;;  %v1533_v50 = vld [vmem:[%s9323_s3 + $0x708] sm:$0xff] }
  0xee   : > { %2958 = vmatpush2.bf16.msra.mxu1 %v6547_v5  ;;  %2908 = vmatprep.subr.bf16.mxu0 %v6412_v12  ;;  %v6493_v5 = vcombine.low %v1453_v60, %v1457_v61  ;;  %v1437_v12 = vld [vmem:[%s9323_s3 + $0x408] sm:$0xff] }
  0xef   : > { %2959 = vmatprep.subr.bf16.mxu1 %v6540_v13  ;;  %v1441_v13 = vld [vmem:[%s9323_s3 + $0x428] sm:$0xff] }
  0xf0   : > { %v6477_v25 = vcombine.low %v1437_v12, %v1441_v13  ;;  %v1537_v51 = vld [vmem:[%s9323_s3 + $0x728] sm:$0xff] }
  0xf1   : > { %2909 = vmatpush2.bf16.msra.mxu0 %v6411_v14  ;;  %v6357_v14 = vcombine.low %v1317_v2, %v1321_v3  ;;  %v1525_v58 = vld [vmem:[%s9323_s3 + $0x6c8] sm:$0xff]  ;;  %v6573_v61 = vcombine.low %v1533_v50, %v1537_v51 }
  0xf2   : > { %2960 = vmatpush2.bf16.msra.mxu1 %v6539_v15  ;;  %2980 = vmatprep.subr.bf16.mxu0 %v6406_v17  ;;  %v6350_v17 = vcombine.high %v1309_v10, %v1313_v11  ;;  %v1529_v59 = vld [vmem:[%s9323_s3 + $0x6e8] sm:$0xff] }
  0xf3   : > { %3031 = vmatprep.subr.bf16.mxu1 %v6534_v18  ;;  %v6478_v18 = vcombine.high %v1437_v12, %v1441_v13  ;;  %v1517_v2 = vld [vmem:[%s9323_s3 + $0x688] sm:$0xff] }
  0xf4   : > { %2911 = vmatmul.mubr.bf16.vlgmr.msra.gmra.mxu0 %v8060_v16  ;;  %v1521_v3 = vld [vmem:[%s9323_s3 + $0x6a8] sm:$0xff] }
  0xf5   : > { %2962 = vmatmul.mubr.bf16.vlgmr.msra.gmra.mxu1 %v8075_v23  ;;  %2981 = vmatpush1.bf16.msra.mxu0 %v6405_v28  ;;  %v6470_v28 = vcombine.high %v1429_v19, %v1433_v20  ;;  %v1509_v10 = vld [vmem:[%s9323_s3 + $0x648] sm:$0xff]  ;;  %v6557_v13 = vcombine.low %v1517_v2, %v1521_v3 }
  0xf6   : > { %3032 = vmatpush1.bf16.msra.mxu1 %v6533_v29  ;;  %2982 = vmatprep.subr.bf16.mxu0 %v6398_v30  ;;  %v6598_v29 = vcombine.high %v1557_v21, %v1561_v22  ;;  %v1421_v30 = vld [vmem:[%s9323_s3 + $0x388] sm:$0xff] }
  0xf7   : > { %3033 = vmatprep.subr.bf16.mxu1 %v6526_v31  ;;  %2920 = vmatprep.mubr.bf16.mxu0 %v8082_v33  ;;  %v1425_v31 = vld [vmem:[%s9323_s3 + $0x3a8] sm:$0xff] }
  0xf8   : > { %2971 = vmatprep.mubr.bf16.mxu1 %v8084_v6  ;;  %v6461_v42 = vcombine.low %v1421_v30, %v1425_v31  ;;  %v1513_v11 = vld [vmem:[%s9323_s3 + $0x668] sm:$0xff] }
  0xf9   : > { %2983 = vmatpush1.bf16.msra.mxu0 %v6397_v36  ;;  %v6462_v36 = vcombine.high %v1421_v30, %v1425_v31  ;;  %v1377_v19 = vld [vmem:[%s9323_s3 + $0x228] sm:$0xff]  ;;  %v1366_v30 = vld [vmem:[%s9323_s3 + $0x1d0] sm:$0xff] }
  0xfa   : > { %3034 = vmatpush1.bf16.msra.mxu1 %v6525_v37  ;;  %2984 = vmatprep.subr.bf16.mxu0 %v6390_v38  ;;  %v6590_v37 = vcombine.high %v1549_v32, %v1553_v7  ;;  %v1413_v38 = vld [vmem:[%s9323_s3 + $0x348] sm:$0xff]  ;;  %v1370_v31 = vld [vmem:[%s9323_s3 + $0x1f0] sm:$0xff] }
  0xfb   : > { %3035 = vmatprep.subr.bf16.mxu1 %v6518_v39  ;;  %v1417_v39 = vld [vmem:[%s9323_s3 + $0x368] sm:$0xff]  ;;  %v1494_v32 = vld [vmem:[%s9323_s3 + $0x5d0] sm:$0xff] }
  0xfc   : > { %2921 = vmatmul.mubr.bf16.gmra.mxu0 %v8111_v44  ;;  %v6453_v52 = vcombine.low %v1413_v38, %v1417_v39  ;;  %v1501_v20 = vld [vmem:[%s9323_s3 + $0x608] sm:$0xff]  ;;  %v1498_v7 = vld [vmem:[%s9323_s3 + $0x5f0] sm:$0xff] }
  0xfd   : > { %2972 = vmatmul.mubr.bf16.gmra.mxu1 %v8113_v45  ;;  %2985 = vmatpush1.bf16.msra.mxu0 %v6389_v46  ;;  %v6454_v46 = vcombine.high %v1413_v38, %v1417_v39  ;;  %v1505_v21 = vld [vmem:[%s9323_s3 + $0x628] sm:$0xff]  ;;  %v6408_v38 = vcombine.high %v1366_v30, %v1370_v31  ;;  %v6536_v39 = vcombine.high %v1494_v32, %v1498_v7 }
  0xfe   : > { %3036 = vmatpush1.bf16.msra.mxu1 %v6517_v47  ;;  %2986 = vmatprep.subr.bf16.mxu0 %v6382_v48  ;;  %v6582_v47 = vcombine.high %v1541_v40, %v1545_v41  ;;  %v1405_v48 = vld [vmem:[%s9323_s3 + $0x308] sm:$0xff]  ;;  %v1358_v41 = vld [vmem:[%s9323_s3 + $0x190] sm:$0xff] }
  0xff   : > { %3037 = vmatprep.subr.bf16.mxu1 %v6510_v49  ;;  %3012 = vmatprep.mubr.bf16.mxu0 %v7882_v26  ;;  %v1445_v26 = vld [vmem:[%s9323_s3 + $0x448] sm:$0xff] }
 0x100   : > { %3063 = vmatprep.mubr.bf16.mxu1 %v7885_v27  ;;  %v1449_v27 = vld [vmem:[%s9323_s3 + $0x468] sm:$0xff] }
 0x101   : > { %2987 = vmatpush1.bf16.msra.mxu0 %v6381_v54  ;;  %v6486_v9 = vcombine.high %v1445_v26, %v1449_v27  ;;  %v6485_v15 = vcombine.low %v1445_v26, %v1449_v27  ;;  %v1409_v49 = vld [vmem:[%s9323_s3 + $0x328] sm:$0xff]  ;;  %v6565_v27 = vcombine.low %v1525_v58, %v1529_v59 }
 0x102   : > { %3038 = vmatpush1.bf16.msra.mxu1 %v6509_v55  ;;  %2988 = vmatprep.subr.bf16.mxu0 %v6374_v56  ;;  %v6446_v54 = vcombine.high %v1405_v48, %v1409_v49  ;;  %v6574_v55 = vcombine.high %v1533_v50, %v1537_v51  ;;  %v1397_v56 = vld [vmem:[%s9323_s3 + $0x2c8] sm:$0xff]  ;;  %v6445_v60 = vcombine.low %v1405_v48, %v1409_v49  ;;  %v1490_v48 = vld [vmem:[%s9323_s3 + $0x5b0] sm:$0xff] }
 0x103   : > { %3039 = vmatprep.subr.bf16.mxu1 %v6502_v57  ;;  %v1401_v57 = vld [vmem:[%s9323_s3 + $0x2e8] sm:$0xff]  ;;  %v1350_v51 = vld [vmem:[%s9323_s3 + $0x150] sm:$0xff] }
 0x104   : > { %v6437_v26 = vcombine.low %v1397_v56, %v1401_v57 }
 0x105   : > { %2989 = vmatpush1.bf16.msra.mxu0 %v6373_v62  ;;  %v6438_v62 = vcombine.high %v1397_v56, %v1401_v57 }
 0x106   : > { %3040 = vmatpush1.bf16.msra.mxu1 %v6501_v63  ;;  %2990 = vmatprep.subr.bf16.mxu0 %v6366_v0  ;;  %v6566_v63 = vcombine.high %v1525_v58, %v1529_v59  ;;  %v1389_v0 = vld [vmem:[%s9323_s3 + $0x288] sm:$0xff] }
 0x107   : > { %3041 = vmatprep.subr.bf16.mxu1 %v6494_v1  ;;  %v1393_v1 = vld [vmem:[%s9323_s3 + $0x2a8] sm:$0xff] }
 0x108   : > { %v6429_v12 = vcombine.low %v1389_v0, %v1393_v1 }
 0x109   : > { %2991 = vmatpush1.bf16.msra.mxu0 %v6365_v4  ;;  %v6430_v4 = vcombine.high %v1389_v0, %v1393_v1 }
 0x10a   : > { %3042 = vmatpush1.bf16.msra.mxu1 %v6493_v5  ;;  %2992 = vmatprep.subr.bf16.mxu0 %v6358_v8  ;;  %v6558_v5 = vcombine.high %v1517_v2, %v1521_v3  ;;  %v1381_v8 = vld [vmem:[%s9323_s3 + $0x248] sm:$0xff]  ;;  %v1342_v2 = vld [vmem:[%s9323_s3 + $0x110] sm:$0xff] }
 0x10b   : > { %3043 = vmatprep.subr.bf16.mxu1 %v6486_v9  ;;  %v1385_v9 = vld [vmem:[%s9323_s3 + $0x268] sm:$0xff]  ;;  %v1346_v3 = vld [vmem:[%s9323_s3 + $0x130] sm:$0xff] }
 0x10c   : > { %v6421_v22 = vcombine.low %v1381_v8, %v1385_v9 }
 0x10d   : > { %2993 = vmatpush1.bf16.msra.mxu0 %v6357_v14  ;;  %v460_v14 = vlaneseq }
 0x10e   : > { %3044 = vmatpush1.bf16.msra.mxu1 %v6485_v15  ;;  %2994 = vmatprep.subr.bf16.mxu0 %v6350_v17  ;;  %v6422_v15 = vcombine.high %v1381_v8, %v1385_v9  ;;  %v6550_v17 = vcombine.high %v1509_v10, %v1513_v11 }
 0x10f   : > { %3045 = vmatprep.subr.bf16.mxu1 %v6478_v18  ;;  %v1373_v18 = vld [vmem:[%s9323_s3 + $0x208] sm:$0xff] }
 0x111   : > { %2995 = vmatpush1.bf16.msra.mxu0 %v6349_v24  ;;  %v6549_v24 = vcombine.low %v1509_v10, %v1513_v11  ;;  %v1470_v10 = vld [vmem:[%s9323_s3 + $0x510] sm:$0xff] }
 0x112   : > { %3046 = vmatpush1.bf16.msra.mxu1 %v6477_v25  ;;  %2996 = vmatprep.subr.bf16.mxu0 %v6470_v28  ;;  %v8263_v25 = vshrl.u32 %v460_v14, 7  ;;  %v6414_v28 = vcombine.high %v1373_v18, %v1377_v19  ;;  %v1474_v11 = vld [vmem:[%s9323_s3 + $0x530] sm:$0xff]  ;;  %v6384_v14 = vcombine.high %v1342_v2, %v1346_v3 }
 0x113   : > { %3047 = vmatprep.subr.bf16.mxu1 %v6598_v29  ;;  %v6542_v29 = vcombine.high %v1501_v20, %v1505_v21 }
 0x114   : > { %v466_v40 = vsub.s32 1, %v8263_v25 }
 0x115   : > { %2997 = vmatpush2.bf16.msra.mxu0 %v6469_v34  ;;  %v6413_v34 = vcombine.low %v1373_v18, %v1377_v19  ;;  %v6512_v19 = vcombine.high %v1470_v10, %v1474_v11 }
 0x116   : > { %3048 = vmatpush2.bf16.msra.mxu1 %v6597_v35  ;;  %2998 = vmatprep.subr.bf16.mxu0 %v6462_v36  ;;  %v6541_v35 = vcombine.low %v1501_v20, %v1505_v21  ;;  %v462_v36 = vsub.s32 0, %v8263_v25  ;;  %v6383_v20 = vcombine.low %v1342_v2, %v1346_v3  ;;  %v1462_v21 = vld [vmem:[%s9323_s3 + $0x4d0] sm:$0xff] }
 0x117   : > { %3049 = vmatprep.subr.bf16.mxu1 %v6590_v37  ;;  %v8281_v37 = vld [vmem:[%s9325_s5] sm:$0xf]  ;;  %v1562_v2 = vld [vmem:[%s9323_s3 + $0x7f0] sm:$0xff] }
 0x118   : > { %v467_v50 = vrot.slane %v8281_v37, %v466_v40 }
 0x119   : > { %2999 = vmatpush2.bf16.msra.mxu0 %v6461_v42  ;;  %v1362_v42 = vld [vmem:[%s9323_s3 + $0x1b0] sm:$0xff] }
 0x11a   : > { %3050 = vmatpush2.bf16.msra.mxu1 %v6589_v43  ;;  %3000 = vmatprep.subr.bf16.mxu0 %v6454_v46  ;;  %v463_v43 = vrot.slane %v8281_v37, %v462_v36  ;;  %v6407_v46 = vcombine.low %v1366_v30, %v1370_v31  ;;  %v6400_v49 = vcombine.high %v1358_v41, %v1362_v42  ;;  %v1330_v30 = vld [vmem:[%s9323_s3 + $0xb0] sm:$0xff] }
 0x11b   : > { %3051 = vmatprep.subr.bf16.mxu1 %v6582_v47  ;;  %v1486_v47 = vld [vmem:[%s9323_s3 + $0x590] sm:$0xff]  ;;  %v6399_v58 = vcombine.low %v1358_v41, %v1362_v42  ;;  %v6511_v31 = vcombine.low %v1470_v10, %v1474_v11 }
 0x11c   : > { %v6528_v56 = vcombine.high %v1486_v47, %v1490_v48  ;;  %v1318_v41 = vld [vmem:[%s9323_s3 + $0x50] sm:$0xff] }
 0x11d   : > { %3001 = vmatpush2.bf16.msra.mxu0 %v6453_v52  ;;  %v1354_v52 = vld [vmem:[%s9323_s3 + $0x170] sm:$0xff] }
 0x11e   : > { %3052 = vmatpush2.bf16.msra.mxu1 %v6581_v53  ;;  %3002 = vmatprep.subr.bf16.mxu0 %v6446_v54  ;;  %v6535_v53 = vcombine.low %v1494_v32, %v1498_v7  ;;  %v6391_v8 = vcombine.low %v1350_v51, %v1354_v52  ;;  %v8359_v32 = vld [vmem:[%s7843_s21 + $0xc] ss:$16 sps:$4 sm:$0xff]   ;;  %v1322_v42 = vld [vmem:[%s9323_s3 + $0x70] sm:$0xff] }
 0x11f   : > { %3053 = vmatprep.subr.bf16.mxu1 %v6574_v55  ;;  %v1550_v10 = vld [vmem:[%s9323_s3 + $0x790] sm:$0xff] }
 0x120   : > { %v1554_v11 = vld [vmem:[%s9323_s3 + $0x7b0] sm:$0xff] }
 0x121   : > { %3003 = vmatpush2.bf16.msra.mxu0 %v6445_v60 }
 0x122   : > { %3054 = vmatpush2.bf16.msra.mxu1 %v6573_v61  ;;  %3004 = vmatprep.subr.bf16.mxu0 %v6438_v62  ;;  %v6392_v61 = vcombine.high %v1350_v51, %v1354_v52  ;;  %v1478_v62 = vld [vmem:[%s9323_s3 + $0x550] sm:$0xff] }
 0x123   : > { %3055 = vmatprep.subr.bf16.mxu1 %v6566_v63  ;;  %v1482_v63 = vld [vmem:[%s9323_s3 + $0x570] sm:$0xff] }
 0x124   : > { %v6520_v9 = vcombine.high %v1478_v62, %v1482_v63  ;;  %v6519_v18 = vcombine.low %v1478_v62, %v1482_v63  ;;  %v1310_v51 = vld [vmem:[%s9323_s3 + $0x10] sm:$0xff] }
 0x125   : > { %3005 = vmatpush2.bf16.msra.mxu0 %v6437_v26  ;;  %v6527_v26 = vcombine.low %v1486_v47, %v1490_v48  ;;  %v1446_v48 = vld [vmem:[%s9323_s3 + $0x450] sm:$0xff] }
 0x126   : > { %3056 = vmatpush2.bf16.msra.mxu1 %v6565_v27  ;;  %3006 = vmatprep.subr.bf16.mxu0 %v6430_v4  ;;  %v1314_v52 = vld [vmem:[%s9323_s3 + $0x30] sm:$0xff] }
 0x127   : > { %3057 = vmatprep.subr.bf16.mxu1 %v6558_v5  ;;  %v6351_v63 = vcombine.low %v1310_v51, %v1314_v52 }
 0x129   : > { %3007 = vmatpush2.bf16.msra.mxu0 %v6429_v12 }
 0x12a   : > { %3058 = vmatpush2.bf16.msra.mxu1 %v6557_v13  ;;  %3008 = vmatprep.subr.bf16.mxu0 %v6422_v15  ;;  %v1334_v15 = vld [vmem:[%s9323_s3 + $0xd0] sm:$0xff] }
 0x12b   : > { %3059 = vmatprep.subr.bf16.mxu1 %v6550_v17  ;;  %v1338_v17 = vld [vmem:[%s9323_s3 + $0xf0] sm:$0xff] }
 0x12d   : > { %3009 = vmatpush2.bf16.msra.mxu0 %v6421_v22  ;;  %v1466_v22 = vld [vmem:[%s9323_s3 + $0x4f0] sm:$0xff] }
 0x12e   : > { %3060 = vmatpush2.bf16.msra.mxu1 %v6549_v24  ;;  %3010 = vmatprep.subr.bf16.mxu0 %v6414_v28  ;;  %v6376_v24 = vcombine.high %v1334_v15, %v1338_v17  ;;  %v8349_v28 = vld [vmem:[%s7843_s21 + $0x4] ss:$16 sps:$4 sm:$0xff]   ;;  %v6504_v7 = vcombine.high %v1462_v21, %v1466_v22 }
 0x12f   : > { %3061 = vmatprep.subr.bf16.mxu1 %v6542_v29  ;;  %v1326_v29 = vld [vmem:[%s9323_s3 + $0x90] sm:$0xff] }
 0x130   : > { %v6367_v47 = vcombine.low %v1326_v29, %v1330_v30 }
 0x131   : > { %3011 = vmatpush2.bf16.msra.mxu0 %v6413_v34  ;;  %v6375_v34 = vcombine.low %v1334_v15, %v1338_v17  ;;  %v6592_v17 = vcombine.high %v1550_v10, %v1554_v11 }
 0x132   : > { %3062 = vmatpush2.bf16.msra.mxu1 %v6541_v35  ;;  %3082 = vmatprep.subr.bf16.mxu0 %v6408_v38  ;;  %v1454_v35 = vld [vmem:[%s9323_s3 + $0x490] sm:$0xff] }
 0x133   : > { %3133 = vmatprep.subr.bf16.mxu1 %v6536_v39  ;;  %v1458_v38 = vld [vmem:[%s9323_s3 + $0x4b0] sm:$0xff]  ;;  %v6368_v39 = vcombine.high %v1326_v29, %v1330_v30  ;;  %v6591_v29 = vcombine.low %v1550_v10, %v1554_v11  ;;  %v1367_v11 = vld [vmem:[%s9323_s3 + $0x1d8] sm:$0xff] }
 0x134   : > { %v1168_v54 = vpop.f32.mrf.mxu0  ;;  %3013 = vmatmul.mubr.bf16.vlgmr.msra.gmra.mxu0 %v8060_v16 }
 0x135   : > { %v1209_v55 = vpop.f32.mrf.mxu1  ;;  %3064 = vmatmul.mubr.bf16.vlgmr.msra.gmra.mxu1 %v8075_v23  ;;  %v1169_v57 = vadd.f32 %v1168_v54, %v463_v43  ;;  %3083 = vmatpush1.bf16.msra.mxu0 %v6407_v46  ;;  %v6503_v43 = vcombine.low %v1462_v21, %v1466_v22  ;;  %v6496_v46 = vcombine.high %v1454_v35, %v1458_v38  ;;  %v1406_v22 = vld [vmem:[%s9323_s3 + $0x310] sm:$0xff] }
 0x136   : > { %3022 = vmatprep.mubr.bf16.mxu0 %v8082_v33  ;;  %v1170_v59 = vpop.f32.mrf.mxu0  ;;  %3084 = vmatprep.subr.bf16.mxu0 %v6400_v49  ;;  %v1450_v49 = vld [vmem:[%s9323_s3 + $0x470] sm:$0xff] }
 0x137   : > { %v1211_v60 = vpop.f32.mrf.mxu1  ;;  %3073 = vmatprep.mubr.bf16.mxu1 %v8084_v6  ;;  %v8318_v0 = vadd.f32 %v1209_v55, %v1169_v57  ;;  %v1171_v1 = vadd.f32 %v1170_v59, %v467_v50  ;;  %3134 = vmatpush1.bf16.msra.mxu1 %v6535_v53  ;;  %v6360_v50 = vcombine.high %v1318_v41, %v1322_v42  ;;  %v1442_v57 = vld [vmem:[%s9323_s3 + $0x430] sm:$0xff] }
 0x138   : > { %v1172_v27 = vpop.f32.mrf.mxu0  ;;  %3135 = vmatprep.subr.bf16.mxu1 %v6528_v56  ;;  %v6495_v53 = vcombine.low %v1454_v35, %v1458_v38  ;;  %v6488_v54 = vcombine.high %v1446_v48, %v1450_v49  ;;  %v6359_v55 = vcombine.low %v1318_v41, %v1322_v42  ;;  %v1438_v56 = vld [vmem:[%s9323_s3 + $0x410] sm:$0xff] }
 0x139   : > { %v1213_v4 = vpop.f32.mrf.mxu1  ;;  %v8326_v5 = vadd.f32 %v1211_v60, %v1171_v1  ;;  %3085 = vmatpush1.bf16.msra.mxu0 %v6399_v58  ;;  %v6352_v58 = vcombine.high %v1310_v51, %v1314_v52  ;;  %v1430_v59 = vld [vmem:[%s9323_s3 + $0x3d0] sm:$0xff]  ;;  %v6480_v62 = vcombine.high %v1438_v56, %v1442_v57 }
 0x13a   : > { %v1173_v12 = vpop.f32.mrf.mxu0  ;;  %3086 = vmatprep.subr.bf16.mxu0 %v6392_v61  ;;  %v1434_v60 = vld [vmem:[%s9323_s3 + $0x3f0] sm:$0xff]  ;;  %v6487_v61 = vcombine.low %v1446_v48, %v1450_v49  ;;  %v6479_v4 = vcombine.low %v1438_v56, %v1442_v57 }
 0x13b   : > { %v1214_v13 = vpop.f32.mrf.mxu1  ;;  %3136 = vmatpush1.bf16.msra.mxu1 %v6527_v26  ;;  %v1558_v1 = vld [vmem:[%s9323_s3 + $0x7d0] sm:$0xff]  ;;  %v6472_v3 = vcombine.high %v1430_v59, %v1434_v60 }
 0x13c   : > { %3023 = vmatmul.mubr.bf16.gmra.mxu0 %v8111_v44  ;;  %3137 = vmatprep.subr.bf16.mxu1 %v6520_v9  ;;  %v1422_v26 = vld [vmem:[%s9323_s3 + $0x390] sm:$0xff]  ;;  %v6471_v9 = vcombine.low %v1430_v59, %v1434_v60  ;;  %v6599_v15 = vcombine.low %v1558_v1, %v1562_v2 }
 0x13d   : > { %3074 = vmatmul.mubr.bf16.gmra.mxu1 %v8113_v45  ;;  %3087 = vmatpush1.bf16.msra.mxu0 %v6391_v8  ;;  %v1426_v27 = vld [vmem:[%s9323_s3 + $0x3b0] sm:$0xff]  ;;  %v6600_v8 = vcombine.high %v1558_v1, %v1562_v2 }
 0x13e   : > { %3088 = vmatprep.subr.bf16.mxu0 %v6384_v14  ;;  %3114 = vmatprep.mubr.bf16.mxu0 %v8349_v28  ;;  %v6464_v12 = vcombine.high %v1422_v26, %v1426_v27  ;;  %v1414_v13 = vld [vmem:[%s9323_s3 + $0x350] sm:$0xff] }
 0x13f   : > { %3138 = vmatpush1.bf16.msra.mxu1 %v6519_v18  ;;  %3165 = vmatprep.mubr.bf16.mxu1 %v8359_v32  ;;  %v1418_v14 = vld [vmem:[%s9323_s3 + $0x370] sm:$0xff]  ;;  %v6463_v18 = vcombine.low %v1422_v26, %v1426_v27 }
 0x140   : > { %3139 = vmatprep.subr.bf16.mxu1 %v6512_v19  ;;  %v1542_v19 = vld [vmem:[%s9323_s3 + $0x750] sm:$0xff]  ;;  %v6456_v21 = vcombine.high %v1414_v13, %v1418_v14 }
 0x141   : > { %3089 = vmatpush1.bf16.msra.mxu0 %v6383_v20  ;;  %v1546_v20 = vld [vmem:[%s9323_s3 + $0x770] sm:$0xff] }
 0x142   : > { %3090 = vmatprep.subr.bf16.mxu0 %v6376_v24  ;;  %v1410_v24 = vld [vmem:[%s9323_s3 + $0x330] sm:$0xff]  ;;  %v6584_v30 = vcombine.high %v1542_v19, %v1546_v20  ;;  %v6583_v41 = vcombine.low %v1542_v19, %v1546_v20  ;;  %v1499_v19 = vld [vmem:[%s9323_s3 + $0x5f8] sm:$0xff] }
 0x143   : > { %3140 = vmatpush1.bf16.msra.mxu1 %v6511_v31  ;;  %v6455_v31 = vcombine.low %v1414_v13, %v1418_v14  ;;  %v6448_v35 = vcombine.high %v1406_v22, %v1410_v24  ;;  %v1398_v38 = vld [vmem:[%s9323_s3 + $0x2d0] sm:$0xff] }
 0x144   : > { %3141 = vmatprep.subr.bf16.mxu1 %v6504_v7  ;;  %v1534_v7 = vld [vmem:[%s9323_s3 + $0x710] sm:$0xff] }
 0x145   : > { %3091 = vmatpush1.bf16.msra.mxu0 %v6375_v34  ;;  %v1538_v34 = vld [vmem:[%s9323_s3 + $0x730] sm:$0xff] }
 0x146   : > { %3092 = vmatprep.subr.bf16.mxu0 %v6368_v39  ;;  %v1402_v39 = vld [vmem:[%s9323_s3 + $0x2f0] sm:$0xff]  ;;  %v6576_v42 = vcombine.high %v1534_v7, %v1538_v34  ;;  %v6575_v51 = vcombine.low %v1534_v7, %v1538_v34  ;;  %v1487_v34 = vld [vmem:[%s9323_s3 + $0x598] sm:$0xff] }
 0x147   : > { %3142 = vmatpush1.bf16.msra.mxu1 %v6503_v43  ;;  %v6447_v43 = vcombine.low %v1406_v22, %v1410_v24  ;;  %v6440_v48 = vcombine.high %v1398_v38, %v1402_v39  ;;  %v1390_v49 = vld [vmem:[%s9323_s3 + $0x290] sm:$0xff]  ;;  %v1359_v22 = vld [vmem:[%s9323_s3 + $0x198] sm:$0xff] }
 0x148   : > { %3143 = vmatprep.subr.bf16.mxu1 %v6496_v46  ;;  %v1526_v46 = vld [vmem:[%s9323_s3 + $0x6d0] sm:$0xff]  ;;  %v1363_v24 = vld [vmem:[%s9323_s3 + $0x1b8] sm:$0xff] }
 0x149   : > { %3093 = vmatpush1.bf16.msra.mxu0 %v6367_v47  ;;  %v1530_v47 = vld [vmem:[%s9323_s3 + $0x6f0] sm:$0xff] }
 0x14a   : > { %3094 = vmatprep.subr.bf16.mxu0 %v6360_v50  ;;  %v1394_v50 = vld [vmem:[%s9323_s3 + $0x2b0] sm:$0xff]  ;;  %v6568_v52 = vcombine.high %v1526_v46, %v1530_v47  ;;  %v6567_v59 = vcombine.low %v1526_v46, %v1530_v47 }
 0x14b   : > { %3144 = vmatpush1.bf16.msra.mxu1 %v6495_v53  ;;  %v6439_v53 = vcombine.low %v1398_v38, %v1402_v39  ;;  %v6432_v56 = vcombine.high %v1390_v49, %v1394_v50  ;;  %v1382_v57 = vld [vmem:[%s9323_s3 + $0x250] sm:$0xff]  ;;  %v6402_v38 = vcombine.high %v1359_v22, %v1363_v24 }
 0x14c   : > { %3145 = vmatprep.subr.bf16.mxu1 %v6488_v54  ;;  %v1518_v54 = vld [vmem:[%s9323_s3 + $0x690] sm:$0xff] }
 0x14d   : > { %3095 = vmatpush1.bf16.msra.mxu0 %v6359_v55  ;;  %v1522_v55 = vld [vmem:[%s9323_s3 + $0x6b0] sm:$0xff] }
 0x14e   : > { %3096 = vmatprep.subr.bf16.mxu0 %v6352_v58  ;;  %v1386_v58 = vld [vmem:[%s9323_s3 + $0x270] sm:$0xff]  ;;  %v6560_v60 = vcombine.high %v1518_v54, %v1522_v55  ;;  %v6559_v26 = vcombine.low %v1518_v54, %v1522_v55 }
 0x14f   : > { %3146 = vmatpush1.bf16.msra.mxu1 %v6487_v61  ;;  %v6431_v61 = vcombine.low %v1390_v49, %v1394_v50  ;;  %v6424_v1 = vcombine.high %v1382_v57, %v1386_v58  ;;  %v1374_v2 = vld [vmem:[%s9323_s3 + $0x210] sm:$0xff]  ;;  %v6401_v50 = vcombine.low %v1359_v22, %v1363_v24  ;;  %v1459_v22 = vld [vmem:[%s9323_s3 + $0x4b8] sm:$0xff] }
 0x150   : > { %3147 = vmatprep.subr.bf16.mxu1 %v6480_v62  ;;  %v1510_v62 = vld [vmem:[%s9323_s3 + $0x650] sm:$0xff] }
 0x151   : > { %3097 = vmatpush1.bf16.msra.mxu0 %v6351_v63  ;;  %v1514_v63 = vld [vmem:[%s9323_s3 + $0x670] sm:$0xff] }
 0x152   : > { %3098 = vmatprep.subr.bf16.mxu0 %v6472_v3  ;;  %v1378_v3 = vld [vmem:[%s9323_s3 + $0x230] sm:$0xff]  ;;  %v6552_v27 = vcombine.high %v1510_v62, %v1514_v63  ;;  %v6551_v13 = vcombine.low %v1510_v62, %v1514_v63  ;;  %v1471_v63 = vld [vmem:[%s9323_s3 + $0x518] sm:$0xff] }
 0x153   : > { %3148 = vmatpush1.bf16.msra.mxu1 %v6479_v4  ;;  %v6423_v4 = vcombine.low %v1382_v57, %v1386_v58  ;;  %v6416_v10 = vcombine.high %v1374_v2, %v1378_v3  ;;  %v1347_v57 = vld [vmem:[%s9323_s3 + $0x138] sm:$0xff] }
 0x154   : > { %3149 = vmatprep.subr.bf16.mxu1 %v6600_v8  ;;  %v1502_v8 = vld [vmem:[%s9323_s3 + $0x610] sm:$0xff] }
 0x155   : > { %3099 = vmatpush2.bf16.msra.mxu0 %v6471_v9  ;;  %v1506_v9 = vld [vmem:[%s9323_s3 + $0x630] sm:$0xff] }
 0x156   : > { %3100 = vmatprep.subr.bf16.mxu0 %v6464_v12  ;;  %v1371_v12 = vld [vmem:[%s9323_s3 + $0x1f8] sm:$0xff]  ;;  %v6544_v14 = vcombine.high %v1502_v8, %v1506_v9 }
 0x157   : > { %3150 = vmatpush2.bf16.msra.mxu1 %v6599_v15  ;;  %v6415_v15 = vcombine.low %v1374_v2, %v1378_v3  ;;  %v6410_v20 = vcombine.high %v1367_v11, %v1371_v12  ;;  %v6409_v7 = vcombine.low %v1367_v11, %v1371_v12  ;;  %v1463_v11 = vld [vmem:[%s9323_s3 + $0x4d8] sm:$0xff] }
 0x158   : > { %3151 = vmatprep.subr.bf16.mxu1 %v6592_v17  ;;  %v470_v17 = vsub.s32 2, %v8263_v25  ;;  %v1467_v12 = vld [vmem:[%s9323_s3 + $0x4f8] sm:$0xff] }
 0x159   : > { %3101 = vmatpush2.bf16.msra.mxu0 %v6463_v18  ;;  %v1495_v18 = vld [vmem:[%s9323_s3 + $0x5d8] sm:$0xff] }
 0x15a   : > { %3102 = vmatprep.subr.bf16.mxu0 %v6456_v21  ;;  %v474_v21 = vsub.s32 3, %v8263_v25 }
 0x15b   : > { %3152 = vmatpush2.bf16.msra.mxu1 %v6591_v29  ;;  %v6543_v29 = vcombine.low %v1502_v8, %v1506_v9 }
 0x15c   : > { %3153 = vmatprep.subr.bf16.mxu1 %v6584_v30  ;;  %v6538_v30 = vcombine.high %v1495_v18, %v1499_v19  ;;  %v475_v39 = vrot.slane %v8281_v37, %v474_v21 }
 0x15d   : > { %3103 = vmatpush2.bf16.msra.mxu0 %v6455_v31  ;;  %v471_v31 = vrot.slane %v8281_v37, %v470_v17  ;;  %v1479_v37 = vld [vmem:[%s9323_s3 + $0x558] sm:$0xff] }
 0x15e   : > { %3104 = vmatprep.subr.bf16.mxu0 %v6448_v35  ;;  %v1491_v35 = vld [vmem:[%s9323_s3 + $0x5b8] sm:$0xff] }
 0x15f   : > { %3154 = vmatpush2.bf16.msra.mxu1 %v6583_v41  ;;  %v1351_v41 = vld [vmem:[%s9323_s3 + $0x158] sm:$0xff]  ;;  %v6529_v58 = vcombine.low %v1487_v34, %v1491_v35 }
 0x160   : > { %3155 = vmatprep.subr.bf16.mxu1 %v6576_v42  ;;  %v1355_v42 = vld [vmem:[%s9323_s3 + $0x178] sm:$0xff] }
 0x161   : > { %3105 = vmatpush2.bf16.msra.mxu0 %v6447_v43  ;;  %v6537_v43 = vcombine.low %v1495_v18, %v1499_v19  ;;  %v6394_v54 = vcombine.high %v1351_v41, %v1355_v42  ;;  %v6393_v62 = vcombine.low %v1351_v41, %v1355_v42  ;;  %v6506_v18 = vcombine.high %v1463_v11, %v1467_v12  ;;  %v1315_v41 = vld [vmem:[%s9323_s3 + $0x38] sm:$0xff] }
 0x162   : > { %3106 = vmatprep.subr.bf16.mxu0 %v6440_v48  ;;  %v6530_v48 = vcombine.high %v1487_v34, %v1491_v35  ;;  %v1447_v34 = vld [vmem:[%s9323_s3 + $0x458] sm:$0xff] }
 0x163   : > { %3156 = vmatpush2.bf16.msra.mxu1 %v6575_v51  ;;  %v1483_v51 = vld [vmem:[%s9323_s3 + $0x578] sm:$0xff] }
 0x164   : > { %3157 = vmatprep.subr.bf16.mxu1 %v6568_v52  ;;  %v6521_v8 = vcombine.low %v1479_v37, %v1483_v51  ;;  %v1451_v35 = vld [vmem:[%s9323_s3 + $0x478] sm:$0xff] }
 0x165   : > { %3107 = vmatpush2.bf16.msra.mxu0 %v6439_v53 }
 0x166   : > { %3108 = vmatprep.subr.bf16.mxu0 %v6432_v56  ;;  %v1343_v56 = vld [vmem:[%s9323_s3 + $0x118] sm:$0xff] }
 0x167   : > { %3158 = vmatpush2.bf16.msra.mxu1 %v6567_v59 }
 0x168   : > { %3159 = vmatprep.subr.bf16.mxu1 %v6560_v60 }
 0x169   : > { %3109 = vmatpush2.bf16.msra.mxu0 %v6431_v61  ;;  %v6522_v61 = vcombine.high %v1479_v37, %v1483_v51  ;;  %v1435_v37 = vld [vmem:[%s9323_s3 + $0x3f8] sm:$0xff]  ;;  %v6489_v51 = vcombine.low %v1447_v34, %v1451_v35 }
 0x16a   : > { %3110 = vmatprep.subr.bf16.mxu0 %v6424_v1  ;;  %v1475_v1 = vld [vmem:[%s9323_s3 + $0x538] sm:$0xff] }
 0x16b   : > { %3160 = vmatpush2.bf16.msra.mxu1 %v6559_v26  ;;  %v6386_v26 = vcombine.high %v1343_v56, %v1347_v57  ;;  %v6514_v9 = vcombine.high %v1471_v63, %v1475_v1 }
 0x16c   : > { %3161 = vmatprep.subr.bf16.mxu1 %v6552_v27  ;;  %v1335_v27 = vld [vmem:[%s9323_s3 + $0xd8] sm:$0xff] }
 0x16d   : > { %3111 = vmatpush2.bf16.msra.mxu0 %v6423_v4  ;;  %v1339_v4 = vld [vmem:[%s9323_s3 + $0xf8] sm:$0xff] }
 0x16e   : > { %3112 = vmatprep.subr.bf16.mxu0 %v6416_v10  ;;  %v6385_v10 = vcombine.low %v1343_v56, %v1347_v57  ;;  %v6377_v19 = vcombine.low %v1335_v27, %v1339_v4  ;;  %v1423_v57 = vld [vmem:[%s9323_s3 + $0x398] sm:$0xff] }
 0x16f   : > { %3162 = vmatpush2.bf16.msra.mxu1 %v6551_v13  ;;  %v6378_v13 = vcombine.high %v1335_v27, %v1339_v4 }
 0x170   : > { %3163 = vmatprep.subr.bf16.mxu1 %v6544_v14  ;;  %v1327_v14 = vld [vmem:[%s9323_s3 + $0x98] sm:$0xff] }
 0x171   : > { %3113 = vmatpush2.bf16.msra.mxu0 %v6415_v15  ;;  %v6513_v15 = vcombine.low %v1471_v63, %v1475_v1  ;;  %v1555_v63 = vld [vmem:[%s9323_s3 + $0x7b8] sm:$0xff] }
 0x172   : > { %3184 = vmatprep.subr.bf16.mxu0 %v6410_v20  ;;  %v1455_v20 = vld [vmem:[%s9323_s3 + $0x498] sm:$0xff] }
 0x173   : > { %3164 = vmatpush2.bf16.msra.mxu1 %v6543_v29  ;;  %v1319_v29 = vld [vmem:[%s9323_s3 + $0x58] sm:$0xff]  ;;  %v6497_v42 = vcombine.low %v1455_v20, %v1459_v22 }
 0x174   : > { %v1250_v46 = vpop.f32.mrf.mxu0  ;;  %3115 = vmatmul.mubr.bf16.vlgmr.msra.gmra.mxu0 %v8060_v16  ;;  %3235 = vmatprep.subr.bf16.mxu1 %v6538_v30  ;;  %v6505_v30 = vcombine.low %v1463_v11, %v1467_v12  ;;  %v1407_v11 = vld [vmem:[%s9323_s3 + $0x318] sm:$0xff] }
 0x175   : > { %v1291_v47 = vpop.f32.mrf.mxu1  ;;  %v1251_v49 = vadd.f32 %v1250_v46, %v471_v31  ;;  %3185 = vmatpush1.bf16.msra.mxu0 %v6409_v7  ;;  %3124 = vmatprep.mubr.bf16.mxu0 %v8082_v33  ;;  %v6498_v31 = vcombine.high %v1455_v20, %v1459_v22  ;;  %v1411_v12 = vld [vmem:[%s9323_s3 + $0x338] sm:$0xff] }
 0x176   : > { %v1252_v52 = vpop.f32.mrf.mxu0  ;;  %3186 = vmatprep.subr.bf16.mxu0 %v6402_v38  ;;  %3166 = vmatmul.mubr.bf16.vlgmr.msra.gmra.mxu1 %v8075_v23  ;;  %v1399_v20 = vld [vmem:[%s9323_s3 + $0x2d8] sm:$0xff] }
 0x177   : > { %v1293_v53 = vpop.f32.mrf.mxu1  ;;  %v8535_v16 = vadd.f32 %v1291_v47, %v1251_v49  ;;  %v1253_v55 = vadd.f32 %v1252_v52, %v475_v39  ;;  %3236 = vmatpush1.bf16.msra.mxu1 %v6537_v43  ;;  %3175 = vmatprep.mubr.bf16.mxu1 %v8084_v6  ;;  %v1311_v39 = vld [vmem:[%s9323_s3 + $0x18] sm:$0xff]  ;;  %v6490_v43 = vcombine.high %v1447_v34, %v1451_v35 }
 0x178   : > { %v1254_v59 = vpop.f32.mrf.mxu0  ;;  %3237 = vmatprep.subr.bf16.mxu1 %v6530_v48  ;;  %v1439_v47 = vld [vmem:[%s9323_s3 + $0x418] sm:$0xff]  ;;  %v6354_v49 = vcombine.high %v1311_v39, %v1315_v41 }
 0x179   : > { %v1295_v60 = vpop.f32.mrf.mxu1  ;;  %v8544_v23 = vadd.f32 %v1293_v53, %v1253_v55  ;;  %3187 = vmatpush1.bf16.msra.mxu0 %v6401_v50  ;;  %v1443_v48 = vld [vmem:[%s9323_s3 + $0x438] sm:$0xff]  ;;  %v6353_v53 = vcombine.low %v1311_v39, %v1315_v41 }
 0x17a   : > { %v1255_v2 = vpop.f32.mrf.mxu0  ;;  %3188 = vmatprep.subr.bf16.mxu0 %v6394_v54  ;;  %v1431_v50 = vld [vmem:[%s9323_s3 + $0x3d8] sm:$0xff]  ;;  %v6482_v52 = vcombine.high %v1439_v47, %v1443_v48  ;;  %v6481_v59 = vcombine.low %v1439_v47, %v1443_v48 }
 0x17b   : > { %v1296_v3 = vpop.f32.mrf.mxu1  ;;  %3238 = vmatpush1.bf16.msra.mxu1 %v6529_v58  ;;  %v1559_v54 = vld [vmem:[%s9323_s3 + $0x7d8] sm:$0xff]  ;;  %v6474_v56 = vcombine.high %v1431_v50, %v1435_v37 }
 0x17c   : > { %3125 = vmatmul.mubr.bf16.gmra.mxu0 %v8111_v44  ;;  %3239 = vmatprep.subr.bf16.mxu1 %v6522_v61  ;;  %v1563_v55 = vld [vmem:[%s9323_s3 + $0x7f8] sm:$0xff]  ;;  %v6473_v61 = vcombine.low %v1431_v50, %v1435_v37 }
 0x17d   : > { %3189 = vmatpush1.bf16.msra.mxu0 %v6393_v62  ;;  %3216 = vmatprep.mubr.bf16.mxu0 %v8349_v28  ;;  %v1331_v28 = vld [vmem:[%s9323_s3 + $0xb8] sm:$0xff]  ;;  %v6602_v60 = vcombine.high %v1559_v54, %v1563_v55 }
 0x17e   : > { %3190 = vmatprep.subr.bf16.mxu0 %v6386_v26  ;;  %3176 = vmatmul.mubr.bf16.gmra.mxu1 %v8113_v45  ;;  %v6370_v24 = vcombine.high %v1327_v14, %v1331_v28  ;;  %v6369_v7 = vcombine.low %v1327_v14, %v1331_v28  ;;  %v1427_v58 = vld [vmem:[%s9323_s3 + $0x3b8] sm:$0xff]  ;;  %v6601_v26 = vcombine.low %v1559_v54, %v1563_v55 }
 0x17f   : > { %3240 = vmatpush1.bf16.msra.mxu1 %v6521_v8  ;;  %3267 = vmatprep.mubr.bf16.mxu1 %v8359_v32  ;;  %v1323_v32 = vld [vmem:[%s9323_s3 + $0x78] sm:$0xff]  ;;  %v6466_v1 = vcombine.high %v1423_v57, %v1427_v58  ;;  %v6465_v4 = vcombine.low %v1423_v57, %v1427_v58 }
 0x180   : > { %3241 = vmatprep.subr.bf16.mxu1 %v6514_v9  ;;  %v6362_v38 = vcombine.high %v1319_v29, %v1323_v32  ;;  %v6361_v46 = vcombine.low %v1319_v29, %v1323_v32  ;;  %v1551_v62 = vld [vmem:[%s9323_s3 + $0x798] sm:$0xff]  ;;  %v6449_v32 = vcombine.low %v1407_v11, %v1411_v12 }
 0x181   : > { %3191 = vmatpush1.bf16.msra.mxu0 %v6385_v10  ;;  %v1415_v2 = vld [vmem:[%s9323_s3 + $0x358] sm:$0xff]  ;;  %v6594_v27 = vcombine.high %v1551_v62, %v1555_v63 }
 0x182   : > { %3192 = vmatprep.subr.bf16.mxu0 %v6378_v13  ;;  %v1419_v3 = vld [vmem:[%s9323_s3 + $0x378] sm:$0xff]  ;;  %v6593_v13 = vcombine.low %v1551_v62, %v1555_v63 }
 0x183   : > { %3242 = vmatpush1.bf16.msra.mxu1 %v6513_v15  ;;  %v1543_v8 = vld [vmem:[%s9323_s3 + $0x758] sm:$0xff]  ;;  %v6458_v10 = vcombine.high %v1415_v2, %v1419_v3  ;;  %v6457_v28 = vcombine.low %v1415_v2, %v1419_v3  ;;  %v7686_v3 = vmov 0.0  }
 0x184   : > { %3243 = vmatprep.subr.bf16.mxu1 %v6506_v18  ;;  %v1547_v9 = vld [vmem:[%s9323_s3 + $0x778] sm:$0xff] }
 0x185   : > { %3193 = vmatpush1.bf16.msra.mxu0 %v6377_v19  ;;  %v6586_v14 = vcombine.high %v1543_v8, %v1547_v9  ;;  %v1535_v15 = vld [vmem:[%s9323_s3 + $0x718] sm:$0xff]  ;;  %v6450_v19 = vcombine.high %v1407_v11, %v1411_v12 }
 0x186   : > { %3194 = vmatprep.subr.bf16.mxu0 %v6370_v24  ;;  %v1539_v18 = vld [vmem:[%s9323_s3 + $0x738] sm:$0xff]  ;;  %v6585_v24 = vcombine.low %v1543_v8, %v1547_v9 }
 0x187   : > { %3244 = vmatpush1.bf16.msra.mxu1 %v6505_v30  ;;  %v1403_v22 = vld [vmem:[%s9323_s3 + $0x2f8] sm:$0xff]  ;;  %v6578_v29 = vcombine.high %v1535_v15, %v1539_v18 }
 0x188   : > { %3245 = vmatprep.subr.bf16.mxu1 %v6498_v31  ;;  %v1527_v30 = vld [vmem:[%s9323_s3 + $0x6d8] sm:$0xff]  ;;  %v6441_v41 = vcombine.low %v1399_v20, %v1403_v22 }
 0x189   : > { %3195 = vmatpush1.bf16.msra.mxu0 %v6369_v7  ;;  %v1531_v31 = vld [vmem:[%s9323_s3 + $0x6f8] sm:$0xff]  ;;  %v6442_v7 = vcombine.high %v1399_v20, %v1403_v22 }
 0x18a   : > { %3196 = vmatprep.subr.bf16.mxu0 %v6362_v38  ;;  %v1391_v34 = vld [vmem:[%s9323_s3 + $0x298] sm:$0xff]  ;;  %v6577_v38 = vcombine.low %v1535_v15, %v1539_v18  ;;  %v6570_v39 = vcombine.high %v1527_v30, %v1531_v31 }
 0x18b   : > { %3246 = vmatpush1.bf16.msra.mxu1 %v6497_v42  ;;  %v1395_v35 = vld [vmem:[%s9323_s3 + $0x2b8] sm:$0xff] }
 0x18c   : > { %3247 = vmatprep.subr.bf16.mxu1 %v6490_v43  ;;  %v1519_v42 = vld [vmem:[%s9323_s3 + $0x698] sm:$0xff]  ;;  %v6433_v37 = vcombine.low %v1391_v34, %v1395_v35 }
 0x18d   : > { %3197 = vmatpush1.bf16.msra.mxu0 %v6361_v46  ;;  %v1523_v43 = vld [vmem:[%s9323_s3 + $0x6b8] sm:$0xff]  ;;  %v6434_v46 = vcombine.high %v1391_v34, %v1395_v35  ;;  %v8725_v35 = vpack.c.bf16 %v8326_v5, %v8326_v5 }
 0x18e   : > { %3198 = vmatprep.subr.bf16.mxu0 %v6354_v49  ;;  %v1383_v47 = vld [vmem:[%s9323_s3 + $0x258] sm:$0xff]  ;;  %v6569_v49 = vcombine.low %v1527_v30, %v1531_v31  ;;  %v6562_v50 = vcombine.high %v1519_v42, %v1523_v43 }
 0x18f   : > { %3248 = vmatpush1.bf16.msra.mxu1 %v6489_v51  ;;  %v1387_v48 = vld [vmem:[%s9323_s3 + $0x278] sm:$0xff] }
 0x190   : > { %3249 = vmatprep.subr.bf16.mxu1 %v6482_v52  ;;  %v1511_v51 = vld [vmem:[%s9323_s3 + $0x658] sm:$0xff]  ;;  %v6425_v58 = vcombine.low %v1383_v47, %v1387_v48 }
 0x191   : > { %3199 = vmatpush1.bf16.msra.mxu0 %v6353_v53  ;;  %v1515_v52 = vld [vmem:[%s9323_s3 + $0x678] sm:$0xff]  ;;  %v6426_v53 = vcombine.high %v1383_v47, %v1387_v48 }
 0x192   : > { %3200 = vmatprep.subr.bf16.mxu0 %v6474_v56  ;;  %v1375_v54 = vld [vmem:[%s9323_s3 + $0x218] sm:$0xff]  ;;  %v6561_v56 = vcombine.low %v1519_v42, %v1523_v43  ;;  %v6554_v57 = vcombine.high %v1511_v51, %v1515_v52  ;;  %v6553_v62 = vcombine.low %v1511_v51, %v1515_v52  ;;  %v8736_v43 = vpack.c.bf16 %v8535_v16, %v8535_v16 }
 0x193   : > { %3250 = vmatpush1.bf16.msra.mxu1 %v6481_v59  ;;  %v1379_v55 = vld [vmem:[%s9323_s3 + $0x238] sm:$0xff] }
 0x194   : > { %3251 = vmatprep.subr.bf16.mxu1 %v6602_v60  ;;  %v1503_v59 = vld [vmem:[%s9323_s3 + $0x618] sm:$0xff] }
 0x195   : > { %3201 = vmatpush2.bf16.msra.mxu0 %v6473_v61  ;;  %v1507_v60 = vld [vmem:[%s9323_s3 + $0x638] sm:$0xff]  ;;  %v6418_v61 = vcombine.high %v1375_v54, %v1379_v55 }
 0x196   : > { %3202 = vmatprep.subr.bf16.mxu0 %v6466_v1  ;;  %v6546_v63 = vcombine.high %v1503_v59, %v1507_v60  ;;  %v6417_v1 = vcombine.low %v1375_v54, %v1379_v55  ;;  %v6545_v2 = vcombine.low %v1503_v59, %v1507_v60 }
 0x197   : > { %3252 = vmatpush2.bf16.msra.mxu1 %v6601_v26 }
 0x198   : > { %3253 = vmatprep.subr.bf16.mxu1 %v6594_v27 }
 0x199   : > { %3203 = vmatpush2.bf16.msra.mxu0 %v6465_v4  ;;  %v7558_v4 = vld [vmem:[%s7843_s21] ss:$16 sps:$4 sm:$0xff]  }
 0x19a   : > { %3204 = vmatprep.subr.bf16.mxu0 %v6458_v10  ;;  %v7559_v10 = vld [vmem:[%s7843_s21 + $0x8] ss:$16 sps:$4 sm:$0xff]   ;;  %s7687_s21 = smov 64  }
 0x19b   : > { %3254 = vmatpush2.bf16.msra.mxu1 %v6593_v13 }
 0x19c   : > { %3255 = vmatprep.subr.bf16.mxu1 %v6586_v14 }
 0x19d   : > { %3205 = vmatpush2.bf16.msra.mxu0 %v6457_v28 }
 0x19e   : > { %3206 = vmatprep.subr.bf16.mxu0 %v6450_v19 }
 0x19f   : > { %3256 = vmatpush2.bf16.msra.mxu1 %v6585_v24 }
 0x1a0   : > { %3257 = vmatprep.subr.bf16.mxu1 %v6578_v29 }
 0x1a1   : > { %3207 = vmatpush2.bf16.msra.mxu0 %v6449_v32 }
 0x1a2   : > { %3208 = vmatprep.subr.bf16.mxu0 %v6442_v7 }
 0x1a3   : > { %3258 = vmatpush2.bf16.msra.mxu1 %v6577_v38 }
 0x1a4   : > { %3259 = vmatprep.subr.bf16.mxu1 %v6570_v39 }
 0x1a5   : > { %3209 = vmatpush2.bf16.msra.mxu0 %v6441_v41 }
 0x1a6   : > { %3210 = vmatprep.subr.bf16.mxu0 %v6434_v46  ;;  %v8746_v46 = vpack.c.bf16 %v8544_v23, %v8544_v23 }
 0x1a7   : > { %3260 = vmatpush2.bf16.msra.mxu1 %v6569_v49 }
 0x1a8   : > { %3261 = vmatprep.subr.bf16.mxu1 %v6562_v50 }
 0x1a9   : > { %3211 = vmatpush2.bf16.msra.mxu0 %v6433_v37 }
 0x1aa   : > { %3212 = vmatprep.subr.bf16.mxu0 %v6426_v53 }
 0x1ab   : > { %3262 = vmatpush2.bf16.msra.mxu1 %v6561_v56 }
 0x1ac   : > { %3263 = vmatprep.subr.bf16.mxu1 %v6554_v57 }
 0x1ad   : > { %3213 = vmatpush2.bf16.msra.mxu0 %v6425_v58 }
 0x1ae   : > { %3214 = vmatprep.subr.bf16.mxu0 %v6418_v61 }
 0x1af   : > { %3264 = vmatpush2.bf16.msra.mxu1 %v6553_v62 }
 0x1b0   : > { %3265 = vmatprep.subr.bf16.mxu1 %v6546_v63 }
 0x1b1   : > { %3215 = vmatpush2.bf16.msra.mxu0 %v6417_v1 }
 0x1b2   : > { %6834 = vmatprep.subr.bf16.mxu0 %v7686_v3 }
 0x1b3   : > { %3266 = vmatpush2.bf16.msra.mxu1 %v6545_v2 }
 0x1b4   : > { %v2912_v26 = vpop.f32.mrf.mxu0  ;;  %3217 = vmatmul.mubr.bf16.vlgmr.msra.gmra.mxu0 %v7558_v4  ;;  %6840 = vmatprep.subr.bf16.mxu1 %v7686_v3 }
 0x1b5   : > { %v2963_v27 = vpop.f32.mrf.mxu1  ;;  %3226 = vmatprep.mubr.bf16.mxu0 %v8082_v33 }
 0x1b6   : > { %v2914_v8 = vpop.f32.mrf.mxu0  ;;  %3268 = vmatmul.mubr.bf16.vlgmr.msra.gmra.mxu1 %v7559_v10  ;;  %v2964_v13 = vadd.f32 %v2963_v27, %v2912_v26 }
 0x1b7   : > { %v2965_v9 = vpop.f32.mrf.mxu1  ;;  %3277 = vmatprep.mubr.bf16.mxu1 %v8084_v6 }
 0x1b8   : > { %v2916_v11 = vpop.f32.mrf.mxu0  ;;  %v2966_v18 = vadd.f32 %v2965_v9, %v2914_v8 }
 0x1b9   : > { %v2967_v12 = vpop.f32.mrf.mxu1 }
 0x1ba   : > { %v2968_v14 = vadd.f32 %v2967_v12, %v2916_v11  ;;  %v2918_v28 = vpop.f32.mrf.mxu0 }
 0x1bb   : > { %v2969_v15 = vpop.f32.mrf.mxu1 }
 0x1bc   : > { %v3286_v19 = vpack.c.bf16 %v2968_v14, %v2964_v13  ;;  %v2970_v20 = vadd.f32 %v2969_v15, %v2918_v28  ;;  %v2922_v22 = vpop.f32.mrf.mxu0  ;;  %3227 = vmatmul.mubr.bf16.gmra.mxu0 %v8111_v44  ;;  %v8716_v44 = vpack.c.bf16 %v8318_v0, %v8318_v0 }
 0x1bd   : > { %v2973_v24 = vpop.f32.mrf.mxu1  ;;  %6836 = vmatprep.mubr.msk.bf16.mxu0 %vm7688_vm1, %v7686_v3 }
 0x1be   : > { %v8707_v33 = vpack.c.bf16 %v2970_v20, %v2966_v18  ;;  %v2974_v29 = vadd.f32 %v2973_v24, %v2922_v22  ;;  %3414 = vrot.lane.b32.xlu0 %v3286_v19, %s7687_s21  ;;  %v3307_v6 = vsel %vm3302_vm0, %v3286_v19, 0  ;;  %v2924_v32 = vpop.f32.mrf.mxu0  ;;  %3278 = vmatmul.mubr.bf16.gmra.mxu1 %v8113_v45  ;;  %v4207_v0 = vrot.slane %v3286_v19, 5 }
 0x1bf   : > { %v2975_v30 = vpop.f32.mrf.mxu1  ;;  %6835 = vmatpush3.bf16.xpose.msra.mxu0 %v3307_v6  ;;  %6842 = vmatprep.mubr.msk.bf16.mxu1 %vm7688_vm1, %v7686_v3 }
 0x1c0   : > { %v3294_v31 = vpack.c.bf16 %v2974_v29, %v2974_v29  ;;  %3633 = vrot.lane.b32.xlu1 %v8707_v33, %s7687_s21  ;;  %6846 = vmatprep.subr.bf16.mxu0 %v7686_v3  ;;  %v2926_v7 = vpop.f32.mrf.mxu0  ;;  %v2976_v38 = vadd.f32 %v2975_v30, %v2924_v32  ;;  %v4423_v16 = vrot.slane %v8707_v33, 5  ;;  %v3528_v32 = vsel %vm3302_vm0, %v8707_v33, 0 }
 0x1c1   : > { %v2977_v34 = vpop.f32.mrf.mxu1 }
 0x1c2   : > { %v4208_v45 = vrot.slane %v3294_v31, 5  ;;  %3411 = vrot.lane.b32.xlu0 %v8716_v44, %s7687_s21  ;;  %v2927_v39 = vpop.f32.mrf.mxu0  ;;  %v3295_v5 = vpack.c.bf16 %v2976_v38, %v2976_v38 }
 0x1c3   : > { %v2978_v41 = vpop.f32.mrf.mxu1 }
 0x1c4   : > { %3630 = vrot.lane.b32.xlu1 %v8725_v35, %s7687_s21  ;;  %v8732_v42 = vsel %vm4206_vm2, %v4207_v0, %v4208_v45  ;;  %v4424_v47 = vrot.slane %v3295_v5, 5 }
 0x1c6   : > { %6837 = vmatmul.mubr.msk.bf16.vlgmr.msra.gmra.mxu0 %vm3302_vm0, %v8716_v44  ;;  %v8752_v48 = vsel %vm4206_vm2, %v4423_v16, %v4424_v47 }
 0x1c7   : > { %6848 = vmatprep.mubr.msk.bf16.mxu0 %vm7688_vm1, %v7686_v3 }
 0x1c8   : > { %3849 = vrot.lane.b32.xlu1 %v8736_v43, %s7687_s21 }
 0x1cc   : > { %4068 = vrot.lane.b32.xlu1 %v8746_v46, %s7687_s21 }
 0x1d0   : > { %4532 = vrot.lane.b32.xlu1 %v8752_v48, %s7687_s21 }
 0x1f4   : > { %v3014_v49 = vpop.f32.mrf.mxu0 }
 0x1f5   : > { %v3065_v50 = vpop.f32.mrf.mxu1 }
 0x1f6   : > { %v3016_v37 = vpop.f32.mrf.mxu0  ;;  %v3066_v23 = vadd.f32 %v3065_v50, %v3014_v49 }
 0x1f7   : > { %v3067_v51 = vpop.f32.mrf.mxu1 }
 0x1f8   : > { %v3018_v52 = vpop.f32.mrf.mxu0  ;;  %v3068_v61 = vadd.f32 %v3067_v51, %v3016_v37 }
 0x1f9   : > { %v3069_v53 = vpop.f32.mrf.mxu1 }
 0x1fa   : > { %v3070_v54 = vadd.f32 %v3069_v53, %v3018_v52  ;;  %v3020_v55 = vpop.f32.mrf.mxu0 }
 0x1fb   : > { %v3071_v56 = vpop.f32.mrf.mxu1 }
 0x1fc   : > { %v8756_v57 = vpack.c.bf16 %v3070_v54, %v3066_v23  ;;  %v3072_v58 = vadd.f32 %v3071_v56, %v3020_v55  ;;  %v3024_v59 = vpop.f32.mrf.mxu0 }
 0x1fd   : > { %v3075_v60 = vpop.f32.mrf.mxu1 }
 0x1fe   : > { %v3076_v62 = vadd.f32 %v3075_v60, %v3024_v59  ;;  %3852 = vrot.lane.b32.xlu0 %v8756_v57, %s7687_s21  ;;  %v3026_v63 = vpop.f32.mrf.mxu0  ;;  %v8760_v2 = vpack.c.bf16 %v3072_v58, %v3068_v61  ;;  %v4639_v15 = vrot.slane %v8756_v57, 5  ;;  %v3747_v60 = vsel %vm3302_vm0, %v8756_v57, 0 }
 0x1ff   : > { %v3077_v1 = vpop.f32.mrf.mxu1 }
 0x200   : > { %v3078_v26 = vadd.f32 %v3077_v1, %v3026_v63  ;;  %v3296_v27 = vpack.c.bf16 %v3076_v62, %v3076_v62  ;;  %v3028_v4 = vpop.f32.mrf.mxu0  ;;  %v4855_v13 = vrot.slane %v8760_v2, 5 }
 0x201   : > { %v3079_v8 = vpop.f32.mrf.mxu1 }
 0x202   : > { %v3297_v9 = vpack.c.bf16 %v3078_v26, %v3078_v26  ;;  %4071 = vrot.lane.b32.xlu0 %v8760_v2, %s7687_s21  ;;  %v3029_v10 = vpop.f32.mrf.mxu0  ;;  %v4640_v14 = vrot.slane %v3296_v27, 5  ;;  %v3966_v8 = vsel %vm3302_vm0, %v8760_v2, 0 }
 0x203   : > { %v3080_v11 = vpop.f32.mrf.mxu1 }
 0x204   : > { %v4856_v12 = vrot.slane %v3297_v9, 5  ;;  %v8774_v18 = vsel %vm4206_vm2, %v4639_v15, %v4640_v14 }
 0x206   : > { %4316 = vrot.lane.b32.xlu0 %v8732_v42, %s7687_s21  ;;  %v8768_v28 = vsel %vm4206_vm2, %v4855_v13, %v4856_v12 }
 0x207   : > { %4964 = vrot.lane.b32.xlu1 %v8768_v28, %s7687_s21 }
 0x20a   : > { %4748 = vrot.lane.b32.xlu0 %v8774_v18, %s7687_s21 }
 0x230   : > { %v3415_v19 = vpop.permute.xlu0 %3414 }
 0x231   : > { %v3420_v20 = vsel %vm3302_vm0, %v3415_v19, 0 }
 0x232   : > { %6847 = vmatpush3.bf16.xpose.msra.mxu0 %v3420_v20  ;;  %v3634_v5 = vpop.permute.xlu1 %3633 }
 0x233   : > { %6858 = vmatprep.subr.bf16.mxu0 %v7686_v3  ;;  %v3639_v52 = vsel %vm3302_vm0, %v3634_v5, 0 }
 0x234   : > { %v3116_v22 = vpop.f32.mrf.mxu0  ;;  %v8780_v6 = vpop.permute.xlu0 %3411 }
 0x236   : > { %v3167_v24 = vpop.f32.mrf.mxu1  ;;  %v3118_v29 = vpop.f32.mrf.mxu0 }
 0x237   : > { %v3168_v7 = vadd.f32 %v3167_v24, %v3116_v22  ;;  %v8806_v59 = vpop.permute.xlu1 %3630 }
 0x238   : > { %v3169_v30 = vpop.f32.mrf.mxu1  ;;  %v3120_v31 = vpop.f32.mrf.mxu0 }
 0x239   : > { %6849 = vmatmul.mubr.msk.bf16.vlgmr.msra.gmra.mxu0 %vm3302_vm0, %v8780_v6  ;;  %v3170_v34 = vadd.f32 %v3169_v30, %v3118_v29 }
 0x23a   : > { %6859 = vmatpush3.bf16.xpose.msra.mxu0 %v3528_v32  ;;  %6860 = vmatprep.mubr.msk.bf16.mxu0 %vm7688_vm1, %v7686_v3  ;;  %v3171_v45 = vpop.f32.mrf.mxu1  ;;  %v3122_v0 = vpop.f32.mrf.mxu0 }
 0x23b   : > { %6870 = vmatprep.subr.bf16.mxu0 %v7686_v3  ;;  %v3172_v38 = vadd.f32 %v3171_v45, %v3120_v31  ;;  %v8821_v26 = vpop.permute.xlu1 %3849 }
 0x23c   : > { %v3173_v39 = vpop.f32.mrf.mxu1  ;;  %v3126_v41 = vpop.f32.mrf.mxu0 }
 0x23d   : > { %v8789_v47 = vpack.c.bf16 %v3172_v38, %v3168_v7  ;;  %v3174_v33 = vadd.f32 %v3173_v39, %v3122_v0 }
 0x23e   : > { %v3177_v16 = vpop.f32.mrf.mxu1  ;;  %v3128_v49 = vpop.f32.mrf.mxu0 }
 0x23f   : > { %v8791_v50 = vpack.c.bf16 %v3174_v33, %v3170_v34  ;;  %v8793_v37 = vadd.f32 %v3177_v16, %v3126_v41  ;;  %v3367_v51 = vsel %vm3365_vm3, %v8789_v47, 0  ;;  %v4069_v5 = vpop.permute.xlu1 %4068  ;;  %v4211_v16 = vsel %vm3302_vm0, %v8732_v42, 0 }
 0x240   : > { %v3179_v53 = vpop.f32.mrf.mxu1  ;;  %v3130_v23 = vpop.f32.mrf.mxu0  ;;  %6841 = vmatpush3.bf16.msra.mxu1 %v3367_v51  ;;  %v4427_v42 = vsel %vm3302_vm0, %v8752_v48, 0  ;;  %v4643_v48 = vsel %vm3302_vm0, %v8774_v18, 0  ;;  %v4859_v18 = vsel %vm3302_vm0, %v8768_v28, 0 }
 0x241   : > { %6861 = vmatmul.mubr.msk.bf16.vlgmr.msra.gmra.mxu0 %vm3302_vm0, %v8725_v35  ;;  %v8802_v54 = vadd.f32 %v3179_v53, %v3128_v49  ;;  %6852 = vmatprep.subr.bf16.mxu1 %v7686_v3 }
 0x242   : > { %6871 = vmatpush3.bf16.xpose.msra.mxu0 %v3639_v52  ;;  %6872 = vmatprep.mubr.msk.bf16.mxu0 %vm7688_vm1, %v7686_v3  ;;  %v3131_v55 = vpop.f32.mrf.mxu0  ;;  %v3181_v56 = vpop.f32.mrf.mxu1 }
 0x243   : > { %6882 = vmatprep.subr.bf16.mxu0 %v7686_v3  ;;  %v4533_v23 = vpop.permute.xlu1 %4532 }
 0x244   : > { %v3182_v58 = vpop.f32.mrf.mxu1 }
 0x249   : > { %6873 = vmatmul.mubr.msk.bf16.vlgmr.msra.gmra.mxu0 %vm3302_vm0, %v8806_v59 }
 0x24a   : > { %6883 = vmatpush3.bf16.xpose.msra.mxu0 %v3747_v60  ;;  %6884 = vmatprep.mubr.msk.bf16.mxu0 %vm7688_vm1, %v7686_v3 }
 0x24b   : > { %6894 = vmatprep.subr.bf16.mxu0 %v7686_v3 }
 0x251   : > { %6885 = vmatmul.mubr.msk.bf16.vlgmr.msra.gmra.mxu0 %vm3302_vm0, %v8736_v43 }
 0x252   : > { %6896 = vmatprep.mubr.msk.bf16.mxu0 %vm7688_vm1, %v7686_v3 }
 0x270   : > { %v3853_v61 = vpop.permute.xlu0 %3852 }
 0x271   : > { %v3858_v62 = vsel %vm3302_vm0, %v3853_v61, 0 }
 0x272   : > { %6895 = vmatpush3.bf16.xpose.msra.mxu0 %v3858_v62 }
 0x273   : > { %6906 = vmatprep.subr.bf16.mxu0 %v7686_v3 }
 0x274   : > { %v3218_v63 = vpop.f32.mrf.mxu0  ;;  %v4072_v15 = vpop.permute.xlu0 %4071 }
 0x275   : > { %v4077_v2 = vsel %vm3302_vm0, %v4072_v15, 0 }
 0x276   : > { %v3220_v57 = vpop.f32.mrf.mxu0  ;;  %v3269_v1 = vpop.f32.mrf.mxu1 }
 0x277   : > { %v3270_v27 = vadd.f32 %v3269_v1, %v3218_v63 }
 0x278   : > { %v3222_v4 = vpop.f32.mrf.mxu0  ;;  %v3271_v9 = vpop.f32.mrf.mxu1 }
 0x279   : > { %6897 = vmatmul.mubr.msk.bf16.vlgmr.msra.gmra.mxu0 %vm3302_vm0, %v8821_v26  ;;  %v3272_v11 = vadd.f32 %v3271_v9, %v3220_v57  ;;  %v4317_v52 = vpop.permute.xlu0 %4316  ;;  %v4965_v55 = vpop.permute.xlu1 %4964 }
 0x27a   : > { %6907 = vmatpush3.bf16.xpose.msra.mxu0 %v3966_v8  ;;  %6908 = vmatprep.mubr.msk.bf16.mxu0 %vm7688_vm1, %v7686_v3  ;;  %v3224_v10 = vpop.f32.mrf.mxu0  ;;  %v3273_v12 = vpop.f32.mrf.mxu1  ;;  %v4319_v53 = vsel %vm3302_vm0, %v4317_v52, 0 }
 0x27b   : > { %6918 = vmatprep.subr.bf16.mxu0 %v7686_v3  ;;  %v3274_v14 = vadd.f32 %v3273_v12, %v3222_v4 }
 0x27c   : > { %v3228_v13 = vpop.f32.mrf.mxu0  ;;  %v3275_v19 = vpop.f32.mrf.mxu1 }
 0x27d   : > { %v8830_v22 = vpack.c.bf16 %v3274_v14, %v3270_v27  ;;  %v3276_v24 = vadd.f32 %v3275_v19, %v3224_v10 }
 0x27e   : > { %v3230_v20 = vpop.f32.mrf.mxu0  ;;  %v3279_v29 = vpop.f32.mrf.mxu1 }
 0x27f   : > { %v8835_v30 = vpack.c.bf16 %v3276_v24, %v3272_v11  ;;  %v8837_v31 = vadd.f32 %v3279_v29, %v3228_v13 }
 0x280   : > { %v3232_v32 = vpop.f32.mrf.mxu0  ;;  %v3281_v7 = vpop.f32.mrf.mxu1 }
 0x281   : > { %6909 = vmatmul.mubr.msk.bf16.vlgmr.msra.gmra.mxu0 %vm3302_vm0, %v8746_v46  ;;  %v8842_v45 = vadd.f32 %v3281_v7, %v3230_v20 }
 0x282   : > { %6919 = vmatpush3.bf16.xpose.msra.mxu0 %v4077_v2  ;;  %6920 = vmatprep.mubr.msk.bf16.mxu0 %vm7688_vm1, %v7686_v3  ;;  %v3233_v34 = vpop.f32.mrf.mxu0  ;;  %v3283_v0 = vpop.f32.mrf.mxu1 }
 0x283   : > { %6930 = vmatprep.subr.bf16.mxu0 %v7686_v3 }
 0x284   : > { %v3284_v39 = vpop.f32.mrf.mxu1 }
 0x286   : > { %v8844_v38 = vpop.f32.mrf.mxu0 }
 0x287   : > { %v3350_v41 = vsel %vm3349_vm4, %v8844_v38, -inf }
 0x288   : > { %3351 = vmax.xlane.f32.xlu0 %v3350_v41  ;;  %v6838_v33 = vpop.f32.mrf.mxu0 }
 0x289   : > { %6921 = vmatmul.mubr.msk.bf16.vlgmr.msra.gmra.mxu0 %vm3302_vm0, %v4069_v5 }
 0x28a   : > { %v3346_v49 = vpop.f32.mrf.mxu0  ;;  %6931 = vmatpush3.bf16.xpose.msra.mxu0 %v4211_v16  ;;  %6932 = vmatprep.mubr.msk.bf16.mxu0 %vm7688_vm1, %v7686_v3 }
 0x28b   : > { %6942 = vmatprep.subr.bf16.mxu0 %v7686_v3 }
 0x28c   : > { %v6839_v51 = vpop.f32.mrf.mxu0 }
 0x291   : > { %6933 = vmatmul.mubr.msk.bf16.vlgmr.msra.gmra.mxu0 %vm3302_vm0, %v8716_v44  ;;  %v4535_v44 = vsel %vm3302_vm0, %v4533_v23, 0 }
 0x292   : > { %6943 = vmatpush3.bf16.xpose.msra.mxu0 %v4319_v53  ;;  %6944 = vmatprep.mubr.msk.bf16.mxu0 %vm7688_vm1, %v7686_v3 }
 0x293   : > { %6954 = vmatprep.subr.bf16.mxu0 %v7686_v3 }
 0x299   : > { %6945 = vmatmul.mubr.msk.bf16.vlgmr.msra.gmra.mxu0 %vm3302_vm0, %v8780_v6  ;;  %v4749_v6 = vpop.permute.xlu0 %4748 }
 0x29a   : > { %6955 = vmatpush3.bf16.xpose.msra.mxu0 %v4427_v42  ;;  %6956 = vmatprep.mubr.msk.bf16.mxu0 %vm7688_vm1, %v7686_v3 }
 0x29b   : > { %6966 = vmatprep.subr.bf16.mxu0 %v7686_v3 }
 0x2a1   : > { %6957 = vmatmul.mubr.msk.bf16.vlgmr.msra.gmra.mxu0 %vm3302_vm0, %v8725_v35  ;;  %v4751_v35 = vsel %vm3302_vm0, %v4749_v6, 0 }
 0x2a2   : > { %6967 = vmatpush3.bf16.xpose.msra.mxu0 %v4535_v44  ;;  %6968 = vmatprep.mubr.msk.bf16.mxu0 %vm7688_vm1, %v7686_v3 }
 0x2a3   : > { %6978 = vmatprep.subr.bf16.mxu0 %v7686_v3 }
 0x2a9   : > { %6969 = vmatmul.mubr.msk.bf16.vlgmr.msra.gmra.mxu0 %vm3302_vm0, %v8806_v59 }
 0x2aa   : > { %6979 = vmatpush3.bf16.xpose.msra.mxu0 %v4643_v48  ;;  %6980 = vmatprep.mubr.msk.bf16.mxu0 %vm7688_vm1, %v7686_v3 }
 0x2ab   : > { %6990 = vmatprep.subr.bf16.mxu0 %v7686_v3 }
 0x2b1   : > { %6981 = vmatmul.mubr.msk.bf16.vlgmr.msra.gmra.mxu0 %vm3302_vm0, %v8736_v43  ;;  %v4967_v43 = vsel %vm3302_vm0, %v4965_v55, 0 }
 0x2b2   : > { %6991 = vmatpush3.bf16.xpose.msra.mxu0 %v4751_v35  ;;  %6992 = vmatprep.mubr.msk.bf16.mxu0 %vm7688_vm1, %v7686_v3 }
 0x2b3   : > { %7002 = vmatprep.subr.bf16.mxu0 %v7686_v3 }
 0x2b9   : > { %6993 = vmatmul.mubr.msk.bf16.vlgmr.msra.gmra.mxu0 %vm3302_vm0, %v8821_v26 }
 0x2ba   : > { %7003 = vmatpush3.bf16.xpose.msra.mxu0 %v4859_v18  ;;  %7004 = vmatprep.mubr.msk.bf16.mxu0 %vm7688_vm1, %v7686_v3 }
 0x2bb   : > { %7014 = vmatprep.subr.bf16.mxu0 %v7686_v3 }
 0x2c1   : > { %7005 = vmatmul.mubr.msk.bf16.vlgmr.msra.gmra.mxu0 %vm3302_vm0, %v8746_v46 }
 0x2c2   : > { %7015 = vmatpush3.bf16.xpose.msra.mxu0 %v4967_v43  ;;  %7016 = vmatprep.mubr.msk.bf16.mxu0 %vm7688_vm1, %v7686_v3 }
 0x2c9   : > { %7017 = vmatmul.mubr.msk.bf16.vlgmr.msra.gmra.mxu0 %vm3302_vm0, %v4069_v5 }
 0x2f9   : > { %v8899_v28 = vpop.f32.mrf.mxu0 }
 0x2fa   : > { %v3462_v56 = vsel %vm3349_vm4, %v8899_v28, -inf }
 0x2fb   : > { %3463 = vmax.xlane.f32.xlu1 %v3462_v56  ;;  %v6850_v58 = vpop.f32.mrf.mxu0 }
 0x2fd   : > { %v3459_v59 = vpop.f32.mrf.mxu0 }
 0x2ff   : > { %v6851_v60 = vpop.f32.mrf.mxu0 }
 0x301   : > { %v8903_v61 = vpop.f32.mrf.mxu0 }
 0x302   : > { %v3570_v46 = vsel %vm3349_vm4, %v8903_v61, -inf }
 0x303   : > { %3571 = vmax.xlane.f32.xlu0 %v3570_v46  ;;  %v6862_v62 = vpop.f32.mrf.mxu0 }
 0x305   : > { %v3567_v63 = vpop.f32.mrf.mxu0 }
 0x307   : > { %v6863_v57 = vpop.f32.mrf.mxu0 }
 0x309   : > { %v8907_v1 = vpop.f32.mrf.mxu0 }
 0x30a   : > { %v3681_v26 = vsel %vm3349_vm4, %v8907_v1, -inf }
 0x30b   : > { %3682 = vmax.xlane.f32.xlu0 %v3681_v26  ;;  %v6874_v27 = vpop.f32.mrf.mxu0 }
 0x30d   : > { %v3678_v4 = vpop.f32.mrf.mxu0 }
 0x30f   : > { %v6875_v8 = vpop.f32.mrf.mxu0 }
 0x311   : > { %v3352_v9 = vpop.xlane.xlu0 %3351  ;;  %v8911_v10 = vpop.f32.mrf.mxu0 }
 0x312   : > { %v3353_v11 = vsub.f32 %v8844_v38, %v3352_v9  ;;  %v3789_v12 = vsel %vm3349_vm4, %v8911_v10, -inf }
 0x313   : > { %3790 = vmax.xlane.f32.xlu1 %v3789_v12  ;;  %v6886_v13 = vpop.f32.mrf.mxu0 }
 0x314   : > { %v3354_v14 = vmul.f32 1.442695, %v3353_v11 }
 0x315   : > { %v3786_v15 = vpop.f32.mrf.mxu0 }
 0x316   : > { %7492 = vpow2.f32 %v3354_v14 }
 0x317   : > { %v6887_v19 = vpop.f32.mrf.mxu0 }
 0x323   : > { %v8916_v20 = vpop.eup %7492 }
 0x324   : > { %v3356_v24 = vsel %vm3349_vm4, %v8916_v20, 0.0 }
 0x325   : > { %3357 = vadd.xlane.f32.xlu1 %v3356_v24 }
 0x339   : > { %v8920_v29 = vpop.f32.mrf.mxu0 }
 0x33a   : > { %v3900_v2 = vsel %vm3349_vm4, %v8920_v29, -inf }
 0x33b   : > { %3901 = vmax.xlane.f32.xlu0 %v3900_v2  ;;  %v6898_v32 = vpop.f32.mrf.mxu0 }
 0x33d   : > { %v3897_v7 = vpop.f32.mrf.mxu0 }
 0x33f   : > { %v6899_v34 = vpop.f32.mrf.mxu0 }
 0x341   : > { %v8924_v0 = vpop.f32.mrf.mxu0 }
 0x342   : > { %v4008_v38 = vsel %vm3349_vm4, %v8924_v0, -inf }
 0x343   : > { %4009 = vmax.xlane.f32.xlu1 %v4008_v38  ;;  %v6910_v39 = vpop.f32.mrf.mxu0 }
 0x345   : > { %v4005_v41 = vpop.f32.mrf.mxu0 }
 0x347   : > { %v6911_v5 = vpop.f32.mrf.mxu0 }
 0x349   : > { %v8928_v33 = vpop.f32.mrf.mxu0 }
 0x34a   : > { %v4119_v16 = vsel %vm3349_vm4, %v8928_v33, -inf }
 0x34b   : > { %4120 = vmax.xlane.f32.xlu0 %v4119_v16  ;;  %v6922_v49 = vpop.f32.mrf.mxu0 }
 0x34d   : > { %v4116_v51 = vpop.f32.mrf.mxu0 }
 0x34f   : > { %v6923_v52 = vpop.f32.mrf.mxu0 }
 0x351   : > { %v8932_v53 = vpop.f32.mrf.mxu0 }
 0x352   : > { %v4253_v42 = vsel %vm3349_vm4, %v8932_v53, -inf }
 0x353   : > { %4254 = vmax.xlane.f32.xlu1 %v4253_v42  ;;  %v6934_v23 = vpop.f32.mrf.mxu0 }
 0x355   : > { %v4250_v44 = vpop.f32.mrf.mxu0 }
 0x357   : > { %v6935_v48 = vpop.f32.mrf.mxu0 }
 0x359   : > { %v8936_v6 = vpop.f32.mrf.mxu0 }
 0x35a   : > { %v4361_v35 = vsel %vm3349_vm4, %v8936_v6, -inf }
 0x35b   : > { %4362 = vmax.xlane.f32.xlu0 %v4361_v35  ;;  %v6946_v18 = vpop.f32.mrf.mxu0 }
 0x35d   : > { %v4358_v55 = vpop.f32.mrf.mxu0 }
 0x35f   : > { %v6947_v43 = vpop.f32.mrf.mxu0 }
 0x361   : > { %v8940_v56 = vpop.f32.mrf.mxu0 }
 0x362   : > { %v4469_v58 = vsel %vm3349_vm4, %v8940_v56, -inf }
 0x363   : > { %4470 = vmax.xlane.f32.xlu1 %v4469_v58  ;;  %v6958_v59 = vpop.f32.mrf.mxu0 }
 0x365   : > { %v4466_v60 = vpop.f32.mrf.mxu0 }
 0x367   : > { %v6959_v46 = vpop.f32.mrf.mxu0 }
 0x369   : > { %v8944_v62 = vpop.f32.mrf.mxu0 }
 0x36a   : > { %v4577_v16 = vsel %vm3349_vm4, %v8944_v62, -inf }
 0x36b   : > { %v6970_v63 = vpop.f32.mrf.mxu0 }
 0x36d   : > { %v4574_v57 = vpop.f32.mrf.mxu0 }
 0x36f   : > { %v6971_v26 = vpop.f32.mrf.mxu0 }
 0x371   : > { %3475 = vrot.lane.b32.xlu0 %v8789_v47, %s7687_s21  ;;  %v8948_v27 = vpop.f32.mrf.mxu0 }
 0x372   : > { %v4685_v49 = vsel %vm3349_vm4, %v8948_v27, -inf }
 0x373   : > { %v6982_v4 = vpop.f32.mrf.mxu0 }
 0x375   : > { %v4682_v8 = vpop.f32.mrf.mxu0 }
 0x377   : > { %v6983_v9 = vpop.f32.mrf.mxu0 }
 0x379   : > { %v8950_v11 = vpop.f32.mrf.mxu0 }
 0x37a   : > { %v4793_v52 = vsel %vm3349_vm4, %v8950_v11, -inf }
 0x37b   : > { %v6994_v12 = vpop.f32.mrf.mxu0 }
 0x37d   : > { %v4790_v13 = vpop.f32.mrf.mxu0 }
 0x37f   : > { %v6995_v14 = vpop.f32.mrf.mxu0 }
 0x381   : > { %v8952_v15 = vpop.f32.mrf.mxu0 }
 0x382   : > { %v4901_v42 = vsel %vm3349_vm4, %v8952_v15, -inf }
 0x383   : > { %v7006_v19 = vpop.f32.mrf.mxu0 }
 0x384   : > { %v3464_v24 = vpop.xlane.xlu1 %3463 }
 0x385   : > { %v3465_v2 = vsub.f32 %v8899_v28, %v3464_v24  ;;  %v4898_v32 = vpop.f32.mrf.mxu0 }
 0x387   : > { %v3466_v7 = vmul.f32 1.442695, %v3465_v2  ;;  %v7007_v34 = vpop.f32.mrf.mxu0 }
 0x389   : > { %7494 = vpow2.f32 %v3466_v7  ;;  %v8955_v38 = vpop.f32.mrf.mxu0 }
 0x38a   : > { %v5009_v23 = vsel %vm3349_vm4, %v8955_v38, -inf }
 0x38b   : > { %v7018_v39 = vpop.f32.mrf.mxu0 }
 0x38c   : > { %v3572_v35 = vpop.xlane.xlu0 %3571 }
 0x38d   : > { %v5006_v41 = vpop.f32.mrf.mxu0  ;;  %v3573_v18 = vsub.f32 %v8903_v61, %v3572_v35 }
 0x38f   : > { %v7019_v5 = vpop.f32.mrf.mxu0  ;;  %v3574_v43 = vmul.f32 1.442695, %v3573_v18 }
 0x390   : > { %4578 = vmax.xlane.f32.xlu0 %v4577_v16 }
 0x394   : > { %4686 = vmax.xlane.f32.xlu0 %v4685_v49  ;;  %v3683_v55 = vpop.xlane.xlu0 %3682 }
 0x395   : > { %v3684_v58 = vsub.f32 %v8907_v1, %v3683_v55 }
 0x396   : > { %v8961_v51 = vpop.eup %7494 }
 0x397   : > { %v3468_v28 = vsel %vm3349_vm4, %v8961_v51, 0.0  ;;  %v3685_v60 = vmul.f32 1.442695, %v3684_v58 }
 0x398   : > { %3469 = vadd.xlane.f32.xlu1 %v3468_v28  ;;  %4794 = vmax.xlane.f32.xlu0 %v4793_v52 }
 0x39c   : > { %4902 = vmax.xlane.f32.xlu0 %v4901_v42  ;;  %v3791_v44 = vpop.xlane.xlu1 %3790 }
 0x39d   : > { %v3792_v46 = vsub.f32 %v8911_v10, %v3791_v44 }
 0x39f   : > { %v3793_v26 = vmul.f32 1.442695, %v3792_v46 }
 0x3a0   : > { %5010 = vmax.xlane.f32.xlu0 %v5009_v23 }
 0x3a9   : > { %3694 = vrot.lane.b32.xlu1 %v8791_v50, %s7687_s21 }
 0x3ae   : > { %v3358_v48 = vpop.xlane.xlu1 %3357 }
 0x3af   : > { %7496 = vrcp.f32 %v3358_v48 }
 0x3b0   : > { %7498 = vpow2.f32 %v3574_v43 }
 0x3b1   : > { %7500 = vpow2.f32 %v3685_v60 }
 0x3b2   : > { %7502 = vpow2.f32 %v3793_v26 }
 0x3bc   : > { %v7497_v59 = vpop.eup %7496 }
 0x3bd   : > { %v3360_v63 = vmul.f32 %v7497_v59, %v8916_v20  ;;  %v8981_v8 = vpop.eup %7498 }
 0x3be   : > { %v3576_v10 = vsel %vm3349_vm4, %v8981_v8, 0.0  ;;  %v8985_v20 = vpop.eup %7500 }
 0x3bf   : > { %v3361_v57 = vpack.c.bf16 %v3360_v63, %v3360_v63  ;;  %v3687_v14 = vsel %vm3349_vm4, %v8985_v20, 0.0  ;;  %v8990_v19 = vpop.eup %7502 }
 0x3c0   : > { %v3795_v24 = vsel %vm3349_vm4, %v8990_v19, 0.0 }
 0x3c1   : > { %6843 = vmatmul.mubr.msk.bf16.vlgmr.msra.gmra.mxu1 %vm3349_vm4, %v3361_v57 }
 0x3c2   : > { %6854 = vmatprep.mubr.msk.bf16.mxu1 %vm7688_vm1, %v7686_v3 }
 0x3c4   : > { %v3902_v61 = vpop.xlane.xlu0 %3901 }
 0x3c5   : > { %v3903_v4 = vsub.f32 %v8920_v29, %v3902_v61 }
 0x3c7   : > { %v3904_v1 = vmul.f32 1.442695, %v3903_v4 }
 0x3c9   : > { %7504 = vpow2.f32 %v3904_v1 }
 0x3cc   : > { %v4010_v9 = vpop.xlane.xlu1 %4009 }
 0x3cd   : > { %v4011_v12 = vsub.f32 %v8924_v0, %v4010_v9  ;;  %3577 = vadd.xlane.f32.xlu1 %v3576_v10 }
 0x3cf   : > { %v4012_v13 = vmul.f32 1.442695, %v4011_v12 }
 0x3d1   : > { %7506 = vpow2.f32 %v4012_v13  ;;  %3688 = vadd.xlane.f32.xlu1 %v3687_v14 }
 0x3d4   : > { %v4121_v29 = vpop.xlane.xlu0 %4120 }
 0x3d5   : > { %v4122_v2 = vsub.f32 %v8928_v33, %v4121_v29  ;;  %3796 = vadd.xlane.f32.xlu1 %v3795_v24 }
 0x3d6   : > { %v8995_v32 = vpop.eup %7504 }
 0x3d7   : > { %v4123_v7 = vmul.f32 1.442695, %v4122_v2  ;;  %v3906_v0 = vsel %vm3349_vm4, %v8995_v32, 0.0 }
 0x3d9   : > { %7508 = vpow2.f32 %v4123_v7  ;;  %3907 = vadd.xlane.f32.xlu1 %v3906_v0 }
 0x3dc   : > { %v4255_v34 = vpop.xlane.xlu1 %4254 }
 0x3dd   : > { %v4256_v39 = vsub.f32 %v8932_v53, %v4255_v34 }
 0x3de   : > { %v9000_v41 = vpop.eup %7506 }
 0x3df   : > { %v4257_v5 = vmul.f32 1.442695, %v4256_v39  ;;  %v4014_v16 = vsel %vm3349_vm4, %v9000_v41, 0.0 }
 0x3e0   : > { %4015 = vadd.xlane.f32.xlu1 %v4014_v16 }
 0x3e1   : > { %7510 = vpow2.f32 %v4257_v5  ;;  %v3298_v5 = vpack.c.bf16 %v8793_v37, %v8793_v37  ;;  %v3300_v37 = vpack.c.bf16 %v8837_v31, %v8837_v31  ;;  %v3301_v31 = vpack.c.bf16 %v8842_v45, %v8842_v45 }
 0x3e4   : > { %v4363_v33 = vpop.xlane.xlu0 %4362 }
 0x3e5   : > { %v4364_v49 = vsub.f32 %v8936_v6, %v4363_v33 }
 0x3e6   : > { %v9005_v28 = vpop.eup %7508 }
 0x3e7   : > { %v4365_v52 = vmul.f32 1.442695, %v4364_v49  ;;  %v4125_v42 = vsel %vm3349_vm4, %v9005_v28, 0.0  ;;  %v4267_v49 = vrot.slane %v3298_v5, 5 }
 0x3e8   : > { %v3476_v23 = vpop.permute.xlu0 %3475  ;;  %4126 = vadd.xlane.f32.xlu0 %v4125_v42  ;;  %v4266_v42 = vrot.slane %v8789_v47, 5  ;;  %v4698_v47 = vrot.slane %v8830_v22, 5 }
 0x3e9   : > { %7512 = vpow2.f32 %v4365_v52  ;;  %v3481_v53 = vsel %vm3365_vm3, %v3476_v23, 0  ;;  %v3299_v52 = vpack.c.bf16 %v8802_v54, %v8802_v54 }
 0x3ea   : > { %6853 = vmatpush3.bf16.msra.mxu1 %v3481_v53 }
 0x3eb   : > { %6864 = vmatprep.subr.bf16.mxu1 %v7686_v3  ;;  %v4483_v53 = vrot.slane %v3299_v52, 5 }
 0x3ec   : > { %v4471_v44 = vpop.xlane.xlu1 %4470 }
 0x3ed   : > { %v4472_v48 = vsub.f32 %v8940_v56, %v4471_v44  ;;  %v9068_v44 = vsel %vm4206_vm2, %v4266_v42, %v4267_v49 }
 0x3ee   : > { %v9012_v35 = vpop.eup %7510 }
 0x3ef   : > { %v4473_v6 = vmul.f32 1.442695, %v4472_v48  ;;  %v4259_v18 = vsel %vm3349_vm4, %v9012_v35, 0.0  ;;  %v4482_v48 = vrot.slane %v8791_v50, 5 }
 0x3f0   : > { %4260 = vadd.xlane.f32.xlu1 %v4259_v18 }
 0x3f1   : > { %7514 = vpow2.f32 %v4473_v6  ;;  %v4699_v6 = vrot.slane %v3300_v37, 5  ;;  %v9074_v54 = vsel %vm4206_vm2, %v4482_v48, %v4483_v53 }
 0x3f3   : > { %v9082_v18 = vsel %vm4206_vm2, %v4698_v47, %v4699_v6  ;;  %v4273_v6 = vsel %vm3365_vm3, %v9068_v44, 0 }
 0x3f6   : > { %v9016_v55 = vpop.eup %7512 }
 0x3f7   : > { %v4367_v43 = vsel %vm3349_vm4, %v9016_v55, 0.0 }
 0x3f8   : > { %4368 = vadd.xlane.f32.xlu1 %v4367_v43  ;;  %v4914_v43 = vrot.slane %v8835_v30, 5 }
 0x3fe   : > { %v9020_v58 = vpop.eup %7514  ;;  %3913 = vrot.lane.b32.xlu0 %v8830_v22, %s7687_s21 }
 0x3ff   : > { %v4475_v56 = vsel %vm3349_vm4, %v9020_v58, 0.0 }
 0x400   : > { %4476 = vadd.xlane.f32.xlu1 %v4475_v56 }
 0x411   : > { %4132 = vrot.lane.b32.xlu1 %v8835_v30, %s7687_s21 }
 0x419   : > { %v4579_v59 = vpop.xlane.xlu0 %4578 }
 0x41a   : > { %v4580_v60 = vsub.f32 %v8944_v62, %v4579_v59 }
 0x41c   : > { %v4581_v46 = vmul.f32 1.442695, %v4580_v60 }
 0x41d   : > { %v4687_v63 = vpop.xlane.xlu0 %4686 }
 0x41e   : > { %7516 = vpow2.f32 %v4581_v46  ;;  %v4688_v57 = vsub.f32 %v8948_v27, %v4687_v63 }
 0x420   : > { %v4689_v26 = vmul.f32 1.442695, %v4688_v57 }
 0x421   : > { %v3470_v61 = vpop.xlane.xlu1 %3469  ;;  %v4795_v4 = vpop.xlane.xlu0 %4794 }
 0x422   : > { %v4796_v1 = vsub.f32 %v8950_v11, %v4795_v4  ;;  %7518 = vrcp.f32 %v3470_v61 }
 0x423   : > { %7520 = vpow2.f32 %v4689_v26 }
 0x424   : > { %v4797_v9 = vmul.f32 1.442695, %v4796_v1 }
 0x425   : > { %v4903_v10 = vpop.xlane.xlu0 %4902  ;;  %v3695_v59 = vpop.permute.xlu1 %3694 }
 0x426   : > { %v4904_v12 = vsub.f32 %v8952_v15, %v4903_v10  ;;  %7522 = vpow2.f32 %v4797_v9  ;;  %v3700_v1 = vsel %vm3365_vm3, %v3695_v59, 0 }
 0x428   : > { %v4905_v13 = vmul.f32 1.442695, %v4904_v12 }
 0x429   : > { %v5011_v14 = vpop.xlane.xlu0 %5010 }
 0x42a   : > { %v5012_v62 = vsub.f32 %v8955_v38, %v5011_v14  ;;  %7524 = vpow2.f32 %v4905_v13  ;;  %v3586_v38 = vsel %vm3365_vm3, %v8791_v50, 0  ;;  %v4915_v50 = vrot.slane %v3301_v31, 5 }
 0x42b   : > { %v9033_v29 = vpop.eup %7516 }
 0x42c   : > { %v5013_v27 = vmul.f32 1.442695, %v5012_v62  ;;  %v4583_v24 = vsel %vm3349_vm4, %v9033_v29, 0.0  ;;  %v9088_v56 = vsel %vm4206_vm2, %v4914_v43, %v4915_v50 }
 0x42d   : > { %4584 = vadd.xlane.f32.xlu0 %v4583_v24 }
 0x42e   : > { %7526 = vpow2.f32 %v5013_v27 }
 0x42f   : > { %v7519_v11 = vpop.eup %7518 }
 0x430   : > { %v9037_v2 = vpop.eup %7520  ;;  %v3472_v7 = vmul.f32 %v7519_v11, %v8961_v51 }
 0x431   : > { %v4691_v0 = vsel %vm3349_vm4, %v9037_v2, 0.0 }
 0x432   : > { %v3473_v15 = vpack.c.bf16 %v3472_v7, %v3472_v7 }
 0x433   : > { %v9042_v34 = vpop.eup %7522 }
 0x434   : > { %6855 = vmatmul.mubr.msk.bf16.vlgmr.msra.gmra.mxu1 %vm3349_vm4, %v3473_v15  ;;  %v4799_v51 = vsel %vm3349_vm4, %v9042_v34, 0.0 }
 0x435   : > { %4692 = vadd.xlane.f32.xlu1 %v4691_v0  ;;  %6865 = vmatpush3.bf16.msra.mxu1 %v3586_v38  ;;  %v4024_v38 = vsel %vm3365_vm3, %v8835_v30, 0 }
 0x436   : > { %6866 = vmatprep.mubr.msk.bf16.mxu1 %vm7688_vm1, %v7686_v3  ;;  %6876 = vmatprep.subr.bf16.mxu1 %v7686_v3 }
 0x437   : > { %v9052_v39 = vpop.eup %7524 }
 0x438   : > { %v4907_v16 = vsel %vm3349_vm4, %v9052_v39, 0.0 }
 0x439   : > { %4800 = vadd.xlane.f32.xlu1 %v4799_v51 }
 0x43b   : > { %v9058_v33 = vpop.eup %7526 }
 0x43c   : > { %v5015_v23 = vsel %vm3349_vm4, %v9058_v33, 0.0 }
 0x43d   : > { %4908 = vadd.xlane.f32.xlu1 %v4907_v16 }
 0x441   : > { %5016 = vadd.xlane.f32.xlu1 %v5015_v23 }
 0x443   : > { %4373 = vrot.lane.b32.xlu0 %v9068_v44, %s7687_s21 }
 0x447   : > { %4589 = vrot.lane.b32.xlu0 %v9074_v54, %s7687_s21 }
 0x44b   : > { %4805 = vrot.lane.b32.xlu0 %v9082_v18, %s7687_s21 }
 0x452   : > { %5021 = vrot.lane.b32.xlu1 %v9088_v56, %s7687_s21 }
 0x456   : > { %v3578_v60 = vpop.xlane.xlu1 %3577 }
 0x457   : > { %7528 = vrcp.f32 %v3578_v60 }
 0x45a   : > { %v3689_v46 = vpop.xlane.xlu1 %3688 }
 0x45b   : > { %7530 = vrcp.f32 %v3689_v46 }
 0x45e   : > { %v3797_v45 = vpop.xlane.xlu1 %3796 }
 0x45f   : > { %7532 = vrcp.f32 %v3797_v45  ;;  %v4489_v45 = vsel %vm3365_vm3, %v9074_v54, 0 }
 0x462   : > { %v3908_v4 = vpop.xlane.xlu1 %3907 }
 0x463   : > { %7534 = vrcp.f32 %v3908_v4 }
 0x464   : > { %v7529_v63 = vpop.eup %7528 }
 0x465   : > { %v3580_v57 = vmul.f32 %v7529_v63, %v8981_v8  ;;  %v3805_v8 = vsel %vm3365_vm3, %v8830_v22, 0 }
 0x467   : > { %v3581_v26 = vpack.c.bf16 %v3580_v57, %v3580_v57 }
 0x468   : > { %v7531_v61 = vpop.eup %7530 }
 0x469   : > { %6867 = vmatmul.mubr.msk.bf16.vlgmr.msra.gmra.mxu1 %vm3349_vm4, %v3581_v26  ;;  %v3691_v9 = vmul.f32 %v7531_v61, %v8985_v20  ;;  %v4016_v13 = vpop.xlane.xlu1 %4015 }
 0x46a   : > { %6877 = vmatpush3.bf16.msra.mxu1 %v3700_v1  ;;  %6878 = vmatprep.mubr.msk.bf16.mxu1 %vm7688_vm1, %v7686_v3  ;;  %7536 = vrcp.f32 %v4016_v13 }
 0x46b   : > { %6888 = vmatprep.subr.bf16.mxu1 %v7686_v3  ;;  %v3692_v10 = vpack.c.bf16 %v3691_v9, %v3691_v9 }
 0x46c   : > { %v7533_v12 = vpop.eup %7532 }
 0x46d   : > { %v3799_v62 = vmul.f32 %v7533_v12, %v8990_v19 }
 0x46f   : > { %v3800_v20 = vpack.c.bf16 %v3799_v62, %v3799_v62 }
 0x470   : > { %v7535_v24 = vpop.eup %7534 }
 0x471   : > { %6879 = vmatmul.mubr.msk.bf16.vlgmr.msra.gmra.mxu1 %vm3349_vm4, %v3692_v10  ;;  %v4127_v14 = vpop.xlane.xlu0 %4126  ;;  %v3910_v22 = vmul.f32 %v7535_v24, %v8995_v32  ;;  %v4705_v10 = vsel %vm3365_vm3, %v9082_v18, 0 }
 0x472   : > { %6889 = vmatpush3.bf16.msra.mxu1 %v3805_v8  ;;  %6890 = vmatprep.mubr.msk.bf16.mxu1 %vm7688_vm1, %v7686_v3  ;;  %7538 = vrcp.f32 %v4127_v14 }
 0x473   : > { %6900 = vmatprep.subr.bf16.mxu1 %v7686_v3  ;;  %v3911_v7 = vpack.c.bf16 %v3910_v22, %v3910_v22 }
 0x475   : > { %v3914_v27 = vpop.permute.xlu0 %3913 }
 0x476   : > { %v3919_v11 = vsel %vm3365_vm3, %v3914_v27, 0 }
 0x477   : > { %v7537_v15 = vpop.eup %7536 }
 0x478   : > { %v4018_v5 = vmul.f32 %v7537_v15, %v9000_v41 }
 0x479   : > { %6891 = vmatmul.mubr.msk.bf16.vlgmr.msra.gmra.mxu1 %vm3349_vm4, %v3800_v20  ;;  %v4261_v0 = vpop.xlane.xlu1 %4260 }
 0x47a   : > { %6901 = vmatpush3.bf16.msra.mxu1 %v3919_v11  ;;  %6902 = vmatprep.mubr.msk.bf16.mxu1 %vm7688_vm1, %v7686_v3  ;;  %7540 = vrcp.f32 %v4261_v0  ;;  %v4019_v52 = vpack.c.bf16 %v4018_v5, %v4018_v5 }
 0x47b   : > { %6912 = vmatprep.subr.bf16.mxu1 %v7686_v3 }
 0x47f   : > { %v7539_v42 = vpop.eup %7538 }
 0x480   : > { %v4129_v30 = vmul.f32 %v7539_v42, %v9005_v28 }
 0x481   : > { %v9112_v19 = vpop.f32.mrf.mxu1  ;;  %6903 = vmatmul.mubr.msk.bf16.vlgmr.msra.gmra.mxu1 %vm3349_vm4, %v3911_v7  ;;  %v4369_v32 = vpop.xlane.xlu1 %4368 }
 0x482   : > { %6913 = vmatpush3.bf16.msra.mxu1 %v4024_v38  ;;  %6914 = vmatprep.mubr.msk.bf16.mxu1 %vm7688_vm1, %v7686_v3  ;;  %v4130_v41 = vpack.c.bf16 %v4129_v30, %v4129_v30  ;;  %7542 = vrcp.f32 %v4369_v32  ;;  %v7300_v30 = vld [vmem:[#allocation5 + $0xe0] ss:$16 sps:$4 sm:$0xff]  }
 0x483   : > { %v6844_v51 = vpop.f32.mrf.mxu1  ;;  %6924 = vmatprep.subr.bf16.mxu1 %v7686_v3 }
 0x485   : > { %v3406_v16 = vpop.f32.mrf.mxu1 }
 0x487   : > { %v6845_v49 = vpop.f32.mrf.mxu1  ;;  %v7541_v48 = vpop.eup %7540 }
 0x488   : > { %v4263_v47 = vmul.f32 %v7541_v48, %v9012_v35 }
 0x489   : > { %v4477_v23 = vpop.xlane.xlu1 %4476  ;;  %6915 = vmatmul.mubr.msk.bf16.vlgmr.msra.gmra.mxu1 %vm3349_vm4, %v4019_v52 }
 0x48a   : > { %6926 = vmatprep.mubr.msk.bf16.mxu1 %vm7688_vm1, %v7686_v3  ;;  %v4264_v28 = vpack.c.bf16 %v4263_v47, %v4263_v47  ;;  %7544 = vrcp.f32 %v4477_v23  ;;  %v7308_v47 = vld [vmem:[#allocation5 + $0xa4] ss:$16 sps:$4 sm:$0xff]  }
 0x48d   : > { %v4133_v53 = vpop.permute.xlu1 %4132 }
 0x48e   : > { %v4138_v37 = vsel %vm3365_vm3, %v4133_v53, 0  ;;  %v7302_v53 = vld [vmem:[#allocation5 + $0xe4] ss:$16 sps:$4 sm:$0xff]  }
 0x48f   : > { %6925 = vmatpush3.bf16.msra.mxu1 %v4138_v37  ;;  %v7543_v31 = vpop.eup %7542  ;;  %5905 = vmatprep.subr.bf16.mxu0 %v7302_v53  ;;  %v7359_v53 = vld [vmem:[#allocation5 + $0x244] ss:$16 sps:$4 sm:$0xff]  }
 0x490   : > { %6936 = vmatprep.subr.bf16.mxu1 %v7686_v3  ;;  %v4371_v50 = vmul.f32 %v7543_v31, %v9016_v55  ;;  %5906 = vmatpush1.bf16.msra.mxu0 %v7300_v30  ;;  %v7327_v31 = vld [vmem:[#allocation5 + $0x2e0] ss:$16 sps:$4 sm:$0xff]   ;;  %v7356_v30 = vld [vmem:[#allocation5 + $0x144] ss:$16 sps:$4 sm:$0xff]  }
 0x492   : > { %6927 = vmatmul.mubr.msk.bf16.vlgmr.msra.gmra.mxu1 %vm3349_vm4, %v4130_v41  ;;  %v4372_v35 = vpack.c.bf16 %v4371_v50, %v4371_v50  ;;  %v7305_v41 = vld [vmem:[#allocation5 + $0xc4] ss:$16 sps:$4 sm:$0xff]  }
 0x493   : > { %6937 = vmatpush3.bf16.msra.mxu1 %v4273_v6  ;;  %6938 = vmatprep.mubr.msk.bf16.mxu1 %vm7688_vm1, %v7686_v3  ;;  %v7303_v6 = vld [vmem:[#allocation5 + $0xc0] ss:$16 sps:$4 sm:$0xff]  }
 0x494   : > { %6948 = vmatprep.subr.bf16.mxu1 %v7686_v3  ;;  %5907 = vmatprep.subr.bf16.mxu0 %v7305_v41  ;;  %v7357_v41 = vld [vmem:[#allocation5 + $0x240] ss:$16 sps:$4 sm:$0xff]  }
 0x495   : > { %5908 = vmatpush1.bf16.msra.mxu0 %v7303_v6  ;;  %v7362_v6 = vld [vmem:[#allocation5 + $0x124] ss:$16 sps:$4 sm:$0xff]  }
 0x496   : > { %5909 = vmatprep.subr.bf16.mxu0 %v7308_v47  ;;  %v7365_v47 = vld [vmem:[#allocation5 + $0x224] ss:$16 sps:$4 sm:$0xff]  }
 0x497   : > { %v7545_v60 = vpop.eup %7544 }
 0x498   : > { %v4479_v55 = vmul.f32 %v7545_v60, %v9020_v58 }
 0x49a   : > { %6939 = vmatmul.mubr.msk.bf16.vlgmr.msra.gmra.mxu1 %vm3349_vm4, %v4264_v28  ;;  %v4480_v57 = vpack.c.bf16 %v4479_v55, %v4479_v55 }
 0x49b   : > { %6950 = vmatprep.mubr.msk.bf16.mxu1 %vm7688_vm1, %v7686_v3 }
 0x4b6   : > { %v4585_v44 = vpop.xlane.xlu0 %4584 }
 0x4b7   : > { %7546 = vrcp.f32 %v4585_v44  ;;  %v7329_v44 = vld [vmem:[#allocation5 + $0x2e4] ss:$16 sps:$4 sm:$0xff]  }
 0x4ba   : > { %v4374_v43 = vpop.permute.xlu0 %4373 }
 0x4bb   : > { %v4379_v59 = vsel %vm3365_vm3, %v4374_v43, 0  ;;  %v7306_v43 = vld [vmem:[#allocation5 + $0xa0] ss:$16 sps:$4 sm:$0xff]  }
 0x4bc   : > { %6949 = vmatpush3.bf16.msra.mxu1 %v4379_v59  ;;  %v7335_v59 = vld [vmem:[#allocation5 + $0x2c4] ss:$16 sps:$4 sm:$0xff]   ;;  %5910 = vmatpush1.bf16.msra.mxu0 %v7306_v43  ;;  %v7363_v43 = vld [vmem:[#allocation5 + $0x220] ss:$16 sps:$4 sm:$0xff]  }
 0x4bd   : > { %6960 = vmatprep.subr.bf16.mxu1 %v7686_v3 }
 0x4be   : > { %v4693_v46 = vpop.xlane.xlu1 %4692  ;;  %v4590_v63 = vpop.permute.xlu0 %4589 }
 0x4bf   : > { %6951 = vmatmul.mubr.msk.bf16.vlgmr.msra.gmra.mxu1 %vm3349_vm4, %v4372_v35  ;;  %7548 = vrcp.f32 %v4693_v46  ;;  %v4595_v4 = vsel %vm3365_vm3, %v4590_v63, 0  ;;  %v7311_v35 = vld [vmem:[#allocation5 + $0x84] ss:$16 sps:$4 sm:$0xff]   ;;  %v7333_v46 = vld [vmem:[#allocation5 + $0x2c0] ss:$16 sps:$4 sm:$0xff]  }
 0x4c0   : > { %6961 = vmatpush3.bf16.msra.mxu1 %v4489_v45  ;;  %6962 = vmatprep.mubr.msk.bf16.mxu1 %vm7688_vm1, %v7686_v3  ;;  %v7341_v45 = vld [vmem:[#allocation5 + $0x2a4] ss:$16 sps:$4 sm:$0xff]   ;;  %v7309_v63 = vld [vmem:[#allocation5 + $0x80] ss:$16 sps:$4 sm:$0xff]  }
 0x4c1   : > { %6972 = vmatprep.subr.bf16.mxu1 %v7686_v3  ;;  %5911 = vmatprep.subr.bf16.mxu0 %v7311_v35 }
 0x4c2   : > { %v4801_v61 = vpop.xlane.xlu1 %4800  ;;  %v4806_v13 = vpop.permute.xlu0 %4805  ;;  %5912 = vmatpush1.bf16.msra.mxu0 %v7309_v63  ;;  %v7371_v63 = vld [vmem:[#allocation5 + $0x204] ss:$16 sps:$4 sm:$0xff]  }
 0x4c3   : > { %7550 = vrcp.f32 %v4801_v61  ;;  %v4811_v62 = vsel %vm3365_vm3, %v4806_v13, 0  ;;  %v7339_v61 = vld [vmem:[#allocation5 + $0x2a0] ss:$16 sps:$4 sm:$0xff]  }
 0x4c4   : > { %v7547_v26 = vpop.eup %7546 }
 0x4c5   : > { %v4587_v54 = vmul.f32 %v7547_v26, %v9033_v29 }
 0x4c6   : > { %v4909_v58 = vpop.xlane.xlu1 %4908 }
 0x4c7   : > { %6963 = vmatmul.mubr.msk.bf16.vlgmr.msra.gmra.mxu1 %vm3349_vm4, %v4480_v57  ;;  %v4588_v1 = vpack.c.bf16 %v4587_v54, %v4587_v54  ;;  %7552 = vrcp.f32 %v4909_v58  ;;  %v7314_v57 = vld [vmem:[#allocation5 + $0x64] ss:$16 sps:$4 sm:$0xff]   ;;  %v7312_v54 = vld [vmem:[#allocation5 + $0x60] ss:$16 sps:$4 sm:$0xff]  }
 0x4c8   : > { %6973 = vmatpush3.bf16.msra.mxu1 %v4595_v4  ;;  %6974 = vmatprep.mubr.msk.bf16.mxu1 %vm7688_vm1, %v7686_v3 }
 0x4c9   : > { %6984 = vmatprep.subr.bf16.mxu1 %v7686_v3  ;;  %5913 = vmatprep.subr.bf16.mxu0 %v7314_v57 }
 0x4ca   : > { %v5017_v14 = vpop.xlane.xlu1 %5016  ;;  %5914 = vmatpush1.bf16.msra.mxu0 %v7312_v54  ;;  %v7375_v54 = vld [vmem:[#allocation5 + $0x3e0] ss:$16 sps:$4 sm:$0xff]  }
 0x4cb   : > { %7554 = vrcp.f32 %v5017_v14  ;;  %v7323_v14 = vld [vmem:[#allocation5 + $0x4] ss:$16 sps:$4 sm:$0xff]  }
 0x4cc   : > { %v7549_v9 = vpop.eup %7548 }
 0x4cd   : > { %v4695_v12 = vmul.f32 %v7549_v9, %v9037_v2  ;;  %v4921_v2 = vsel %vm3365_vm3, %v9088_v56, 0 }
 0x4ce   : > { %v5022_v11 = vpop.permute.xlu1 %5021 }
 0x4cf   : > { %6975 = vmatmul.mubr.msk.bf16.vlgmr.msra.gmra.mxu1 %vm3349_vm4, %v4588_v1  ;;  %v4696_v8 = vpack.c.bf16 %v4695_v12, %v4695_v12  ;;  %v7317_v1 = vld [vmem:[#allocation5 + $0x44] ss:$16 sps:$4 sm:$0xff]  }
 0x4d0   : > { %6985 = vmatpush3.bf16.msra.mxu1 %v4705_v10  ;;  %6986 = vmatprep.mubr.msk.bf16.mxu1 %vm7688_vm1, %v7686_v3  ;;  %v7551_v29 = vpop.eup %7550  ;;  %v7315_v10 = vld [vmem:[#allocation5 + $0x40] ss:$16 sps:$4 sm:$0xff]   ;;  %v7320_v12 = vld [vmem:[#allocation5 + $0x24] ss:$16 sps:$4 sm:$0xff]  }
 0x4d1   : > { %6996 = vmatprep.subr.bf16.mxu1 %v7686_v3  ;;  %v4803_v18 = vmul.f32 %v7551_v29, %v9042_v34  ;;  %v5027_v34 = vsel %vm3365_vm3, %v5022_v11, 0  ;;  %5915 = vmatprep.subr.bf16.mxu0 %v7317_v1  ;;  %v7318_v29 = vld [vmem:[#allocation5 + $0x20] ss:$16 sps:$4 sm:$0xff]   ;;  %v7377_v1 = vld [vmem:[#allocation5 + $0x3e4] ss:$16 sps:$4 sm:$0xff]  }
 0x4d2   : > { %5916 = vmatpush1.bf16.msra.mxu0 %v7315_v10 }
 0x4d3   : > { %v4804_v27 = vpack.c.bf16 %v4803_v18, %v4803_v18  ;;  %5917 = vmatprep.subr.bf16.mxu0 %v7320_v12  ;;  %v7321_v18 = vld [vmem:[#allocation5] ss:$16 sps:$4 sm:$0xff]  }
 0x4d4   : > { %v7553_v20 = vpop.eup %7552  ;;  %v7381_v12 = vld [vmem:[#allocation5 + $0x3c0] ss:$16 sps:$4 sm:$0xff]  }
 0x4d5   : > { %v4911_v24 = vmul.f32 %v7553_v20, %v9052_v39  ;;  %v7326_v20 = vld [vmem:[#allocation5 + $0x1e4] ss:$16 sps:$4 sm:$0xff]  }
 0x4d6   : > { %5918 = vmatpush1.bf16.msra.mxu0 %v7318_v29 }
 0x4d7   : > { %6987 = vmatmul.mubr.msk.bf16.vlgmr.msra.gmra.mxu1 %vm3349_vm4, %v4696_v8  ;;  %v4912_v22 = vpack.c.bf16 %v4911_v24, %v4911_v24  ;;  %5919 = vmatprep.subr.bf16.mxu0 %v7323_v14  ;;  %v7324_v24 = vld [vmem:[#allocation5 + $0x1e0] ss:$16 sps:$4 sm:$0xff]  }
 0x4d8   : > { %6997 = vmatpush3.bf16.msra.mxu1 %v4811_v62  ;;  %6998 = vmatprep.mubr.msk.bf16.mxu1 %vm7688_vm1, %v7686_v3  ;;  %v7555_v7 = vpop.eup %7554 }
 0x4d9   : > { %7008 = vmatprep.subr.bf16.mxu1 %v7686_v3  ;;  %v5019_v56 = vmul.f32 %v7555_v7, %v9058_v33 }
 0x4da   : > { %5920 = vmatpush1.bf16.msra.mxu0 %v7321_v18  ;;  %v7389_v18 = vld [vmem:[#allocation5 + $0x3a4] ss:$16 sps:$4 sm:$0xff]  }
 0x4db   : > { %v5020_v15 = vpack.c.bf16 %v5019_v56, %v5019_v56  ;;  %5921 = vmatprep.subr.bf16.mxu0 %v7326_v20 }
 0x4de   : > { %5922 = vmatpush2.bf16.msra.mxu0 %v7324_v24  ;;  %v7393_v24 = vld [vmem:[#allocation5 + $0x380] ss:$16 sps:$4 sm:$0xff]  }
 0x4df   : > { %6999 = vmatmul.mubr.msk.bf16.vlgmr.msra.gmra.mxu1 %vm3349_vm4, %v4804_v27 }
 0x4e0   : > { %7009 = vmatpush3.bf16.msra.mxu1 %v4921_v2  ;;  %7010 = vmatprep.mubr.msk.bf16.mxu1 %vm7688_vm1, %v7686_v3 }
 0x4e1   : > { %7020 = vmatprep.subr.bf16.mxu1 %v7686_v3 }
 0x4e7   : > { %7011 = vmatmul.mubr.msk.bf16.vlgmr.msra.gmra.mxu1 %vm3349_vm4, %v4912_v22  ;;  %v7332_v22 = vld [vmem:[#allocation5 + $0x1c4] ss:$16 sps:$4 sm:$0xff]  }
 0x4e8   : > { %7021 = vmatpush3.bf16.msra.mxu1 %v5027_v34  ;;  %7022 = vmatprep.mubr.msk.bf16.mxu1 %vm7688_vm1, %v7686_v3  ;;  %v7330_v34 = vld [vmem:[#allocation5 + $0x1c0] ss:$16 sps:$4 sm:$0xff]  }
 0x4e9   : > { %5948 = vmatprep.subr.bf16.mxu1 %v7329_v44  ;;  %5923 = vmatprep.subr.bf16.mxu0 %v7332_v22  ;;  %v7360_v44 = vld [vmem:[#allocation5 + $0x120] ss:$16 sps:$4 sm:$0xff]  }
 0x4ea   : > { %5924 = vmatpush2.bf16.msra.mxu0 %v7330_v34  ;;  %v7399_v34 = vld [vmem:[#allocation5 + $0x360] ss:$16 sps:$4 sm:$0xff]  }
 0x4ef   : > { %7023 = vmatmul.mubr.msk.bf16.vlgmr.msra.gmra.mxu1 %vm3349_vm4, %v5020_v15  ;;  %v7338_v15 = vld [vmem:[#allocation5 + $0x1a4] ss:$16 sps:$4 sm:$0xff]  }
 0x4f0   : > { %5949 = vmatpush1.bf16.msra.mxu1 %v7327_v31  ;;  %5925 = vmatprep.subr.bf16.mxu0 %v7338_v15  ;;  %v7401_v15 = vld [vmem:[#allocation5 + $0x364] ss:$16 sps:$4 sm:$0xff]  }
 0x4f1   : > { %5950 = vmatprep.subr.bf16.mxu1 %v7335_v59 }
 0x4f4   : > { %v3517_v0 = vpop.f32.mrf.mxu1  ;;  %5951 = vmatpush1.bf16.msra.mxu1 %v7333_v46  ;;  %v7366_v46 = vld [vmem:[#allocation5 + $0x100] ss:$16 sps:$4 sm:$0xff]  }
 0x4f5   : > { %v3523_v38 = vpack.c.bf16 %v3517_v0, %v3517_v0  ;;  %5952 = vmatprep.subr.bf16.mxu1 %v7341_v45  ;;  %v7369_v45 = vld [vmem:[#allocation5 + $0x200] ss:$16 sps:$4 sm:$0xff]  }
 0x4f6   : > { %v6856_v51 = vpop.f32.mrf.mxu1 }
 0x4f7   : > { %4182 = vrot.lane.b32.xlu0 %v3523_v38, %s7687_s21  ;;  %v7336_v38 = vld [vmem:[#allocation5 + $0x1a0] ss:$16 sps:$4 sm:$0xff]  }
 0x4f8   : > { %v3520_v39 = vpop.f32.mrf.mxu1  ;;  %5953 = vmatpush1.bf16.msra.mxu1 %v7339_v61  ;;  %5926 = vmatpush2.bf16.msra.mxu0 %v7336_v38  ;;  %v7374_v61 = vld [vmem:[#allocation5 + $0xec] ss:$16 sps:$4 sm:$0xff]  }
 0x4fa   : > { %v6857_v5 = vpop.f32.mrf.mxu1 }
 0x4fb   : > { %v7344_v5 = vld [vmem:[#allocation5 + $0x184] ss:$16 sps:$4 sm:$0xff]  }
 0x4fc   : > { %5927 = vmatprep.subr.bf16.mxu0 %v7344_v5 }
 0x529   : > { %v9180_v32 = vpop.f32.mrf.mxu1 }
 0x52b   : > { %v6868_v16 = vpop.f32.mrf.mxu1 }
 0x52c   : > { %v7342_v16 = vld [vmem:[#allocation5 + $0x180] ss:$16 sps:$4 sm:$0xff]  }
 0x52d   : > { %v3625_v49 = vpop.f32.mrf.mxu1  ;;  %5928 = vmatpush2.bf16.msra.mxu0 %v7342_v16 }
 0x52e   : > { %v7345_v49 = vld [vmem:[#allocation5 + $0x280] ss:$16 sps:$4 sm:$0xff]  }
 0x52f   : > { %v6869_v52 = vpop.f32.mrf.mxu1 }
 0x530   : > { %v7347_v52 = vld [vmem:[#allocation5 + $0x284] ss:$16 sps:$4 sm:$0xff]  }
 0x531   : > { %v3736_v42 = vpop.f32.mrf.mxu1  ;;  %5954 = vmatprep.subr.bf16.mxu1 %v7347_v52  ;;  %v7411_v52 = vld [vmem:[#allocation5 + $0x320] ss:$16 sps:$4 sm:$0xff]  }
 0x532   : > { %v3742_v23 = vpack.c.bf16 %v3736_v42, %v3736_v42  ;;  %v7350_v42 = vld [vmem:[#allocation5 + $0x164] ss:$16 sps:$4 sm:$0xff]   ;;  %5955 = vmatpush1.bf16.msra.mxu1 %v7345_v49 }
 0x533   : > { %v6880_v3 = vpop.f32.mrf.mxu1  ;;  %5929 = vmatprep.subr.bf16.mxu0 %v7350_v42  ;;  %v7413_v42 = vld [vmem:[#allocation5 + $0x324] ss:$16 sps:$4 sm:$0xff]  }
 0x534   : > { %4185 = vrot.lane.b32.xlu0 %v3742_v23, %s7687_s21  ;;  %v7348_v23 = vld [vmem:[#allocation5 + $0x160] ss:$16 sps:$4 sm:$0xff]   ;;  %v7353_v3 = vld [vmem:[#allocation5 + $0x264] ss:$16 sps:$4 sm:$0xff]  }
 0x535   : > { %v3739_v33 = vpop.f32.mrf.mxu1  ;;  %5956 = vmatprep.subr.bf16.mxu1 %v7353_v3  ;;  %5930 = vmatpush2.bf16.msra.mxu0 %v7348_v23 }
 0x536   : > { %v7351_v33 = vld [vmem:[#allocation5 + $0x260] ss:$16 sps:$4 sm:$0xff]   ;;  %5931 = vmatprep.subr.bf16.mxu0 %v7356_v30 }
 0x537   : > { %v6881_v37 = vpop.f32.mrf.mxu1  ;;  %5957 = vmatpush1.bf16.msra.mxu1 %v7351_v33  ;;  %v7417_v30 = vld [vmem:[#allocation5 + $0x300] ss:$16 sps:$4 sm:$0xff]  }
 0x538   : > { %v7354_v37 = vld [vmem:[#allocation5 + $0x140] ss:$16 sps:$4 sm:$0xff]   ;;  %5958 = vmatprep.subr.bf16.mxu1 %v7359_v53  ;;  %v7419_v53 = vld [vmem:[#allocation5 + $0x304] ss:$16 sps:$4 sm:$0xff]  }
 0x539   : > { %v9183_v48 = vpop.f32.mrf.mxu1  ;;  %5932 = vmatpush2.bf16.msra.mxu0 %v7354_v37 }
 0x53a   : > { %5933 = vmatprep.subr.bf16.mxu0 %v7362_v6  ;;  %v7425_v6 = vld [vmem:[#allocation5 + $0x2ec] ss:$16 sps:$4 sm:$0xff]  }
 0x53b   : > { %v6892_v28 = vpop.f32.mrf.mxu1  ;;  %5959 = vmatpush1.bf16.msra.mxu1 %v7357_v41 }
 0x53c   : > { %5960 = vmatprep.subr.bf16.mxu1 %v7365_v47 }
 0x53d   : > { %v3844_v50 = vpop.f32.mrf.mxu1  ;;  %5934 = vmatpush2.bf16.msra.mxu0 %v7360_v44 }
 0x53f   : > { %v6893_v60 = vpop.f32.mrf.mxu1  ;;  %5961 = vmatpush1.bf16.msra.mxu1 %v7363_v43 }
 0x540   : > { %v7368_v60 = vld [vmem:[#allocation5 + $0x104] ss:$16 sps:$4 sm:$0xff]   ;;  %5962 = vmatprep.subr.bf16.mxu1 %v7371_v63 }
 0x541   : > { %v9185_v55 = vpop.f32.mrf.mxu1  ;;  %5935 = vmatprep.subr.bf16.mxu0 %v7368_v60 }
 0x542   : > { %5936 = vmatpush2.bf16.msra.mxu0 %v7366_v46  ;;  %v3961_v23 = vpack.c.bf16 %v9185_v55, %v9185_v55 }
 0x543   : > { %v6904_v26 = vpop.f32.mrf.mxu1  ;;  %5963 = vmatpush1.bf16.msra.mxu1 %v7369_v45  ;;  %5991 = vmatprep.subr.bf16.mxu0 %v7374_v61  ;;  %v3409_v45 = vpack.c.bf16 %v9112_v19, %v9112_v19 }
 0x544   : > { %5964 = vmatprep.subr.bf16.mxu1 %v7377_v1 }
 0x545   : > { %v3958_v4 = vpop.f32.mrf.mxu1 }
 0x547   : > { %v6905_v9 = vpop.f32.mrf.mxu1  ;;  %5965 = vmatpush2.bf16.msra.mxu1 %v7375_v54 }
 0x549   : > { %v9187_v58 = vpop.f32.mrf.mxu1 }
 0x54b   : > { %v6916_v13 = vpop.f32.mrf.mxu1 }
 0x54c   : > { %v7383_v13 = vld [vmem:[#allocation5 + $0x3c4] ss:$16 sps:$4 sm:$0xff]  }
 0x54d   : > { %v4063_v8 = vpop.f32.mrf.mxu1  ;;  %5966 = vmatprep.subr.bf16.mxu1 %v7383_v13  ;;  %v7380_v13 = vld [vmem:[#allocation5 + $0xcc] ss:$16 sps:$4 sm:$0xff]  }
 0x54e   : > { %5967 = vmatpush2.bf16.msra.mxu1 %v7381_v12 }
 0x54f   : > { %v6917_v62 = vpop.f32.mrf.mxu1  ;;  %5968 = vmatprep.subr.bf16.mxu1 %v7389_v18 }
 0x550   : > { %v7387_v62 = vld [vmem:[#allocation5 + $0x3a0] ss:$16 sps:$4 sm:$0xff]  }
 0x552   : > { %v9189_v27 = vpop.f32.mrf.mxu1  ;;  %5969 = vmatpush2.bf16.msra.mxu1 %v7387_v62  ;;  %v7390_v62 = vld [vmem:[#allocation5 + $0x88] ss:$16 sps:$4 sm:$0xff]  }
 0x554   : > { %v6928_v2 = vpop.f32.mrf.mxu1 }
 0x556   : > { %v4177_v11 = vpop.f32.mrf.mxu1 }
 0x557   : > { %v7395_v11 = vld [vmem:[#allocation5 + $0x384] ss:$16 sps:$4 sm:$0xff]  }
 0x558   : > { %v6929_v7 = vpop.f32.mrf.mxu1  ;;  %5970 = vmatprep.subr.bf16.mxu1 %v7395_v11  ;;  %v3847_v11 = vpack.c.bf16 %v9183_v48, %v9183_v48 }
 0x559   : > { %5971 = vmatpush2.bf16.msra.mxu1 %v7393_v24 }
 0x55a   : > { %v9191_v56 = vpop.f32.mrf.mxu1  ;;  %5972 = vmatprep.subr.bf16.mxu1 %v7401_v15  ;;  %v7404_v15 = vld [vmem:[#allocation5 + $0x4c] ss:$16 sps:$4 sm:$0xff]  }
 0x55b   : > { %v4315_v60 = vpack.c.bf16 %v9191_v56, %v9191_v56  ;;  %v3628_v56 = vpack.c.bf16 %v9180_v32, %v9180_v32  ;;  %v7392_v32 = vld [vmem:[#allocation5 + $0x8c] ss:$16 sps:$4 sm:$0xff]  }
 0x55c   : > { %v6940_v0 = vpop.f32.mrf.mxu1 }
 0x55d   : > { %5973 = vmatpush2.bf16.msra.mxu1 %v7399_v34 }
 0x55e   : > { %v4312_v51 = vpop.f32.mrf.mxu1 }
 0x55f   : > { %v7405_v51 = vld [vmem:[#allocation5 + $0x340] ss:$16 sps:$4 sm:$0xff]  }
 0x560   : > { %v6941_v39 = vpop.f32.mrf.mxu1 }
 0x561   : > { %v7407_v39 = vld [vmem:[#allocation5 + $0x344] ss:$16 sps:$4 sm:$0xff]  }
 0x562   : > { %5974 = vmatprep.subr.bf16.mxu1 %v7407_v39  ;;  %v7408_v39 = vld [vmem:[#allocation5 + $0x28] ss:$16 sps:$4 sm:$0xff]  }
 0x563   : > { %5975 = vmatpush2.bf16.msra.mxu1 %v7405_v51  ;;  %v7410_v51 = vld [vmem:[#allocation5 + $0x2c] ss:$16 sps:$4 sm:$0xff]  }
 0x564   : > { %5976 = vmatprep.subr.bf16.mxu1 %v7413_v42 }
 0x567   : > { %5977 = vmatpush2.bf16.msra.mxu1 %v7411_v52  ;;  %v7422_v52 = vld [vmem:[#allocation5 + $0x1ec] ss:$16 sps:$4 sm:$0xff]  }
 0x568   : > { %5978 = vmatprep.subr.bf16.mxu1 %v7419_v53 }
 0x56b   : > { %5979 = vmatpush2.bf16.msra.mxu1 %v7417_v30 }
 0x56c   : > { %6034 = vmatprep.subr.bf16.mxu1 %v7425_v6  ;;  %v7423_v6 = vld [vmem:[#allocation5 + $0x2e8] ss:$16 sps:$4 sm:$0xff]  }
 0x57f   : > { %v4415_v28 = vpop.f32.mrf.mxu1 }
 0x580   : > { %v4421_v31 = vpack.c.bf16 %v4415_v28, %v4415_v28 }
 0x581   : > { %v6952_v50 = vpop.f32.mrf.mxu1 }
 0x582   : > { %5071 = vrot.lane.b32.xlu0 %v4421_v31, %s7687_s21  ;;  %v4180_v50 = vpack.c.bf16 %v9189_v27, %v9189_v27 }
 0x583   : > { %v4418_v59 = vpop.f32.mrf.mxu1 }
 0x584   : > { %v4183_v59 = vpop.permute.xlu0 %4182 }
 0x585   : > { %v6953_v35 = vpop.f32.mrf.mxu1  ;;  %v4195_v61 = vsel %vm3302_vm0, %v3409_v45, %v4183_v59  ;;  %v7443_v59 = vld [vmem:[#allocation5 + $0x28c] ss:$16 sps:$4 sm:$0xff]  }
 0x586   : > { %v7449_v45 = vld [vmem:[#allocation5 + $0x26c] ss:$16 sps:$4 sm:$0xff]  }
 0x587   : > { %v9194_v57 = vpop.f32.mrf.mxu1 }
 0x589   : > { %v6964_v26 = vpop.f32.mrf.mxu1 }
 0x58b   : > { %v4528_v4 = vpop.f32.mrf.mxu1 }
 0x58c   : > { %v4531_v4 = vpack.c.bf16 %v9194_v57, %v9194_v57  ;;  %v7386_v57 = vld [vmem:[#allocation5 + $0xac] ss:$16 sps:$4 sm:$0xff]  }
 0x58d   : > { %v6965_v9 = vpop.f32.mrf.mxu1 }
 0x58f   : > { %v4631_v10 = vpop.f32.mrf.mxu1 }
 0x590   : > { %v4637_v8 = vpack.c.bf16 %v4631_v10, %v4631_v10  ;;  %v7372_v10 = vld [vmem:[#allocation5 + $0xe8] ss:$16 sps:$4 sm:$0xff]  }
 0x591   : > { %v6976_v29 = vpop.f32.mrf.mxu1 }
 0x592   : > { %5074 = vrot.lane.b32.xlu0 %v4637_v8, %s7687_s21  ;;  %v7378_v8 = vld [vmem:[#allocation5 + $0xc8] ss:$16 sps:$4 sm:$0xff]  }
 0x593   : > { %v4634_v14 = vpop.f32.mrf.mxu1  ;;  %v7384_v29 = vld [vmem:[#allocation5 + $0xa8] ss:$16 sps:$4 sm:$0xff]  }
 0x595   : > { %v6977_v20 = vpop.f32.mrf.mxu1 }
 0x596   : > { %v7398_v20 = vld [vmem:[#allocation5 + $0x6c] ss:$16 sps:$4 sm:$0xff]  }
 0x597   : > { %v9197_v2 = vpop.f32.mrf.mxu1 }
 0x598   : > { %v4747_v14 = vpack.c.bf16 %v9197_v2, %v9197_v2 }
 0x599   : > { %v6988_v22 = vpop.f32.mrf.mxu1 }
 0x59a   : > { %v7396_v22 = vld [vmem:[#allocation5 + $0x68] ss:$16 sps:$4 sm:$0xff]  }
 0x59b   : > { %v4744_v7 = vpop.f32.mrf.mxu1 }
 0x59d   : > { %v6989_v0 = vpop.f32.mrf.mxu1 }
 0x59f   : > { %v4847_v38 = vpop.f32.mrf.mxu1 }
 0x5a0   : > { %v4853_v5 = vpack.c.bf16 %v4847_v38, %v4847_v38  ;;  %v7402_v38 = vld [vmem:[#allocation5 + $0x48] ss:$16 sps:$4 sm:$0xff]  }
 0x5a1   : > { %v7000_v16 = vpop.f32.mrf.mxu1 }
 0x5a2   : > { %5077 = vrot.lane.b32.xlu1 %v4853_v5, %s7687_s21  ;;  %v7416_v5 = vld [vmem:[#allocation5 + $0xc] ss:$16 sps:$4 sm:$0xff]   ;;  %v7414_v16 = vld [vmem:[#allocation5 + $0x8] ss:$16 sps:$4 sm:$0xff]  }
 0x5a3   : > { %v4850_v49 = vpop.f32.mrf.mxu1 }
 0x5a5   : > { %v7001_v3 = vpop.f32.mrf.mxu1 }
 0x5a6   : > { %4188 = vrot.lane.b32.xlu1 %v3961_v23, %s7687_s21  ;;  %v4186_v35 = vpop.permute.xlu0 %4185  ;;  %v4066_v23 = vpack.c.bf16 %v9187_v58, %v9187_v58  ;;  %v7420_v3 = vld [vmem:[#allocation5 + $0x1e8] ss:$16 sps:$4 sm:$0xff]  }
 0x5a7   : > { %v9203_v33 = vpop.f32.mrf.mxu1  ;;  %v4198_v19 = vsel %vm3302_vm0, %v3628_v56, %v4186_v35  ;;  %v7429_v58 = vld [vmem:[#allocation5 + $0x2c8] ss:$16 sps:$4 sm:$0xff]   ;;  %v7458_v56 = vld [vmem:[#allocation5 + $0x12c] ss:$16 sps:$4 sm:$0xff]  }
 0x5a8   : > { %v4963_v48 = vpack.c.bf16 %v9203_v33, %v9203_v33  ;;  %v7438_v35 = vld [vmem:[#allocation5 + $0x188] ss:$16 sps:$4 sm:$0xff]  }
 0x5a9   : > { %v7012_v37 = vpop.f32.mrf.mxu1 }
 0x5aa   : > { %v7428_v37 = vld [vmem:[#allocation5 + $0x1cc] ss:$16 sps:$4 sm:$0xff]  }
 0x5ab   : > { %v4960_v41 = vpop.f32.mrf.mxu1 }
 0x5ad   : > { %v7013_v47 = vpop.f32.mrf.mxu1 }
 0x5ae   : > { %v7431_v47 = vld [vmem:[#allocation5 + $0x2cc] ss:$16 sps:$4 sm:$0xff]  }
 0x5af   : > { %v5063_v28 = vpop.f32.mrf.mxu1 }
 0x5b0   : > { %v5069_v31 = vpack.c.bf16 %v5063_v28, %v5063_v28  ;;  %v7426_v28 = vld [vmem:[#allocation5 + $0x1c8] ss:$16 sps:$4 sm:$0xff]  }
 0x5b1   : > { %v7024_v44 = vpop.f32.mrf.mxu1 }
 0x5b2   : > { %5080 = vrot.lane.b32.xlu0 %v5069_v31, %s7687_s21  ;;  %v7434_v31 = vld [vmem:[#allocation5 + $0x1ac] ss:$16 sps:$4 sm:$0xff]  }
 0x5b3   : > { %v5066_v55 = vpop.f32.mrf.mxu1  ;;  %v7437_v44 = vld [vmem:[#allocation5 + $0x2ac] ss:$16 sps:$4 sm:$0xff]  }
 0x5b4   : > { %v7432_v55 = vld [vmem:[#allocation5 + $0x1a8] ss:$16 sps:$4 sm:$0xff]  }
 0x5b5   : > { %v7025_v43 = vpop.f32.mrf.mxu1 }
 0x5b6   : > { %4191 = vrot.lane.b32.xlu0 %v4180_v50, %s7687_s21  ;;  %v7440_v50 = vld [vmem:[#allocation5 + $0x18c] ss:$16 sps:$4 sm:$0xff]   ;;  %v7435_v43 = vld [vmem:[#allocation5 + $0x2a8] ss:$16 sps:$4 sm:$0xff]   ;;  %s7618_s21 = scalar_lea.vmem %s7617_s14, 2048 }
 0x5b7   : > { %p7620_p0 = scmp.lt.s32.totalorder %s7618_s21, %s7612_s28 }
 0x5b9   : > { %p7621_p1 = por %p7620_p0, %p7619_p11 }
 0x5bb   : > { %p7622_p3 = pnand %p7621_p1, %p7615_p8 }
 0x5f4   : > { %v5072_v46 = vpop.permute.xlu0 %5071 }
 0x5f5   : > { %v5084_v63 = vsel %vm3302_vm0, %v4315_v60, %v5072_v46  ;;  %v7446_v60 = vld [vmem:[#allocation5 + $0x16c] ss:$16 sps:$4 sm:$0xff]   ;;  %v7441_v46 = vld [vmem:[#allocation5 + $0x288] ss:$16 sps:$4 sm:$0xff]  }
 0x5f6   : > { %v5098_v26 = vrot.slane %v5084_v63, 4  ;;  %v7444_v63 = vld [vmem:[#allocation5 + $0x168] ss:$16 sps:$4 sm:$0xff]  }
 0x5f8   : > { %v9216_v27 = vsel %vm5102_vm5, %v4195_v61, %v5098_v26  ;;  %v7452_v26 = vld [vmem:[#allocation5 + $0x14c] ss:$16 sps:$4 sm:$0xff]   ;;  %v7447_v61 = vld [vmem:[#allocation5 + $0x268] ss:$16 sps:$4 sm:$0xff]  }
 0x604   : > { %v5075_v54 = vpop.permute.xlu0 %5074 }
 0x605   : > { %v5087_v1 = vsel %vm3302_vm0, %v4531_v4, %v5075_v54  ;;  %v7455_v4 = vld [vmem:[#allocation5 + $0x24c] ss:$16 sps:$4 sm:$0xff]   ;;  %v7450_v54 = vld [vmem:[#allocation5 + $0x148] ss:$16 sps:$4 sm:$0xff]  }
 0x606   : > { %v5099_v9 = vrot.slane %v5087_v1, 4  ;;  %v7453_v1 = vld [vmem:[#allocation5 + $0x248] ss:$16 sps:$4 sm:$0xff]  }
 0x608   : > { %v5107_v12 = vsel %vm5102_vm5, %v4198_v19, %v5099_v9  ;;  %v7461_v9 = vld [vmem:[#allocation5 + $0x22c] ss:$16 sps:$4 sm:$0xff]   ;;  %v7456_v19 = vld [vmem:[#allocation5 + $0x128] ss:$16 sps:$4 sm:$0xff]  }
 0x609   : > { %5937 = vmatprep.mubr.bf16.mxu0 %v5107_v12 }
 0x60a   : > { %5938 = vmatmul.mubr.bf16.vlgmr.msra.gmra.mxu0 %v9216_v27 }
 0x60b   : > { %5992 = vmatpush1.bf16.msra.mxu0 %v7372_v10  ;;  %6023 = vmatprep.mubr.bf16.mxu0 %v5107_v12  ;;  %v7464_v10 = vld [vmem:[#allocation5 + $0x10c] ss:$16 sps:$4 sm:$0xff]   ;;  %v7459_v12 = vld [vmem:[#allocation5 + $0x228] ss:$16 sps:$4 sm:$0xff]  }
 0x60c   : > { %5993 = vmatprep.subr.bf16.mxu0 %v7380_v13  ;;  %v7467_v13 = vld [vmem:[#allocation5 + $0x20c] ss:$16 sps:$4 sm:$0xff]  }
 0x60f   : > { %5994 = vmatpush1.bf16.msra.mxu0 %v7378_v8  ;;  %v7462_v8 = vld [vmem:[#allocation5 + $0x108] ss:$16 sps:$4 sm:$0xff]  }
 0x610   : > { %5995 = vmatprep.subr.bf16.mxu0 %v7386_v57  ;;  %v7465_v57 = vld [vmem:[#allocation5 + $0x208] ss:$16 sps:$4 sm:$0xff]  }
 0x613   : > { %5996 = vmatpush1.bf16.msra.mxu0 %v7384_v29  ;;  %v7470_v29 = vld [vmem:[#allocation5 + $0x3ec] ss:$16 sps:$4 sm:$0xff]  }
 0x614   : > { %v5078_v18 = vpop.permute.xlu1 %5077  ;;  %5997 = vmatprep.subr.bf16.mxu0 %v7392_v32  ;;  %v7468_v32 = vld [vmem:[#allocation5 + $0x3e8] ss:$16 sps:$4 sm:$0xff]  }
 0x615   : > { %v5090_v24 = vsel %vm3302_vm0, %v4747_v14, %v5078_v18  ;;  %v7473_v14 = vld [vmem:[#allocation5 + $0x3cc] ss:$16 sps:$4 sm:$0xff]  }
 0x616   : > { %v5100_v7 = vrot.slane %v5090_v24, 4  ;;  %v7476_v18 = vld [vmem:[#allocation5 + $0x3ac] ss:$16 sps:$4 sm:$0xff]  }
 0x617   : > { %5998 = vmatpush1.bf16.msra.mxu0 %v7390_v62  ;;  %v7471_v62 = vld [vmem:[#allocation5 + $0x3c8] ss:$16 sps:$4 sm:$0xff]   ;;  %v7479_v24 = vld [vmem:[#allocation5 + $0x38c] ss:$16 sps:$4 sm:$0xff]  }
 0x618   : > { %v4189_v34 = vpop.permute.xlu1 %4188  ;;  %5999 = vmatprep.subr.bf16.mxu0 %v7398_v20  ;;  %v7474_v20 = vld [vmem:[#allocation5 + $0x3a8] ss:$16 sps:$4 sm:$0xff]  }
 0x619   : > { %v4201_v0 = vsel %vm3302_vm0, %v3847_v11, %v4189_v34  ;;  %v7477_v11 = vld [vmem:[#allocation5 + $0x388] ss:$16 sps:$4 sm:$0xff]   ;;  %v7485_v34 = vld [vmem:[#allocation5 + $0x34c] ss:$16 sps:$4 sm:$0xff]  }
 0x61a   : > { %v9233_v2 = vsel %vm5102_vm5, %v4201_v0, %v5100_v7  ;;  %v7480_v7 = vld [vmem:[#allocation5 + $0x368] ss:$16 sps:$4 sm:$0xff]  }
 0x61b   : > { %6000 = vmatpush1.bf16.msra.mxu0 %v7396_v22  ;;  %v7482_v22 = vld [vmem:[#allocation5 + $0x36c] ss:$16 sps:$4 sm:$0xff]   ;;  %v7486_v0 = vld [vmem:[#allocation5 + $0x328] ss:$16 sps:$4 sm:$0xff]  }
 0x61c   : > { %6001 = vmatprep.subr.bf16.mxu0 %v7404_v15  ;;  %v7488_v15 = vld [vmem:[#allocation5 + $0x32c] ss:$16 sps:$4 sm:$0xff]  }
 0x61f   : > { %6002 = vmatpush1.bf16.msra.mxu0 %v7402_v38  ;;  %v7491_v38 = vld [vmem:[#allocation5 + $0x30c] ss:$16 sps:$4 sm:$0xff]  }
 0x620   : > { %6003 = vmatprep.subr.bf16.mxu0 %v7410_v51  ;;  %v7489_v51 = vld [vmem:[#allocation5 + $0x308] ss:$16 sps:$4 sm:$0xff]  }
 0x623   : > { %6004 = vmatpush1.bf16.msra.mxu0 %v7408_v39 }
 0x624   : > { %v5081_v49 = vpop.permute.xlu0 %5080  ;;  %6005 = vmatprep.subr.bf16.mxu0 %v7416_v5  ;;  %v5243_v5 = vld [vmem:[%s9326_s6] sm:$0xf] }
 0x625   : > { %v5093_v42 = vsel %vm3302_vm0, %v4963_v48, %v5081_v49  ;;  %v5252_v49 = vrot.slane %v5243_v5, %v466_v40 }
 0x626   : > { %v5101_v30 = vrot.slane %v5093_v42, 4 }
 0x627   : > { %6006 = vmatpush1.bf16.msra.mxu0 %v7414_v16  ;;  %v5248_v16 = vrot.slane %v5243_v5, %v462_v36 }
 0x628   : > { %v4192_v53 = vpop.permute.xlu0 %4191  ;;  %6007 = vmatprep.subr.bf16.mxu0 %v7422_v52 }
 0x629   : > { %v4204_v41 = vsel %vm3302_vm0, %v4066_v23, %v4192_v53 }
 0x62a   : > { %v5113_v33 = vsel %vm5102_vm5, %v4204_v41, %v5101_v30 }
 0x62b   : > { %6008 = vmatpush2.bf16.msra.mxu0 %v7420_v3  ;;  %5980 = vmatprep.mubr.bf16.mxu1 %v5113_v33 }
 0x62c   : > { %5981 = vmatmul.mubr.bf16.vlgmr.msra.gmra.mxu1 %v9233_v2  ;;  %6009 = vmatprep.subr.bf16.mxu0 %v7428_v37 }
 0x62d   : > { %6035 = vmatpush1.bf16.msra.mxu1 %v7423_v6  ;;  %6066 = vmatprep.mubr.bf16.mxu1 %v5113_v33 }
 0x62e   : > { %6036 = vmatprep.subr.bf16.mxu1 %v7431_v47 }
 0x62f   : > { %6010 = vmatpush2.bf16.msra.mxu0 %v7426_v28 }
 0x630   : > { %6011 = vmatprep.subr.bf16.mxu0 %v7434_v31 }
 0x631   : > { %6037 = vmatpush1.bf16.msra.mxu1 %v7429_v58  ;;  %v5256_v58 = vrot.slane %v5243_v5, %v470_v17 }
 0x632   : > { %6038 = vmatprep.subr.bf16.mxu1 %v7437_v44  ;;  %v5260_v44 = vrot.slane %v5243_v5, %v474_v21 }
 0x633   : > { %6012 = vmatpush2.bf16.msra.mxu0 %v7432_v55 }
 0x634   : > { %6013 = vmatprep.subr.bf16.mxu0 %v7440_v50 }
 0x635   : > { %6039 = vmatpush1.bf16.msra.mxu1 %v7435_v43 }
 0x636   : > { %6040 = vmatprep.subr.bf16.mxu1 %v7443_v59 }
 0x637   : > { %6014 = vmatpush2.bf16.msra.mxu0 %v7438_v35 }
 0x638   : > { %6015 = vmatprep.subr.bf16.mxu0 %v7446_v60 }
 0x639   : > { %6041 = vmatpush1.bf16.msra.mxu1 %v7441_v46 }
 0x63a   : > { %6042 = vmatprep.subr.bf16.mxu1 %v7449_v45 }
 0x63b   : > { %6016 = vmatpush2.bf16.msra.mxu0 %v7444_v63 }
 0x63c   : > { %6017 = vmatprep.subr.bf16.mxu0 %v7452_v26 }
 0x63d   : > { %6043 = vmatpush1.bf16.msra.mxu1 %v7447_v61 }
 0x63e   : > { %6044 = vmatprep.subr.bf16.mxu1 %v7455_v4 }
 0x63f   : > { %6018 = vmatpush2.bf16.msra.mxu0 %v7450_v54 }
 0x640   : > { %6019 = vmatprep.subr.bf16.mxu0 %v7458_v56 }
 0x641   : > { %6045 = vmatpush1.bf16.msra.mxu1 %v7453_v1 }
 0x642   : > { %6046 = vmatprep.subr.bf16.mxu1 %v7461_v9 }
 0x643   : > { %6020 = vmatpush2.bf16.msra.mxu0 %v7456_v19 }
 0x644   : > { %6021 = vmatprep.subr.bf16.mxu0 %v7464_v10 }
 0x645   : > { %6047 = vmatpush1.bf16.msra.mxu1 %v7459_v12 }
 0x646   : > { %6048 = vmatprep.subr.bf16.mxu1 %v7467_v13 }
 0x647   : > { %6022 = vmatpush2.bf16.msra.mxu0 %v7462_v8 }
 0x649   : > { %6049 = vmatpush1.bf16.msra.mxu1 %v7465_v57 }
 0x64a   : > { %6024 = vmatmul.mubr.bf16.vlgmr.msra.gmra.mxu0 %v9216_v27  ;;  %6050 = vmatprep.subr.bf16.mxu1 %v7470_v29  ;;  %v7483_v27 = vld [vmem:[#allocation5 + $0x348] ss:$16 sps:$4 sm:$0xff]  }
 0x64d   : > { %6051 = vmatpush2.bf16.msra.mxu1 %v7468_v32 }
 0x64e   : > { %6052 = vmatprep.subr.bf16.mxu1 %v7473_v14 }
 0x651   : > { %6053 = vmatpush2.bf16.msra.mxu1 %v7471_v62 }
 0x652   : > { %6054 = vmatprep.subr.bf16.mxu1 %v7476_v18 }
 0x655   : > { %6055 = vmatpush2.bf16.msra.mxu1 %v7474_v20 }
 0x656   : > { %6056 = vmatprep.subr.bf16.mxu1 %v7479_v24 }
 0x659   : > { %6057 = vmatpush2.bf16.msra.mxu1 %v7477_v11 }
 0x65a   : > { %6058 = vmatprep.subr.bf16.mxu1 %v7482_v22 }
 0x65d   : > { %6059 = vmatpush2.bf16.msra.mxu1 %v7480_v7 }
 0x65e   : > { %6060 = vmatprep.subr.bf16.mxu1 %v7485_v34 }
 0x661   : > { %6061 = vmatpush2.bf16.msra.mxu1 %v7483_v27 }
 0x662   : > { %6062 = vmatprep.subr.bf16.mxu1 %v7488_v15 }
 0x665   : > { %6063 = vmatpush2.bf16.msra.mxu1 %v7486_v0 }
 0x666   : > { %6064 = vmatprep.subr.bf16.mxu1 %v7491_v38 }
 0x669   : > { %6065 = vmatpush2.bf16.msra.mxu1 %v7489_v51 }
 0x66c   : > { %6067 = vmatmul.mubr.bf16.vlgmr.msra.gmra.mxu1 %v9233_v2 }
 0x6ca   : > { %v5939_v39 = vpop.f32.mrf.mxu0 }
 0x6cb   : > { %v5940_v42 = vadd.f32 %v5939_v39, %v5248_v16 }
 0x6cc   : > { %v5941_v48 = vpop.f32.mrf.mxu0 }
 0x6cd   : > { %v5942_v3 = vadd.f32 %v5941_v48, %v5252_v49 }
 0x6ce   : > { %v5943_v52 = vpop.f32.mrf.mxu0 }
 0x6cf   : > { %v5944_v37 = vadd.f32 %v5943_v52, %v5248_v16 }
 0x6d0   : > { %v5945_v30 = vpop.f32.mrf.mxu0 }
 0x6d1   : > { %v5946_v40 = vadd.f32 %v5945_v30, %v5252_v49 }
 0x6ec   : > { %v5982_v23 = vpop.f32.mrf.mxu1 }
 0x6ed   : > { %v5983_v2 = vadd.f32 %v5982_v23, %v5940_v42 }
 0x6ee   : > { %v5984_v53 = vpop.f32.mrf.mxu1 }
 0x6ef   : > { %6077 = vst [vmem:[%s9255_s19] sm:$0xff] %v5983_v2  ;;  %v5985_v36 = vadd.f32 %v5984_v53, %v5942_v3 }
 0x6f0   : > { %v5986_v41 = vpop.f32.mrf.mxu1 }
 0x6f1   : > { %6078 = vst [vmem:[%s9255_s19 + $0x8] sm:$0xff] %v5985_v36  ;;  %v5987_v6 = vadd.f32 %v5986_v41, %v5944_v37 }
 0x6f2   : > { %v5988_v33 = vpop.f32.mrf.mxu1 }
 0x6f3   : > { %6081 = vst [vmem:[%s9255_s19 + $0x20] sm:$0xff] %v5987_v6  ;;  %v5989_v47 = vadd.f32 %v5988_v33, %v5946_v40 }
 0x6f5   : > { %6082 = vst [vmem:[%s9255_s19 + $0x28] sm:$0xff] %v5989_v47 }
 0x70a   : > { %v6025_v28 = vpop.f32.mrf.mxu0 }
 0x70b   : > { %v6026_v50 = vadd.f32 %v6025_v28, %v5256_v58 }
 0x70c   : > { %v6027_v31 = vpop.f32.mrf.mxu0 }
 0x70d   : > { %v6028_v59 = vadd.f32 %v6027_v31, %v5260_v44 }
 0x70e   : > { %v6029_v55 = vpop.f32.mrf.mxu0 }
 0x70f   : > { %v6030_v45 = vadd.f32 %v6029_v55, %v5256_v58 }
 0x710   : > { %v6031_v60 = vpop.f32.mrf.mxu0 }
 0x711   : > { %v6032_v25 = vadd.f32 %v6031_v60, %v5260_v44 }
 0x72c   : > { %v6068_v43 = vpop.f32.mrf.mxu1 }
 0x72d   : > { %v6069_v35 = vadd.f32 %v6068_v43, %v6026_v50 }
 0x72e   : > { %v6070_v46 = vpop.f32.mrf.mxu1 }
 0x72f   : > { %6079 = vst [vmem:[%s9255_s19 + $0x10] sm:$0xff] %v6069_v35  ;;  %v6071_v63 = vadd.f32 %v6070_v46, %v6028_v59 }
 0x730   : > { %v6072_v17 = vpop.f32.mrf.mxu1 }
 0x731   : > { %6080 = vst [vmem:[%s9255_s19 + $0x18] sm:$0xff] %v6071_v63  ;;  %v6073_v21 = vadd.f32 %v6072_v17, %v6030_v45 }
 0x732   : > { %v6074_v26 = vpop.f32.mrf.mxu1 }
 0x733   : > { %6083 = vst [vmem:[%s9255_s19 + $0x30] sm:$0xff] %v6073_v21  ;;  %v6075_v61 = vadd.f32 %v6074_v26, %v6032_v25 }
 0x735   : > { %6084 = vst [vmem:[%s9255_s19 + $0x38] sm:$0xff] %v6075_v61 }
 0x736   : > { %7625 = shalt.err (!%p7622_p3)
}
 0x737   : > { %s7626_s15 = scalar_lea.hbm %s9275_s8, 1024  ;;  %s7630_s18 = scalar_lea.hbm %s9327_s7, 6144 }
 0x738   : > { %p7627_p2 = scmp.ne.s32.totalorder %s9275_s8, %s7626_s15  ;;  %p7631_p7 = scmp.lt.s32.totalorder %s9275_s8, %s9327_s7 }
 0x739   : > { %p7632_p6 = scmp.lt.s32.totalorder %s7630_s18, %s7626_s15 }
 0x73a   : > { %p7628_p4 = pnand %p7627_p2, %p7770_p5 }
 0x73b   : > { %p7633_p9 = por %p7632_p6, %p7631_p7 }
 0x73c   : > { %p7629_p13 = pneg %p7628_p4 }
 0x73e   : > { %p7634_p10 = pnand %p7633_p9, %p7629_p13 }
 0x740   : > { %7637 = shalt.err (!%p7634_p10)
}
 0x741   : > { %s7690_s23 = smov 512   ;;  %s7691_s29 = smov 32  }
 0x742   : > { %7035 = dma.vmem_to_hbm [thread:$0]  (%p7770_p5), %s9269_s20, 1024, %s9275_s8, %s9280_s9, %s7690_s23, %s7690_s23, %s7691_s29  }
 0x743 PF: > { %p7052_p12 = scmp.ge.s32.totalorder %s7680_s27, 2  ;;  %s6114_s28 = sand.u32 1, %s7668_s24  }
 0x744   : > { %p9337_p8 = scmp.ne.s32.totalorder %s9330_s12, 0  ;;  %s6115_s13 = scalar_lea.sflag [#allocation4], %s6114_s28 }
 0x746   : > { %p7045_p11 = pnand %p7052_p12, %p9337_p8 }
 0x748   : > { %p7046_p0 = pneg %p7045_p11 }
 0x74a   : > { %7663 = dma.done.wait (%p7046_p0), %s6115_s13, 1024  }
 0x74b   : > { %7665 = vsyncadd (%p7046_p0), %s6115_s13, 4294966272  ;;  %p19_p1 = scmp.ge.s32.totalorder %s7757_s30, 8   ;;  %s9338_s24 = smov %s7672_s25 }
 0x74c   : > { %s9339_s25 = smov %s7676_s26  ;;  %s9340_s26 = smov %s7768_s10 }
 0x74d   : > { %s9341_s27 = smov %s7757_s30  ;;  %21 = sbr.rel (!%p19_p1) target bundleno = 5 (0x5), region = 95 }
 0x752   :  { %6120 = vsyncpa [#allocation3], 1 }
 0x753   :  { %6122 = vsyncpa [#allocation3 + $0x1], 1 }
 0x754   :  { %6123 = vsyncpa [#allocation6], 1 }
 0x755   :  { %6124 = vsyncpa [#allocation4], 1 }
 0x756   :  { %6126 = vsyncpa [#allocation4 + $0x1], 1 }

</bundles_post_ra>
